<compile_context>
chip_gen: v7x
topology: tpu7x:2x2x1
jax: 0.10.0
libtpu: 0.0.40
codegen_flags: <defaults>
</compile_context>

<pallas_src>
import functools

import jax
import jax.numpy as jnp
from jax import lax
from jax.experimental import pallas as pl
from jax.experimental.pallas import tpu as pltpu


def _silu(x):
    # x * sigmoid(x); reciprocal on the EUP slot (frees VALU in a VPU-bound kernel).
    return x * pl.reciprocal(1.0 + jnp.exp(-x), approx=True)


# ----------------------------------------------------------------------------
# Pallas kernel: fused depthwise kxk + BN + SiLU  ->  1x1 conv + BN + SiLU
# ----------------------------------------------------------------------------
def _dwsep_kernel(xb_ref, xt_ref, xbot_ref, wdw_ref, bdw_ref, wpw_ref, bpw_ref,
                  o_ref, xw_ref, *, ksize, wchunk):
    # xb_ref  : (1, tH,  W, C)   row band of the image
    # xt_ref  : (1, pad, W, C)   halo rows above the band (garbage at band 0)
    # xbot_ref: (1, pad, W, C)   halo rows below the band (garbage at last band)
    # wdw_ref : (k*k, C)         BN-folded depthwise weights, tap-major
    # bdw_ref : (1, C)           BN-folded depthwise bias
    # wpw_ref : (C, C)  bf16     BN-folded pointwise weights (Cin, Cout)
    # bpw_ref : (1, C)           BN-folded pointwise bias
    # o_ref   : (1, tH, W, C)    output row band
    # xw_ref  : (tH+2p, W+2p, C) per-band padded-window scratch (VMEM)
    pad = (ksize - 1) // 2
    _, tH, W, C = o_ref.shape

    b = pl.program_id(1)
    is_first = b == 0
    is_last = b == pl.num_programs(1) - 1

    # ---- assemble the padded window: zero only the halo rows/cols ---------
    zcol = jnp.zeros((tH + 2 * pad, pad, C), jnp.float32)
    xw_ref[:, 0:pad, :] = zcol                      # left  halo columns
    xw_ref[:, pad + W:, :] = zcol                   # right halo columns
    xw_ref[0:pad, pad:pad + W, :] = jnp.where(      # top halo rows (zero at band 0)
        is_first, 0.0, xt_ref[0].astype(jnp.float32))
    xw_ref[pad + tH:, pad:pad + W, :] = jnp.where(  # bottom halo rows (zero at last)
        is_last, 0.0, xbot_ref[0].astype(jnp.float32))
    xw_ref[pad:pad + tH, pad:pad + W, :] = xb_ref[0].astype(jnp.float32)

    # ---- hoisted weight / bias loads ---------------------------------------
    w_dw = wdw_ref[...]            # (k*k, C) f32
    b_dw = bdw_ref[0, :]           # (C,)
    w_pw = wpw_ref[...]            # (C, C) bf16
    b_pw = bpw_ref[0, :]           # (C,)

    # ---- W-chunked depthwise accumulation + fused pointwise matmul ---------
    for ws in range(0, W, wchunk):
        wc = min(wchunk, W - ws)
        acc = jnp.zeros((tH, wc, C), jnp.float32)
        for dy in range(ksize):
            # one slab load per dy; dx shifts are register slices of the slab
            slab = xw_ref[dy:dy + tH, ws:ws + wc + 2 * pad, :]   # (tH, wc+2p, C)
            for dx in range(ksize):
                acc = acc + slab[:, dx:dx + wc, :] * w_dw[dy * ksize + dx, :]
        h = _silu(acc + b_dw)                                    # SiLU, f32

        # 1x1 conv on the MXU: bf16 inputs, f32 accumulation.
        hm = h.reshape(tH * wc, C).astype(jnp.bfloat16)
        y = jnp.dot(hm, w_pw, preferred_element_type=jnp.float32)
        y = _silu(y + b_pw)                                      # SiLU, f32
        o_ref[0, :, ws:ws + wc, :] = y.reshape(tH, wc, C).astype(o_ref.dtype)


# ----------------------------------------------------------------------------
# Wrapper
# ----------------------------------------------------------------------------
def _pick_band_rows(H, pad, cap=64):
    """Largest divisor of H that is <= cap and a multiple of pad."""
    best = None
    for t in range(1, min(H, cap) + 1):
        if H % t == 0 and t % pad == 0:
            best = t
    return best if best is not None else H


@functools.partial(jax.jit, static_argnames=("ksize", "band_rows"))
def dwsep_forward(x_nchw, w_dw_taps, b_dw, w_pw_mat, b_pw, *, ksize,
                  band_rows=None):
    """x_nchw: (N, C, H, W) f32; weights already BN-folded (pack_kernel_weights)."""
    N, C, H, W = x_nchw.shape
    assert ksize % 2 == 1 and ksize >= 3, "odd kernel size >= 3 expected"
    pad = (ksize - 1) // 2

    # NHWC, channels on the 128-lane axis.
    # TODO(synk): keep activations NHWC end-to-end in a real pipeline.
    x = jnp.transpose(x_nchw, (0, 2, 3, 1))

    # Lane-dense channel count (multiple of 128) so output stores are not
    # masked partial stores.  No-op for production channel counts.
    Cp = max(128, ((C + 127) // 128) * 128)
    if Cp != C:
        x = jnp.pad(x, ((0, 0), (0, 0), (0, 0), (0, Cp - C)))
        w_dw_taps = jnp.pad(w_dw_taps, ((0, 0), (0, Cp - C)))
        b_dw = jnp.pad(b_dw, (0, Cp - C))
        w_pw_mat = jnp.pad(w_pw_mat, ((0, Cp - C), (0, Cp - C)))
        b_pw = jnp.pad(b_pw, (0, Cp - C))
    w_pw_mat = w_pw_mat.astype(jnp.bfloat16)   # full-rate MXU, f32 accumulation

    # Row-band size: largest divisor of H <= 64 (amortizes per-step overhead,
    # fills the MXU M dimension) unless overridden.
    tH = _pick_band_rows(H, pad) if band_rows is None else band_rows
    assert H % tH == 0 and tH % pad == 0, (H, tH, pad)
    n_bands = H // tH
    rr = tH // pad                              # halo-strip blocks per band
    h_strip_last = (H + pad - 1) // pad - 1     # last valid strip block index

    # W chunk so the depthwise accumulator stays register-resident
    # (~<=128 KiB of the 256 KiB vreg file); aligned to 8 sublanes when possible.
    wchunk = max(1, min(W, (128 * 1024) // (tH * Cp * 4)))
    if wchunk >= 8:
        wchunk = (wchunk // 8) * 8

    # VMEM sizing: double-buffered band + halo strips + weights + output band
    # + per-band scratch, with headroom.  (Size per generation; the cap keeps
    # the request within v7x's physical 64 MiB.)
    band_b = tH * W * Cp * 4
    strip_b = pad * W * Cp * 4
    scr_b = (tH + 2 * pad) * (W + 2 * pad) * Cp * 4
    w_b = (ksize * ksize * Cp + 2 * Cp) * 4 + Cp * Cp * 2
    need = 2 * (band_b + 2 * strip_b + w_b) + 2 * band_b + scr_b
    vmem_lim = int(min(96 * 2 ** 20, max(32 * 2 ** 20, 4 * need)))

    out_nhwc = pl.pallas_call(
        functools.partial(_dwsep_kernel, ksize=ksize, wchunk=wchunk),
        out_shape=jax.ShapeDtypeStruct((N, H, W, Cp), x.dtype),
        grid_spec=pltpu.PrefetchScalarGridSpec(
            num_scalar_prefetch=0,
            grid=(N, n_bands),
            in_specs=[
                # row band
                pl.BlockSpec((1, tH, W, Cp), lambda n, b: (n, b, 0, 0)),
                # pad rows above the band (clamped at the top; zero-masked in-kernel)
                pl.BlockSpec((1, pad, W, Cp),
                             lambda n, b: (n, jnp.maximum(b * rr - 1, 0), 0, 0)),
                # pad rows below the band (clamped at the bottom; zero-masked)
                pl.BlockSpec((1, pad, W, Cp),
                             lambda n, b: (n, jnp.minimum((b + 1) * rr,
                                                          h_strip_last), 0, 0)),
                pl.BlockSpec((ksize * ksize, Cp), lambda n, b: (0, 0)),
                pl.BlockSpec((1, Cp), lambda n, b: (0, 0)),
                pl.BlockSpec((Cp, Cp), lambda n, b: (0, 0)),
                pl.BlockSpec((1, Cp), lambda n, b: (0, 0)),
            ],
            out_specs=pl.BlockSpec((1, tH, W, Cp), lambda n, b: (n, b, 0, 0)),
            scratch_shapes=[
                pltpu.VMEM((tH + 2 * pad, W + 2 * pad, Cp), jnp.float32),
            ],
        ),
        compiler_params=pltpu.CompilerParams(
            # No cross-band state left in the scratch, so both axes are
            # parallel (lets v7x shard bands across its 2 TensorCores).
            dimension_semantics=("parallel", "parallel"),
            vmem_limit_bytes=vmem_lim),
    )(x, x, x, w_dw_taps, b_dw.reshape(1, Cp), w_pw_mat, b_pw.reshape(1, Cp))

    out_nhwc = out_nhwc[..., :C]
    return jnp.transpose(out_nhwc, (0, 3, 1, 2))           # back to NCHW


# ----------------------------------------------------------------------------
# Parameter construction (deterministic, synthetic) + BN folding (glue)
# ----------------------------------------------------------------------------
def make_params(key, channels, ksize):
    keys = jax.random.split(key, 10)
    # Depthwise Conv2d(C, C, k, groups=C, bias=False): (C, 1, k, k)
    w_dw = 0.1 * jax.random.normal(keys[0], (channels, 1, ksize, ksize), jnp.float32)
    # Pointwise Conv2d(C, C, 1, bias=False): (C, C, 1, 1)
    w_pw = 0.1 * jax.random.normal(keys[1], (channels, channels, 1, 1), jnp.float32)

    def bn(k1, k2, k3, k4):
        return dict(gamma=1.0 + 0.1 * jax.random.normal(k1, (channels,)),
                    beta=0.1 * jax.random.normal(k2, (channels,)),
                    mean=0.05 * jax.random.normal(k3, (channels,)),
                    var=jnp.abs(1.0 + 0.1 * jax.random.normal(k4, (channels,))))

    bn_dw = bn(*keys[2:6])
    bn_pw = bn(*keys[6:10])
    return w_dw, bn_dw, w_pw, bn_pw


def fold_bn(w_oihw, bn, eps=1e-5):
    scale = bn["gamma"] / jnp.sqrt(bn["var"] + eps)
    w_eff = w_oihw * scale[:, None, None, None]
    b_eff = bn["beta"] - bn["mean"] * scale
    return w_eff, b_eff


def pack_kernel_weights(w_dw, bn_dw, w_pw, bn_pw):
    w_dw_eff, b_dw = fold_bn(w_dw, bn_dw)                  # (C,1,k,k), (C,)
    w_pw_eff, b_pw = fold_bn(w_pw, bn_pw)                  # (C,C,1,1), (C,)
    C, _, k, _ = w_dw_eff.shape
    # (C,1,k,k) -> (k*k, C): tap-major rows, channels on lanes.
    w_dw_taps = jnp.transpose(w_dw_eff[:, 0].reshape(C, k * k), (1, 0))
    # (Cout, Cin) -> (Cin, Cout) so the kernel computes h @ w_pw_mat.
    w_pw_mat = jnp.transpose(w_pw_eff[:, :, 0, 0], (1, 0))
    return w_dw_taps, b_dw, w_pw_mat, b_pw, (w_dw_eff, b_dw, w_pw_eff, b_pw)


# ----------------------------------------------------------------------------
# Pure-JAX reference (unfused, NCHW, f32) for verification
# ----------------------------------------------------------------------------
def reference_forward(x_nchw, w_dw_eff, b_dw, w_pw_eff, b_pw):
    C = x_nchw.shape[1]
    k = w_dw_eff.shape[-1]
    p = (k - 1) // 2
    dn = lax.conv_dimension_numbers(x_nchw.shape, w_dw_eff.shape,
                                    ("NCHW", "OIHW", "NCHW"))
    h = lax.conv_general_dilated(x_nchw, w_dw_eff, (1, 1), [(p, p), (p, p)],
                                 dimension_numbers=dn, feature_group_count=C)
    h = h + b_dw[None, :, None, None]
    h = h * jax.nn.sigmoid(h)
    dn2 = lax.conv_dimension_numbers(h.shape, w_pw_eff.shape,
                                     ("NCHW", "OIHW", "NCHW"))
    y = lax.conv_general_dilated(h, w_pw_eff, (1, 1), [(0, 0), (0, 0)],
                                 dimension_numbers=dn2)
    y = y + b_pw[None, :, None, None]
    return y * jax.nn.sigmoid(y)


if __name__ == "__main__":
    key = jax.random.PRNGKey(0)
    kx, kp = jax.random.split(key)

    N, C, H, W, K = 2, 4, 16, 16, 3
    x = jax.random.normal(kx, (N, C, H, W), jnp.float32)

    w_dw, bn_dw, w_pw, bn_pw = make_params(kp, C, K)
    w_dw_taps, b_dw, w_pw_mat, b_pw, eff = pack_kernel_weights(
        w_dw, bn_dw, w_pw, bn_pw)

    ref = reference_forward(x, *eff)

    # Run with the auto band size and with an explicit multi-band size that
    # exercises the cross-band halo path.  bf16 MXU + approx reciprocal ->
    # compare against the f32 reference at a bf16-appropriate tolerance.
    for band_rows in (None, 4):
        out = dwsep_forward(x, w_dw_taps, b_dw, w_pw_mat, b_pw,
                            ksize=K, band_rows=band_rows)
        out = jax.block_until_ready(out)
        assert out.shape == (N, C, H, W)
        max_err = float(jnp.max(jnp.abs(out - ref)))
        assert jnp.allclose(out, ref, atol=2e-2, rtol=2e-2), max_err

    print("KERNEL_OK")
</pallas_src>

<mosaic_0001>
module attributes {stable_mosaic.version = 11 : i64} {
  func.func @_dwsep_kernel(%arg0: i32, %arg1: i32, %arg2: memref<1x16x16x128xf32, #tpu.memory_space<vmem>>, %arg3: memref<1x1x16x128xf32, #tpu.memory_space<vmem>>, %arg4: memref<1x1x16x128xf32, #tpu.memory_space<vmem>>, %arg5: memref<9x128xf32, #tpu.memory_space<vmem>>, %arg6: memref<1x128xf32, #tpu.memory_space<vmem>>, %arg7: memref<128x128xbf16, #tpu.memory_space<vmem>>, %arg8: memref<1x128xf32, #tpu.memory_space<vmem>>, %arg9: memref<1x16x16x128xf32, #tpu.memory_space<vmem>>, %arg10: memref<18x18x128xf32, #tpu.memory_space<vmem>>) attributes {dimension_semantics = [#tpu.dimension_semantics<parallel>, #tpu.dimension_semantics<parallel>], iteration_bounds = array<i64: 2, 1>, scalar_prefetch = 0 : i64, scratch_operands = 1 : i64, tpu.core_type = #tpu.core_type<tc>, window_params = [{transform_indices = @transform_0, window_bounds = array<i64: 1, 16, 16, 128>}, {transform_indices = @transform_1, window_bounds = array<i64: 1, 1, 16, 128>}, {transform_indices = @transform_2, window_bounds = array<i64: 1, 1, 16, 128>}, {pipeline_mode = #tpu.pipeline_mode<synchronous>, transform_indices = @transform_3, window_bounds = array<i64: 9, 128>}, {pipeline_mode = #tpu.pipeline_mode<synchronous>, transform_indices = @transform_4, window_bounds = array<i64: 1, 128>}, {pipeline_mode = #tpu.pipeline_mode<synchronous>, transform_indices = @transform_5, window_bounds = array<i64: 128, 128>}, {pipeline_mode = #tpu.pipeline_mode<synchronous>, transform_indices = @transform_6, window_bounds = array<i64: 1, 128>}, {transform_indices = @transform_7, window_bounds = array<i64: 1, 16, 16, 128>}]} {
    %c0_i32 = arith.constant 0 : i32
    %0 = arith.cmpi eq, %arg1, %c0_i32 : i32
    %c0_i32_0 = arith.constant 0 : i32
    %1 = arith.cmpi eq, %arg1, %c0_i32_0 : i32
    %cst = arith.constant 0.000000e+00 : f32
    %2 = vector.broadcast %cst : f32 to vector<18x1x128xf32>
    %c0 = arith.constant 0 : index
    %c0_1 = arith.constant 0 : index
    %c0_2 = arith.constant 0 : index
    %3 = vector.load %arg10[%c0, %c0_1, %c0_2] : memref<18x18x128xf32, #tpu.memory_space<vmem>>, vector<18x1x128xf32>
    tpu.vector_store %arg10[%c0, %c0_1, %c0_2], %2 {strides = array<i32>} : memref<18x18x128xf32, #tpu.memory_space<vmem>>, vector<18x1x128xf32>,
    %c0_3 = arith.constant 0 : index
    %c17 = arith.constant 17 : index
    %c0_4 = arith.constant 0 : index
    %4 = vector.load %arg10[%c0_3, %c17, %c0_4] : memref<18x18x128xf32, #tpu.memory_space<vmem>>, vector<18x1x128xf32>
    tpu.vector_store %arg10[%c0_3, %c17, %c0_4], %2 {strides = array<i32>} : memref<18x18x128xf32, #tpu.memory_space<vmem>>, vector<18x1x128xf32>,
    %c0_5 = arith.constant 0 : index
    %c0_6 = arith.constant 0 : index
    %c0_7 = arith.constant 0 : index
    %c0_8 = arith.constant 0 : index
    %5 = vector.load %arg3[%c0_5, %c0_6, %c0_7, %c0_8] : memref<1x1x16x128xf32, #tpu.memory_space<vmem>>, vector<1x1x16x128xf32>
    %6 = vector.shape_cast %5 : vector<1x1x16x128xf32> to vector<1x16x128xf32>
    %cst_9 = arith.constant 0.000000e+00 : f32
    %7 = vector.broadcast %cst_9 : f32 to vector<1x16x128xf32>
    %8 = arith.select %0, %7, %6 : vector<1x16x128xf32>
    %c0_10 = arith.constant 0 : index
    %c1 = arith.constant 1 : index
    %c0_11 = arith.constant 0 : index
    %9 = vector.load %arg10[%c0_10, %c1, %c0_11] : memref<18x18x128xf32, #tpu.memory_space<vmem>>, vector<1x16x128xf32>
    tpu.vector_store %arg10[%c0_10, %c1, %c0_11], %8 {strides = array<i32>} : memref<18x18x128xf32, #tpu.memory_space<vmem>>, vector<1x16x128xf32>,
    %c0_12 = arith.constant 0 : index
    %c0_13 = arith.constant 0 : index
    %c0_14 = arith.constant 0 : index
    %c0_15 = arith.constant 0 : index
    %10 = vector.load %arg4[%c0_12, %c0_13, %c0_14, %c0_15] : memref<1x1x16x128xf32, #tpu.memory_space<vmem>>, vector<1x1x16x128xf32>
    %11 = vector.shape_cast %10 : vector<1x1x16x128xf32> to vector<1x16x128xf32>
    %cst_16 = arith.constant 0.000000e+00 : f32
    %12 = vector.broadcast %cst_16 : f32 to vector<1x16x128xf32>
    %13 = arith.select %1, %12, %11 : vector<1x16x128xf32>
    %c17_17 = arith.constant 17 : index
    %c1_18 = arith.constant 1 : index
    %c0_19 = arith.constant 0 : index
    %14 = vector.load %arg10[%c17_17, %c1_18, %c0_19] : memref<18x18x128xf32, #tpu.memory_space<vmem>>, vector<1x16x128xf32>
    tpu.vector_store %arg10[%c17_17, %c1_18, %c0_19], %13 {strides = array<i32>} : memref<18x18x128xf32, #tpu.memory_space<vmem>>, vector<1x16x128xf32>,
    %c0_20 = arith.constant 0 : index
    %c0_21 = arith.constant 0 : index
    %c0_22 = arith.constant 0 : index
    %c0_23 = arith.constant 0 : index
    %15 = vector.load %arg2[%c0_20, %c0_21, %c0_22, %c0_23] : memref<1x16x16x128xf32, #tpu.memory_space<vmem>>, vector<1x16x16x128xf32>
    %16 = vector.shape_cast %15 : vector<1x16x16x128xf32> to vector<16x16x128xf32>
    %c1_24 = arith.constant 1 : index
    %c1_25 = arith.constant 1 : index
    %c0_26 = arith.constant 0 : index
    %17 = vector.load %arg10[%c1_24, %c1_25, %c0_26] : memref<18x18x128xf32, #tpu.memory_space<vmem>>, vector<16x16x128xf32>
    tpu.vector_store %arg10[%c1_24, %c1_25, %c0_26], %16 {strides = array<i32>} : memref<18x18x128xf32, #tpu.memory_space<vmem>>, vector<16x16x128xf32>,
    %c0_27 = arith.constant 0 : index
    %c0_28 = arith.constant 0 : index
    %18 = vector.load %arg5[%c0_27, %c0_28] : memref<9x128xf32, #tpu.memory_space<vmem>>, vector<9x128xf32>
    %c0_29 = arith.constant 0 : index
    %c0_30 = arith.constant 0 : index
    %19 = vector.load %arg6[%c0_29, %c0_30] : memref<1x128xf32, #tpu.memory_space<vmem>>, vector<1x128xf32>
    %20 = vector.shape_cast %19 : vector<1x128xf32> to vector<128xf32>
    %c0_31 = arith.constant 0 : index
    %c0_32 = arith.constant 0 : index
    %21 = vector.load %arg7[%c0_31, %c0_32] : memref<128x128xbf16, #tpu.memory_space<vmem>>, vector<128x128xbf16>
    %c0_33 = arith.constant 0 : index
    %c0_34 = arith.constant 0 : index
    %22 = vector.load %arg8[%c0_33, %c0_34] : memref<1x128xf32, #tpu.memory_space<vmem>>, vector<1x128xf32>
    %23 = vector.shape_cast %22 : vector<1x128xf32> to vector<128xf32>
    %cst_35 = arith.constant 0.000000e+00 : f32
    %24 = vector.broadcast %cst_35 : f32 to vector<16x16x128xf32>
    %c0_36 = arith.constant 0 : index
    %c0_37 = arith.constant 0 : index
    %c0_38 = arith.constant 0 : index
    %25 = vector.load %arg10[%c0_36, %c0_37, %c0_38] : memref<18x18x128xf32, #tpu.memory_space<vmem>>, vector<16x18x128xf32>
    %26 = vector.extract_strided_slice %25 {offsets = [0, 0, 0], sizes = [16, 16, 128], strides = [1, 1, 1]} : vector<16x18x128xf32> to vector<16x16x128xf32>
    %27 = vector.extract_strided_slice %18 {offsets = [0, 0], sizes = [1, 128], strides = [1, 1]} : vector<9x128xf32> to vector<1x128xf32>
    %28 = vector.shape_cast %27 : vector<1x128xf32> to vector<128xf32>
    %29 = vector.shape_cast %28 : vector<128xf32> to vector<1x1x128xf32>
    %30 = vector.broadcast %29 : vector<1x1x128xf32> to vector<16x16x128xf32>
    %31 = arith.mulf %26, %30 : vector<16x16x128xf32>
    %32 = arith.addf %24, %31 : vector<16x16x128xf32>
    %33 = vector.extract_strided_slice %25 {offsets = [0, 1, 0], sizes = [16, 16, 128], strides = [1, 1, 1]} : vector<16x18x128xf32> to vector<16x16x128xf32>
    %34 = vector.extract_strided_slice %18 {offsets = [1, 0], sizes = [1, 128], strides = [1, 1]} : vector<9x128xf32> to vector<1x128xf32>
    %35 = vector.shape_cast %34 : vector<1x128xf32> to vector<128xf32>
    %36 = vector.shape_cast %35 : vector<128xf32> to vector<1x1x128xf32>
    %37 = vector.broadcast %36 : vector<1x1x128xf32> to vector<16x16x128xf32>
    %38 = arith.mulf %33, %37 : vector<16x16x128xf32>
    %39 = arith.addf %32, %38 : vector<16x16x128xf32>
    %40 = vector.extract_strided_slice %25 {offsets = [0, 2, 0], sizes = [16, 16, 128], strides = [1, 1, 1]} : vector<16x18x128xf32> to vector<16x16x128xf32>
    %41 = vector.extract_strided_slice %18 {offsets = [2, 0], sizes = [1, 128], strides = [1, 1]} : vector<9x128xf32> to vector<1x128xf32>
    %42 = vector.shape_cast %41 : vector<1x128xf32> to vector<128xf32>
    %43 = vector.shape_cast %42 : vector<128xf32> to vector<1x1x128xf32>
    %44 = vector.broadcast %43 : vector<1x1x128xf32> to vector<16x16x128xf32>
    %45 = arith.mulf %40, %44 : vector<16x16x128xf32>
    %46 = arith.addf %39, %45 : vector<16x16x128xf32>
    %c1_39 = arith.constant 1 : index
    %c0_40 = arith.constant 0 : index
    %c0_41 = arith.constant 0 : index
    %47 = vector.load %arg10[%c1_39, %c0_40, %c0_41] : memref<18x18x128xf32, #tpu.memory_space<vmem>>, vector<16x18x128xf32>
    %48 = vector.extract_strided_slice %47 {offsets = [0, 0, 0], sizes = [16, 16, 128], strides = [1, 1, 1]} : vector<16x18x128xf32> to vector<16x16x128xf32>
    %49 = vector.extract_strided_slice %18 {offsets = [3, 0], sizes = [1, 128], strides = [1, 1]} : vector<9x128xf32> to vector<1x128xf32>
    %50 = vector.shape_cast %49 : vector<1x128xf32> to vector<128xf32>
    %51 = vector.shape_cast %50 : vector<128xf32> to vector<1x1x128xf32>
    %52 = vector.broadcast %51 : vector<1x1x128xf32> to vector<16x16x128xf32>
    %53 = arith.mulf %48, %52 : vector<16x16x128xf32>
    %54 = arith.addf %46, %53 : vector<16x16x128xf32>
    %55 = vector.extract_strided_slice %47 {offsets = [0, 1, 0], sizes = [16, 16, 128], strides = [1, 1, 1]} : vector<16x18x128xf32> to vector<16x16x128xf32>
    %56 = vector.extract_strided_slice %18 {offsets = [4, 0], sizes = [1, 128], strides = [1, 1]} : vector<9x128xf32> to vector<1x128xf32>
    %57 = vector.shape_cast %56 : vector<1x128xf32> to vector<128xf32>
    %58 = vector.shape_cast %57 : vector<128xf32> to vector<1x1x128xf32>
    %59 = vector.broadcast %58 : vector<1x1x128xf32> to vector<16x16x128xf32>
    %60 = arith.mulf %55, %59 : vector<16x16x128xf32>
    %61 = arith.addf %54, %60 : vector<16x16x128xf32>
    %62 = vector.extract_strided_slice %47 {offsets = [0, 2, 0], sizes = [16, 16, 128], strides = [1, 1, 1]} : vector<16x18x128xf32> to vector<16x16x128xf32>
    %63 = vector.extract_strided_slice %18 {offsets = [5, 0], sizes = [1, 128], strides = [1, 1]} : vector<9x128xf32> to vector<1x128xf32>
    %64 = vector.shape_cast %63 : vector<1x128xf32> to vector<128xf32>
    %65 = vector.shape_cast %64 : vector<128xf32> to vector<1x1x128xf32>
    %66 = vector.broadcast %65 : vector<1x1x128xf32> to vector<16x16x128xf32>
    %67 = arith.mulf %62, %66 : vector<16x16x128xf32>
    %68 = arith.addf %61, %67 : vector<16x16x128xf32>
    %c2 = arith.constant 2 : index
    %c0_42 = arith.constant 0 : index
    %c0_43 = arith.constant 0 : index
    %69 = vector.load %arg10[%c2, %c0_42, %c0_43] : memref<18x18x128xf32, #tpu.memory_space<vmem>>, vector<16x18x128xf32>
    %70 = vector.extract_strided_slice %69 {offsets = [0, 0, 0], sizes = [16, 16, 128], strides = [1, 1, 1]} : vector<16x18x128xf32> to vector<16x16x128xf32>
    %71 = vector.extract_strided_slice %18 {offsets = [6, 0], sizes = [1, 128], strides = [1, 1]} : vector<9x128xf32> to vector<1x128xf32>
    %72 = vector.shape_cast %71 : vector<1x128xf32> to vector<128xf32>
    %73 = vector.shape_cast %72 : vector<128xf32> to vector<1x1x128xf32>
    %74 = vector.broadcast %73 : vector<1x1x128xf32> to vector<16x16x128xf32>
    %75 = arith.mulf %70, %74 : vector<16x16x128xf32>
    %76 = arith.addf %68, %75 : vector<16x16x128xf32>
    %77 = vector.extract_strided_slice %69 {offsets = [0, 1, 0], sizes = [16, 16, 128], strides = [1, 1, 1]} : vector<16x18x128xf32> to vector<16x16x128xf32>
    %78 = vector.extract_strided_slice %18 {offsets = [7, 0], sizes = [1, 128], strides = [1, 1]} : vector<9x128xf32> to vector<1x128xf32>
    %79 = vector.shape_cast %78 : vector<1x128xf32> to vector<128xf32>
    %80 = vector.shape_cast %79 : vector<128xf32> to vector<1x1x128xf32>
    %81 = vector.broadcast %80 : vector<1x1x128xf32> to vector<16x16x128xf32>
    %82 = arith.mulf %77, %81 : vector<16x16x128xf32>
    %83 = arith.addf %76, %82 : vector<16x16x128xf32>
    %84 = vector.extract_strided_slice %69 {offsets = [0, 2, 0], sizes = [16, 16, 128], strides = [1, 1, 1]} : vector<16x18x128xf32> to vector<16x16x128xf32>
    %85 = vector.extract_strided_slice %18 {offsets = [8, 0], sizes = [1, 128], strides = [1, 1]} : vector<9x128xf32> to vector<1x128xf32>
    %86 = vector.shape_cast %85 : vector<1x128xf32> to vector<128xf32>
    %87 = vector.shape_cast %86 : vector<128xf32> to vector<1x1x128xf32>
    %88 = vector.broadcast %87 : vector<1x1x128xf32> to vector<16x16x128xf32>
    %89 = arith.mulf %84, %88 : vector<16x16x128xf32>
    %90 = arith.addf %83, %89 : vector<16x16x128xf32>
    %91 = vector.shape_cast %20 : vector<128xf32> to vector<1x1x128xf32>
    %92 = vector.broadcast %91 : vector<1x1x128xf32> to vector<16x16x128xf32>
    %93 = arith.addf %90, %92 : vector<16x16x128xf32>
    %cst_44 = arith.constant 0.000000e+00 : f32
    %94 = vector.broadcast %cst_44 : f32 to vector<16x16x128xf32>
    %95 = arith.subf %94, %93 : vector<16x16x128xf32>
    %96 = math.exp %95 : vector<16x16x128xf32>
    %cst_45 = arith.constant 1.000000e+00 : f32
    %97 = vector.broadcast %cst_45 : f32 to vector<16x16x128xf32>
    %98 = arith.addf %97, %96 : vector<16x16x128xf32>
    %99 = tpu.reciprocal %98 {approx = true} : vector<16x16x128xf32> -> vector<16x16x128xf32>
    %100 = arith.mulf %93, %99 : vector<16x16x128xf32>
    %101 = vector.shape_cast %100 : vector<16x16x128xf32> to vector<256x128xf32>
    %102 = arith.truncf %101 : vector<256x128xf32> to vector<256x128xbf16>
    %cst_46 = arith.constant dense<0.000000e+00> : vector<256x128xf32>
    %103 = tpu.matmul %102, %21, %cst_46 {dimension_numbers = #tpu.dot_dimension_numbers<[1], [0], [0], [1], [0, 0, 1, 1], [], []>} : vector<256x128xbf16>, vector<128x128xbf16>, vector<256x128xf32> -> vector<256x128xf32>
    %104 = vector.shape_cast %23 : vector<128xf32> to vector<1x128xf32>
    %105 = vector.broadcast %104 : vector<1x128xf32> to vector<256x128xf32>
    %106 = arith.addf %103, %105 : vector<256x128xf32>
    %cst_47 = arith.constant 0.000000e+00 : f32
    %107 = vector.broadcast %cst_47 : f32 to vector<256x128xf32>
    %108 = arith.subf %107, %106 : vector<256x128xf32>
    %109 = math.exp %108 : vector<256x128xf32>
    %cst_48 = arith.constant 1.000000e+00 : f32
    %110 = vector.broadcast %cst_48 : f32 to vector<256x128xf32>
    %111 = arith.addf %110, %109 : vector<256x128xf32>
    %112 = tpu.reciprocal %111 {approx = true} : vector<256x128xf32> -> vector<256x128xf32>
    %113 = arith.mulf %106, %112 : vector<256x128xf32>
    %114 = vector.shape_cast %113 : vector<256x128xf32> to vector<16x16x128xf32>
    %c0_49 = arith.constant 0 : index
    %c0_50 = arith.constant 0 : index
    %c0_51 = arith.constant 0 : index
    %c0_52 = arith.constant 0 : index
    %115 = vector.load %arg9[%c0_49, %c0_50, %c0_51, %c0_52] : memref<1x16x16x128xf32, #tpu.memory_space<vmem>>, vector<1x16x16x128xf32>
    %116 = vector.shape_cast %115 : vector<1x16x16x128xf32> to vector<16x16x128xf32>
    %117 = vector.shape_cast %114 : vector<16x16x128xf32> to vector<1x16x16x128xf32>
    tpu.vector_store %arg9[%c0_49, %c0_50, %c0_51, %c0_52], %117 {strides = array<i32>} : memref<1x16x16x128xf32, #tpu.memory_space<vmem>>, vector<1x16x16x128xf32>,
    return
  }
  func.func @transform_0(%arg0: i32, %arg1: i32) -> (i32, i32, i32, i32) {
    %c0_i32 = arith.constant 0 : i32
    %c0_i32_0 = arith.constant 0 : i32
    %c0_i32_1 = arith.constant 0 : i32
    return %arg0, %arg1, %c0_i32, %c0_i32_0 : i32, i32, i32, i32
  }
  func.func @transform_1(%arg0: i32, %arg1: i32) -> (i32, i32, i32, i32) {
    %c16_i32 = arith.constant 16 : i32
    %0 = arith.muli %arg1, %c16_i32 : i32
    %c1_i32 = arith.constant 1 : i32
    %1 = arith.subi %0, %c1_i32 : i32
    %c0_i32 = arith.constant 0 : i32
    %2 = arith.maxsi %1, %c0_i32 : i32
    %c0_i32_0 = arith.constant 0 : i32
    %c0_i32_1 = arith.constant 0 : i32
    %c0_i32_2 = arith.constant 0 : i32
    return %arg0, %2, %c0_i32_0, %c0_i32_1 : i32, i32, i32, i32
  }
  func.func @transform_2(%arg0: i32, %arg1: i32) -> (i32, i32, i32, i32) {
    %c1_i32 = arith.constant 1 : i32
    %0 = arith.addi %arg1, %c1_i32 : i32
    %c16_i32 = arith.constant 16 : i32
    %1 = arith.muli %0, %c16_i32 : i32
    %c15_i32 = arith.constant 15 : i32
    %2 = arith.minsi %1, %c15_i32 : i32
    %c0_i32 = arith.constant 0 : i32
    %c0_i32_0 = arith.constant 0 : i32
    %c0_i32_1 = arith.constant 0 : i32
    return %arg0, %2, %c0_i32, %c0_i32_0 : i32, i32, i32, i32
  }
  func.func @transform_3(%arg0: i32, %arg1: i32) -> (i32, i32) {
    %c0_i32 = arith.constant 0 : i32
    %c0_i32_0 = arith.constant 0 : i32
    %c0_i32_1 = arith.constant 0 : i32
    return %c0_i32, %c0_i32_0 : i32, i32
  }
  func.func @transform_4(%arg0: i32, %arg1: i32) -> (i32, i32) {
    %c0_i32 = arith.constant 0 : i32
    %c0_i32_0 = arith.constant 0 : i32
    %c0_i32_1 = arith.constant 0 : i32
    return %c0_i32, %c0_i32_0 : i32, i32
  }
  func.func @transform_5(%arg0: i32, %arg1: i32) -> (i32, i32) {
    %c0_i32 = arith.constant 0 : i32
    %c0_i32_0 = arith.constant 0 : i32
    %c0_i32_1 = arith.constant 0 : i32
    return %c0_i32, %c0_i32_0 : i32, i32
  }
  func.func @transform_6(%arg0: i32, %arg1: i32) -> (i32, i32) {
    %c0_i32 = arith.constant 0 : i32
    %c0_i32_0 = arith.constant 0 : i32
    %c0_i32_1 = arith.constant 0 : i32
    return %c0_i32, %c0_i32_0 : i32, i32
  }
  func.func @transform_7(%arg0: i32, %arg1: i32) -> (i32, i32, i32, i32) {
    %c0_i32 = arith.constant 0 : i32
    %c0_i32_0 = arith.constant 0 : i32
    %c0_i32_1 = arith.constant 0 : i32
    return %arg0, %arg1, %c0_i32, %c0_i32_0 : i32, i32, i32, i32
  }
}

</mosaic_0001>

<bundles_post_ra>
// kernel: dwsep_forward.1
= control target key start
LH: loop header
LB: loop body
LE: loop exit
PB: predicated region body
PF: predicated region fallthrough
CT: control target
= control target key end

     0   :  { %s3701_s24 = smov 0   ;;  %s3703_s1 = smov 0   ;;  %s5053_s0 = inlined_call_operand.vmem [shape: f32[2,16,16,128], index: 0, kind: input, shape index: {}, may-alias: {0,1,2}]   ;;  %s5054_s1 = inlined_call_operand.vmem [shape: f32[2,16,16,128], index: 1, kind: input, shape index: {}, may-alias: {0,1,2}]   ;;  %s5055_s2 = inlined_call_operand.vmem [shape: f32[2,16,16,128], index: 2, kind: input, shape index: {}, may-alias: {0,1,2}]   ;;  %s5056_s3 = inlined_call_operand.vmem [shape: f32[9,128], index: 3, kind: input, shape index: {}]   ;;  %s5057_s4 = inlined_call_operand.vmem [shape: f32[1,128], index: 4, kind: input, shape index: {}]   ;;  %s5058_s5 = inlined_call_operand.vmem [shape: bf16[128,128], index: 5, kind: input, shape index: {}]   ;;  %s5059_s6 = inlined_call_operand.vmem [shape: f32[1,128], index: 6, kind: input, shape index: {}]   ;;  %s5060_s7 = inlined_call_operand.vmem [shape: f32[2,16,16,128], index: 7, kind: output, shape index: {}]  }
   0x1   :  { %s3705_s2 = smov 0  }
   0x2 LB: > { %s29_s25 = sadd.s32 1, %s3654_s1  ;;  %p3228_p0 = scmp.ge.s32.totalorder %s3658_s2, 1  ;;  %s3658_s2 = sphi %s3705_s2, %s17_s2   ;;  %s3654_s1 = sphi %s3703_s1, %s5062_s1   ;;  %s3650_s24 = sphi %s3701_s24, %s5061_s24  }
   0x3   : > { %p31_p1 = scmp.ge.s32.totalorder %s29_s25, 2  ;;  %p323_p2 = scmp.lt.s32.totalorder %s3658_s2, 3 }
   0x5   : > { %s5064_s25 = smov (%p31_p1, %s29_s25), 0  ;;  %p324_p3 = pnand %p3228_p0, %p323_p2 }
   0x6   : > { %v3368_v0 = vld [vmem:[%s5058_s5] sm:$0xff] (!%p324_p3)   ;;  %p392_p4 = scmp.lt.s32.totalorder (!%p324_p3), %s3650_s24, 1  ;;  %v634_v1 = vlaneseq (!%p324_p3)  ;;  %v3369_v2 = vld [vmem:[%s5058_s5 + $0x8] sm:$0xff] (!%p324_p3)   ;;  %v3660_v3 = vmov (!%p324_p3), 0.0   ;;  %v3370_v5 = vld [vmem:[%s5058_s5 + $0x10] sm:$0xff] (!%p324_p3)   ;;  %vm802_vm0 = vcmask (!%p324_p3), 1046528  }
   0x7   : > { %327 = sbr.rel (%p324_p3) target bundleno = 650 (0x28a), region = 48  ;;  %3279 = vmatprep.subr.bf16.mxu0 (!%p324_p3), %v3368_v0  ;;  %3327 = vmatprep.subr.bf16.mxu1 (!%p324_p3), %v3368_v0  ;;  %449 = vst [vmem:[#allocation2] sm:$0x1] (!%p324_p3), %v3660_v3  ;;  %450 = vst [vmem:[#allocation2 + $0x18] sm:$0x1] (!%p324_p3), %v3660_v3  ;;  %v3371_v8 = vld [vmem:[%s5058_s5 + $0x18] sm:$0xff] (!%p324_p3)  }
   0x8   : > { %451 = vst [vmem:[#allocation2 + $0x30] sm:$0x1] (!%p324_p3), %v3660_v3  ;;  %467 = vst [vmem:[#allocation2 + $0x11] sm:$0x1] (!%p324_p3), %v3660_v3  ;;  %3280 = vmatpush3.bf16.msra.mxu0 (!%p324_p3), %v3368_v0  ;;  %3335 = vmatpush3.bf16.msra.mxu1 (!%p324_p3), %v3368_v0  ;;  %v3727_v4 = vshrl.u32 (!%p324_p3), %v634_v1, 7  ;;  %v3754_v15 = vld [vmem:[%s5056_s3] sm:$0xff] (!%p324_p3) }
   0x9   : > { %468 = vst [vmem:[#allocation2 + $0x29] sm:$0x1] (!%p324_p3), %v3660_v3  ;;  %469 = vst [vmem:[#allocation2 + $0x41] sm:$0x1] (!%p324_p3), %v3660_v3  ;;  %3281 = vmatprep.subr.bf16.mxu0 (!%p324_p3), %v3369_v2  ;;  %3328 = vmatprep.subr.bf16.mxu1 (!%p324_p3), %v3369_v2  ;;  %v3760_v17 = vld [vmem:[%s5058_s5 + $0x20] sm:$0xff] (!%p324_p3)   ;;  %vm1047_vm1 = vcmask (!%p324_p3), 1045504  }
   0xa   : > { %492 = vst [vmem:[#allocation2 + $0x1] sm:$0xff] (!%p324_p3), %v3660_v3  ;;  %493 = vst [vmem:[#allocation2 + $0x9] sm:$0xff] (!%p324_p3), %v3660_v3  ;;  %v636_v6 = vsub.s32 (!%p324_p3), 0, %v3727_v4  ;;  %v704_v7 = vsub.s32 (!%p324_p3), 1, %v3727_v4  ;;  %v949_v12 = vsub.s32 (!%p324_p3), 2, %v3727_v4  ;;  %v1242_v13 = vsub.s32 (!%p324_p3), 3, %v3727_v4 }
   0xb   : > { %452 = vst [vmem:[#allocation2 + $0x48] sm:$0x1] (!%p324_p3), %v3660_v3  ;;  %453 = vst [vmem:[#allocation2 + $0x60] sm:$0x1] (!%p324_p3), %v3660_v3  ;;  %v1310_v16 = vsub.s32 (!%p324_p3), 4, %v3727_v4  ;;  %v1554_v25 = vsub.s32 (!%p324_p3), 5, %v3727_v4 }
   0xc   : > { %454 = vst [vmem:[#allocation2 + $0x78] sm:$0x1] (!%p324_p3), %v3660_v3  ;;  %455 = vst [vmem:[#allocation2 + $0x90] sm:$0x1] (!%p324_p3), %v3660_v3  ;;  %3282 = vmatpush3.bf16.msra.mxu0 (!%p324_p3), %v3369_v2  ;;  %3336 = vmatpush3.bf16.msra.mxu1 (!%p324_p3), %v3369_v2  ;;  %v3763_v20 = vrot.slane (!%p324_p3), %v3754_v15, %v636_v6  ;;  %v3766_v21 = vrot.slane (!%p324_p3), %v3754_v15, %v704_v7  ;;  %v1847_v30 = vsub.s32 (!%p324_p3), 6, %v3727_v4  ;;  %v3373_v55 = vld [vmem:[%s5058_s5 + $0x28] sm:$0xff] (!%p324_p3)  }
   0xd   : > { %456 = vst [vmem:[#allocation2 + $0xa8] sm:$0x1] (!%p324_p3), %v3660_v3  ;;  %457 = vst [vmem:[#allocation2 + $0xc0] sm:$0x1] (!%p324_p3), %v3660_v3  ;;  %3283 = vmatprep.subr.bf16.mxu0 (!%p324_p3), %v3370_v5  ;;  %3329 = vmatprep.subr.bf16.mxu1 (!%p324_p3), %v3370_v5  ;;  %v3769_v22 = vrot.slane (!%p324_p3), %v3754_v15, %v949_v12  ;;  %v3772_v24 = vrot.slane (!%p324_p3), %v3754_v15, %v1242_v13  ;;  %v1915_v31 = vsub.s32 (!%p324_p3), 7, %v3727_v4 }
   0xe   : > { %s5066_s24 = smov (!%p392_p4, %s3650_s24), 1  ;;  %458 = vst [vmem:[#allocation2 + $0xd8] sm:$0x1] %v3660_v3  ;;  %459 = vst [vmem:[#allocation2 + $0xf0] sm:$0x1] %v3660_v3  ;;  %v3779_v29 = vrot.slane %v3754_v15, %v1310_v16  ;;  %v3809_v59 = vrot.slane %v3754_v15, %v1554_v25  ;;  %v3812_v60 = vrot.slane %v3754_v15, %v1847_v30 }
   0xf   : > { %460 = vst [vmem:[#allocation2 + $0x108] sm:$0x1] %v3660_v3  ;;  %461 = vst [vmem:[#allocation2 + $0x120] sm:$0x1] %v3660_v3  ;;  %s3250_s9 = sshll.u32 %s5066_s24, 8  ;;  %v3815_v61 = vrot.slane %v3754_v15, %v1915_v31 }
  0x10   : > { %462 = vst [vmem:[#allocation2 + $0x138] sm:$0x1] %v3660_v3  ;;  %463 = vst [vmem:[#allocation2 + $0x150] sm:$0x1] %v3660_v3  ;;  %s3738_s12 = scalar_lea.vmem %s5053_s0, %s3250_s9  ;;  %3284 = vmatpush3.bf16.msra.mxu0 %v3370_v5  ;;  %3337 = vmatpush3.bf16.msra.mxu1 %v3370_v5  ;;  %s4976_s21 = scalar_lea.vmem %s5060_s7, %s3250_s9 }
  0x11   : > { %464 = vst [vmem:[#allocation2 + $0x168] sm:$0x1] %v3660_v3  ;;  %465 = vst [vmem:[#allocation2 + $0x180] sm:$0x1] %v3660_v3  ;;  %v501_v9 = vld [vmem:[%s3738_s12] sm:$0xff]  ;;  %v502_v10 = vld [vmem:[%s3738_s12 + $0x8] sm:$0xff]  ;;  %3285 = vmatprep.subr.bf16.mxu0 %v3371_v8  ;;  %3330 = vmatprep.subr.bf16.mxu1 %v3371_v8 }
  0x12   : > { %466 = vst [vmem:[#allocation2 + $0x198] sm:$0x1] %v3660_v3  ;;  %470 = vst [vmem:[#allocation2 + $0x59] sm:$0x1] %v3660_v3  ;;  %v503_v11 = vld [vmem:[%s3738_s12 + $0x10] sm:$0xff]  ;;  %v504_v14 = vld [vmem:[%s3738_s12 + $0x18] sm:$0xff] }
  0x13   : > { %471 = vst [vmem:[#allocation2 + $0x71] sm:$0x1] %v3660_v3  ;;  %472 = vst [vmem:[#allocation2 + $0x89] sm:$0x1] %v3660_v3  ;;  %v586_v18 = vld [vmem:[#allocation2] sm:$0xff]  ;;  %v587_v19 = vld [vmem:[#allocation2 + $0x8] sm:$0xff] }
  0x14   : > { %473 = vst [vmem:[#allocation2 + $0xa1] sm:$0x1] %v3660_v3  ;;  %474 = vst [vmem:[#allocation2 + $0xb9] sm:$0x1] %v3660_v3  ;;  %v588_v23 = vld [vmem:[#allocation2 + $0x10] sm:$0x3]  ;;  %v706_v28 = vmul.f32 %v3766_v21, %v586_v18  ;;  %v707_v35 = vmul.f32 %v3766_v21, %v587_v19  ;;  %v951_v37 = vmul.f32 %v3769_v22, %v586_v18  ;;  %3286 = vmatpush3.bf16.msra.mxu0 %v3371_v8 }
  0x15   : > { %475 = vst [vmem:[#allocation2 + $0xd1] sm:$0x1] %v3660_v3  ;;  %476 = vst [vmem:[#allocation2 + $0xe9] sm:$0x1] %v3660_v3  ;;  %v505_v26 = vld [vmem:[%s3738_s12 + $0x20] sm:$0xff]  ;;  %v506_v27 = vld [vmem:[%s3738_s12 + $0x28] sm:$0xff]  ;;  %v708_v36 = vmul.f32 %v3766_v21, %v588_v23  ;;  %v952_v38 = vmul.f32 %v3769_v22, %v587_v19  ;;  %v638_v42 = vmul.f32 %v3763_v20, %v586_v18  ;;  %3338 = vmatpush3.bf16.msra.mxu1 %v3371_v8 }
  0x16   : > { %477 = vst [vmem:[#allocation2 + $0x101] sm:$0x1] %v3660_v3  ;;  %478 = vst [vmem:[#allocation2 + $0x119] sm:$0x1] %v3660_v3  ;;  %v515_v32 = vld [vmem:[%s3738_s12 + $0x70] sm:$0xff]  ;;  %v516_v33 = vld [vmem:[%s3738_s12 + $0x78] sm:$0xff]  ;;  %v639_v43 = vmul.f32 %v3763_v20, %v587_v19  ;;  %v953_v45 = vmul.f32 %v3769_v22, %v588_v23  ;;  %3287 = vmatprep.subr.bf16.mxu0 %v3760_v17  ;;  %3331 = vmatprep.subr.bf16.mxu1 %v3760_v17 }
  0x17   : > { %479 = vst [vmem:[#allocation2 + $0x131] sm:$0x1] %v3660_v3  ;;  %480 = vst [vmem:[#allocation2 + $0x149] sm:$0x1] %v3660_v3  ;;  %v517_v34 = vld [vmem:[%s3738_s12 + $0x80] sm:$0xff]  ;;  %v518_v39 = vld [vmem:[%s3738_s12 + $0x88] sm:$0xff] }
  0x18   : > { %481 = vst [vmem:[#allocation2 + $0x161] sm:$0x1] %v3660_v3  ;;  %482 = vst [vmem:[#allocation2 + $0x179] sm:$0x1] %v3660_v3  ;;  %v519_v40 = vld [vmem:[%s3738_s12 + $0x90] sm:$0xff]  ;;  %v520_v41 = vld [vmem:[%s3738_s12 + $0x98] sm:$0xff]  ;;  %3288 = vmatpush3.bf16.msra.mxu0 %v3760_v17 }
  0x19   : > { %483 = vst [vmem:[#allocation2 + $0x191] sm:$0x1] %v3660_v3  ;;  %484 = vst [vmem:[#allocation2 + $0x1a9] sm:$0x1] %v3660_v3  ;;  %v803_v44 = vrot.slane %v706_v28, 1  ;;  %v521_v46 = vld [vmem:[%s3738_s12 + $0xa0] sm:$0xff]  ;;  %3339 = vmatpush3.bf16.msra.mxu1 %v3760_v17  ;;  %3289 = vmatprep.subr.bf16.mxu0 %v3373_v55 }
  0x1a   : > { %499 = vst [vmem:[#allocation2 + $0x199] sm:$0xff] %v3660_v3  ;;  %500 = vst [vmem:[#allocation2 + $0x1a1] sm:$0xff] %v3660_v3  ;;  %v522_v47 = vld [vmem:[%s3738_s12 + $0xa8] sm:$0xff]  ;;  %v507_v48 = vld [vmem:[%s3738_s12 + $0x30] sm:$0xff]  ;;  %v804_v49 = vrot.slane %v707_v35, 1  ;;  %v806_v50 = vrot.slane %v708_v36, 1  ;;  %3332 = vmatprep.subr.bf16.mxu1 %v3373_v55 }
  0x1b   : > { %534 = vst [vmem:[#allocation2 + $0x19] sm:$0xff] %v501_v9  ;;  %535 = vst [vmem:[#allocation2 + $0x21] sm:$0xff] %v502_v10  ;;  %v1048_v51 = vrot.slane %v951_v37, 2  ;;  %v1049_v52 = vrot.slane %v952_v38, 2  ;;  %v508_v53 = vld [vmem:[%s3738_s12 + $0x38] sm:$0xff]  ;;  %v509_v54 = vld [vmem:[%s3738_s12 + $0x40] sm:$0xff] }
  0x1c   : > { %536 = vst [vmem:[#allocation2 + $0x31] sm:$0xff] %v503_v11  ;;  %537 = vst [vmem:[#allocation2 + $0x39] sm:$0xff] %v504_v14  ;;  %v1051_v56 = vrot.slane %v953_v45, 2  ;;  %v805_v62 = vsel %vm802_vm0, %v803_v44, %v804_v49  ;;  %v807_v63 = vsel %vm802_vm0, %v804_v49, %v806_v50  ;;  %v3374_v10 = vld [vmem:[%s5058_s5 + $0x30] sm:$0xff]   ;;  %3290 = vmatpush3.bf16.msra.mxu0 %v3373_v55  ;;  %v3847_v28 = vld [vmem:[%s5056_s3 + $0x8] ss:$0 sm:$0xff] }
  0x1d   : > { %538 = vst [vmem:[#allocation2 + $0x49] sm:$0xff] %v505_v26  ;;  %539 = vst [vmem:[#allocation2 + $0x51] sm:$0xff] %v506_v27  ;;  %v1050_v0 = vsel %vm1047_vm1, %v1048_v51, %v1049_v52  ;;  %v915_v3 = vadd.f32 %v805_v62, %v638_v42  ;;  %v916_v4 = vadd.f32 %v807_v63, %v639_v43  ;;  %3340 = vmatpush3.bf16.msra.mxu1 %v3373_v55  ;;  %v3375_v35 = vld [vmem:[%s5058_s5 + $0x38] sm:$0xff]  }
  0x1e   : > { %548 = vst [vmem:[#allocation2 + $0xc1] sm:$0xff] %v515_v32  ;;  %549 = vst [vmem:[#allocation2 + $0xc9] sm:$0xff] %v516_v33  ;;  %v1052_v5 = vsel %vm1047_vm1, %v1049_v52, %v1051_v56  ;;  %3291 = vmatprep.subr.bf16.mxu0 %v3374_v10  ;;  %3333 = vmatprep.subr.bf16.mxu1 %v3374_v10 }
  0x1f   : > { %550 = vst [vmem:[#allocation2 + $0xd9] sm:$0xff] %v517_v34  ;;  %551 = vst [vmem:[#allocation2 + $0xe1] sm:$0xff] %v518_v39  ;;  %v1160_v11 = vadd.f32 %v1050_v0, %v915_v3  ;;  %v1161_v12 = vadd.f32 %v1052_v5, %v916_v4  ;;  %v525_v5 = vld [vmem:[%s3738_s12 + $0xc0] sm:$0xff] }
  0x20   : > { %552 = vst [vmem:[#allocation2 + $0xf1] sm:$0xff] %v519_v40  ;;  %553 = vst [vmem:[#allocation2 + $0xf9] sm:$0xff] %v520_v41  ;;  %3292 = vmatpush3.bf16.msra.mxu0 %v3374_v10 }
  0x21   : > { %554 = vst [vmem:[#allocation2 + $0x109] sm:$0xff] %v521_v46  ;;  %555 = vst [vmem:[#allocation2 + $0x111] sm:$0xff] %v522_v47  ;;  %3341 = vmatpush3.bf16.msra.mxu1 %v3374_v10  ;;  %3293 = vmatprep.subr.bf16.mxu0 %v3375_v35 }
  0x22   : > { %540 = vst [vmem:[#allocation2 + $0x61] sm:$0xff] %v507_v48  ;;  %v3806_v57 = vld [vmem:[#allocation2 + $0x18] sm:$0xff]  ;;  %v1194_v58 = vld [vmem:[#allocation2 + $0x28] sm:$0x3]  ;;  %541 = vst [vmem:[#allocation2 + $0x69] sm:$0xff] %v508_v53  ;;  %3334 = vmatprep.subr.bf16.mxu1 %v3375_v35 }
  0x23   : > { %542 = vst [vmem:[#allocation2 + $0x79] sm:$0xff] %v509_v54  ;;  %v3820_v1 = vld [vmem:[#allocation2 + $0x20] sm:$0xff]  ;;  %v1244_v2 = vmul.f32 %v3772_v24, %v3806_v57  ;;  %v1312_v7 = vmul.f32 %v3779_v29, %v3806_v57  ;;  %v1314_v9 = vmul.f32 %v3779_v29, %v1194_v58  ;;  %v1556_v13 = vmul.f32 %v3809_v59, %v3806_v57  ;;  %v3842_v26 = vld [vmem:[#allocation2 + $0x30] sm:$0xff]  ;;  %v3851_v33 = vld [vmem:[#allocation2 + $0x38] sm:$0xff] }
  0x24   : > { %v1245_v6 = vmul.f32 %v3772_v24, %v3820_v1  ;;  %v1313_v8 = vmul.f32 %v3779_v29, %v3820_v1  ;;  %v1557_v17 = vmul.f32 %v3809_v59, %v3820_v1  ;;  %v1558_v23 = vmul.f32 %v3809_v59, %v1194_v58  ;;  %v1799_v27 = vld [vmem:[#allocation2 + $0x40] sm:$0x3]  ;;  %v510_v48 = vld [vmem:[%s3738_s12 + $0x48] sm:$0xff]  ;;  %v523_v53 = vld [vmem:[%s3738_s12 + $0xb0] sm:$0xff]  ;;  %558 = vst [vmem:[#allocation2 + $0x139] sm:$0xff] %v525_v5 }
  0x25   : > { %v1408_v14 = vrot.slane %v1312_v7, 1  ;;  %v1411_v16 = vrot.slane %v1314_v9, 1  ;;  %v1276_v18 = vadd.f32 %v1244_v2, %v1160_v11  ;;  %v1652_v25 = vrot.slane %v1556_v13, 2  ;;  %543 = vst [vmem:[#allocation2 + $0x81] sm:$0xff] %v510_v48  ;;  %v524_v54 = vld [vmem:[%s3738_s12 + $0xb8] sm:$0xff]  ;;  %556 = vst [vmem:[#allocation2 + $0x121] sm:$0xff] %v523_v53  ;;  %3294 = vmatpush3.bf16.msra.mxu0 %v3375_v35  ;;  %3342 = vmatpush3.bf16.msra.mxu1 %v3375_v35 }
  0x26   : > { %v1409_v15 = vrot.slane %v1313_v8, 1  ;;  %v1277_v19 = vadd.f32 %v1245_v6, %v1161_v12  ;;  %v1653_v32 = vrot.slane %v1557_v17, 2  ;;  %v1849_v34 = vmul.f32 %v3812_v60, %v3842_v26  ;;  %557 = vst [vmem:[#allocation2 + $0x129] sm:$0xff] %v524_v54  ;;  %v591_v3 = vld [vmem:[#allocation2 + $0x28] sm:$0x3] }
  0x27   : > { %v1655_v38 = vrot.slane %v1558_v23, 2  ;;  %v1850_v39 = vmul.f32 %v3812_v60, %v3851_v33  ;;  %v1917_v41 = vmul.f32 %v3815_v61, %v3842_v26  ;;  %v1918_v42 = vmul.f32 %v3815_v61, %v3851_v33  ;;  %v526_v6 = vld [vmem:[%s3738_s12 + $0xc8] sm:$0xff]  ;;  %v3887_v11 = vld [vmem:[%s5057_s4] ss:$0 sm:$0xff] }
  0x28   : > { %v1410_v30 = vsel %vm802_vm0, %v1408_v14, %v1409_v15  ;;  %v1412_v31 = vsel %vm802_vm0, %v1409_v15, %v1411_v16  ;;  %v1654_v40 = vsel %vm1047_vm1, %v1652_v25, %v1653_v32  ;;  %v1919_v43 = vmul.f32 %v3815_v61, %v1799_v27  ;;  %559 = vst [vmem:[#allocation2 + $0x141] sm:$0xff] %v526_v6 }
  0x29   : > { %v1520_v36 = vadd.f32 %v1410_v30, %v1276_v18  ;;  %v1521_v37 = vadd.f32 %v1412_v31, %v1277_v19  ;;  %v1656_v44 = vsel %vm1047_vm1, %v1653_v32, %v1655_v38  ;;  %v2161_v46 = vmul.f32 %v3847_v28, %v3842_v26 }
  0x2a   : > { %v2162_v47 = vmul.f32 %v3847_v28, %v3851_v33  ;;  %v2013_v50 = vrot.slane %v1917_v41, 1  ;;  %v2014_v51 = vrot.slane %v1918_v42, 1  ;;  %v2016_v52 = vrot.slane %v1919_v43, 1  ;;  %v1197_v41 = vld [vmem:[#allocation2 + $0x40] sm:$0x3] }
  0x2b   : > { %v1764_v45 = vadd.f32 %v1654_v40, %v1520_v36  ;;  %v1765_v49 = vadd.f32 %v1656_v44, %v1521_v37  ;;  %v2163_v56 = vmul.f32 %v3847_v28, %v1799_v27  ;;  %v2257_v58 = vrot.slane %v2161_v46, 2  ;;  %v511_v46 = vld [vmem:[%s3738_s12 + $0x50] sm:$0xff] }
  0x2c   : > { %v2258_v62 = vrot.slane %v2162_v47, 2  ;;  %v2015_v0 = vsel %vm802_vm0, %v2013_v50, %v2014_v51  ;;  %v2017_v2 = vsel %vm802_vm0, %v2014_v51, %v2016_v52  ;;  %v640_v4 = vmul.f32 %v3806_v57, %v3763_v20  ;;  %v512_v47 = vld [vmem:[%s3738_s12 + $0x58] sm:$0xff]  ;;  %544 = vst [vmem:[#allocation2 + $0x91] sm:$0xff] %v511_v46 }
  0x2d   : > { %v1881_v55 = vadd.f32 %v1849_v34, %v1764_v45  ;;  %v1882_v63 = vadd.f32 %v1850_v39, %v1765_v49  ;;  %v2260_v9 = vrot.slane %v2163_v56, 2  ;;  %v641_v10 = vmul.f32 %v3820_v1, %v3763_v20  ;;  %545 = vst [vmem:[#allocation2 + $0x99] sm:$0xff] %v512_v47 }
  0x2e   : > { %v2259_v8 = vsel %vm1047_vm1, %v2257_v58, %v2258_v62  ;;  %v709_v13 = vmul.f32 %v3806_v57, %v3766_v21  ;;  %v710_v14 = vmul.f32 %v3820_v1, %v3766_v21  ;;  %v711_v17 = vmul.f32 %v3766_v21, %v591_v3 }
  0x2f   : > { %v2125_v7 = vadd.f32 %v2015_v0, %v1881_v55  ;;  %v2126_v12 = vadd.f32 %v2017_v2, %v1882_v63  ;;  %v2261_v15 = vsel %vm1047_vm1, %v2258_v62, %v2260_v9  ;;  %v954_v18 = vmul.f32 %v3806_v57, %v3769_v22 }
  0x30   : > { %v808_v23 = vrot.slane %v709_v13, 1  ;;  %v809_v25 = vrot.slane %v710_v14, 1  ;;  %v955_v27 = vmul.f32 %v3820_v1, %v3769_v22  ;;  %v811_v31 = vrot.slane %v711_v17, 1 }
  0x31   : > { %v2369_v16 = vadd.f32 %v2259_v8, %v2125_v7  ;;  %v2370_v19 = vadd.f32 %v2261_v15, %v2126_v12  ;;  %v956_v32 = vmul.f32 %v3769_v22, %v591_v3  ;;  %v1053_v34 = vrot.slane %v954_v18, 2  ;;  %v3925_v3 = vld [vmem:[#allocation2 + $0x48] sm:$0xff]  ;;  %v3930_v7 = vld [vmem:[#allocation2 + $0x50] sm:$0xff]  ;;  %v1802_v8 = vld [vmem:[#allocation2 + $0x58] sm:$0x3] }
  0x32   : > { %v810_v57 = vsel %vm802_vm0, %v808_v23, %v809_v25  ;;  %v1054_v36 = vrot.slane %v955_v27, 2  ;;  %v1246_v37 = vmul.f32 %v3842_v26, %v3772_v24  ;;  %v812_v38 = vsel %vm802_vm0, %v809_v25, %v811_v31 }
  0x33   : > { %v3900_v30 = vadd.f32 %v3887_v11, %v2369_v16  ;;  %v3904_v35 = vadd.f32 %v3887_v11, %v2370_v19  ;;  %v917_v39 = vadd.f32 %v810_v57, %v640_v4  ;;  %v1056_v40 = vrot.slane %v956_v32, 2 }
  0x34   : > { %v918_v43 = vadd.f32 %v812_v38, %v641_v10  ;;  %v1055_v44 = vsel %vm1047_vm1, %v1053_v34, %v1054_v36  ;;  %v1247_v45 = vmul.f32 %v3851_v33, %v3772_v24  ;;  %v1315_v51 = vmul.f32 %v3842_v26, %v3779_v29 }
  0x35   : > { %v2439_v1 = vsub.f32 0.0, %v3900_v30  ;;  %v2440_v42 = vsub.f32 0.0, %v3904_v35  ;;  %v1057_v49 = vsel %vm1047_vm1, %v1054_v36, %v1056_v40  ;;  %v1162_v50 = vadd.f32 %v1055_v44, %v917_v39  ;;  %v610_v39 = vld [vmem:[#allocation2 + $0xc0] sm:$0xff] }
  0x36   : > { %v1163_v53 = vadd.f32 %v1057_v49, %v918_v43  ;;  %v1316_v54 = vmul.f32 %v3851_v33, %v3779_v29  ;;  %v1317_v55 = vmul.f32 %v3779_v29, %v1197_v41  ;;  %v1413_v58 = vrot.slane %v1315_v51, 1  ;;  %v611_v43 = vld [vmem:[#allocation2 + $0xc8] sm:$0xff]  ;;  %v612_v49 = vld [vmem:[#allocation2 + $0xd0] sm:$0x3] }
  0x37   : > { %v2471_v48 = vmul.f32 1.442695, %v2439_v1  ;;  %v2473_v52 = vmul.f32 1.442695, %v2440_v42  ;;  %v1278_v56 = vadd.f32 %v1246_v37, %v1162_v50  ;;  %v1559_v62 = vmul.f32 %v3842_v26, %v3809_v59 }
  0x38   : > { %v1279_v63 = vadd.f32 %v1247_v45, %v1163_v53  ;;  %v1414_v0 = vrot.slane %v1316_v54, 1  ;;  %v1416_v2 = vrot.slane %v1317_v55, 1  ;;  %v1560_v4 = vmul.f32 %v3851_v33, %v3809_v59 }
  0x39   : > { %3376 = vpow2.f32 %v2471_v48  ;;  %v1561_v5 = vmul.f32 %v3809_v59, %v1197_v41  ;;  %v1657_v6 = vrot.slane %v1559_v62, 2  ;;  %v1851_v9 = vmul.f32 %v3812_v60, %v3925_v3 }
  0x3a   : > { %3378 = vpow2.f32 %v2473_v52  ;;  %v1415_v10 = vsel %vm802_vm0, %v1413_v58, %v1414_v0  ;;  %v1417_v12 = vsel %vm802_vm0, %v1414_v0, %v1416_v2  ;;  %v1852_v13 = vmul.f32 %v3812_v60, %v3930_v7 }
  0x3b   : > { %v1920_v14 = vmul.f32 %v3815_v61, %v3925_v3  ;;  %v1522_v15 = vadd.f32 %v1415_v10, %v1278_v56  ;;  %v1523_v16 = vadd.f32 %v1417_v12, %v1279_v63  ;;  %v1658_v17 = vrot.slane %v1560_v4, 2 }
  0x3c   : > { %v1660_v18 = vrot.slane %v1561_v5, 2  ;;  %v1921_v19 = vmul.f32 %v3815_v61, %v3930_v7  ;;  %v1922_v23 = vmul.f32 %v3815_v61, %v1802_v8  ;;  %v2164_v27 = vmul.f32 %v3847_v28, %v3925_v3 }
  0x3d   : > { %v2018_v25 = vrot.slane %v1920_v14, 1  ;;  %v1659_v31 = vsel %vm1047_vm1, %v1657_v6, %v1658_v17  ;;  %v2165_v34 = vmul.f32 %v3847_v28, %v3930_v7  ;;  %v2166_v57 = vmul.f32 %v3847_v28, %v1802_v8 }
  0x3e   : > { %v1661_v32 = vsel %vm1047_vm1, %v1658_v17, %v1660_v18  ;;  %v1766_v36 = vadd.f32 %v1659_v31, %v1522_v15  ;;  %v2019_v1 = vrot.slane %v1921_v19, 1  ;;  %v2021_v38 = vrot.slane %v1922_v23, 1  ;;  %v513_v18 = vld [vmem:[%s3738_s12 + $0x60] sm:$0xff]  ;;  %v514_v19 = vld [vmem:[%s3738_s12 + $0x68] sm:$0xff] }
  0x3f   : > { %v1767_v37 = vadd.f32 %v1661_v32, %v1523_v16  ;;  %v2262_v40 = vrot.slane %v2164_v27, 2  ;;  %v2263_v41 = vrot.slane %v2165_v34, 2  ;;  %v2265_v42 = vrot.slane %v2166_v57, 2  ;;  %v3972_v32 = vld [vmem:[#allocation2 + $0xd8] sm:$0xff]  ;;  %546 = vst [vmem:[#allocation2 + $0xa9] sm:$0xff] %v513_v18  ;;  %547 = vst [vmem:[#allocation2 + $0xb1] sm:$0xff] %v514_v19 }
  0x40   : > { %v654_v44 = vmul.f32 %v3763_v20, %v610_v39  ;;  %v1883_v45 = vadd.f32 %v1851_v9, %v1766_v36  ;;  %v2020_v47 = vsel %vm802_vm0, %v2018_v25, %v2019_v1  ;;  %v2022_v48 = vsel %vm802_vm0, %v2019_v1, %v2021_v38  ;;  %v1218_v1 = vld [vmem:[#allocation2 + $0xe8] sm:$0x3] }
  0x41   : > { %v1884_v46 = vadd.f32 %v1852_v13, %v1767_v37  ;;  %v2264_v51 = vsel %vm1047_vm1, %v2262_v40, %v2263_v41  ;;  %v2266_v52 = vsel %vm1047_vm1, %v2263_v41, %v2265_v42  ;;  %v655_v53 = vmul.f32 %v3763_v20, %v611_v43  ;;  %v3976_v37 = vld [vmem:[#allocation2 + $0xe0] sm:$0xff] }
  0x42   : > { %v730_v54 = vmul.f32 %v3766_v21, %v610_v39  ;;  %v2127_v58 = vadd.f32 %v2020_v47, %v1883_v45  ;;  %v731_v63 = vmul.f32 %v3766_v21, %v611_v43  ;;  %v732_v2 = vmul.f32 %v3766_v21, %v612_v49 }
  0x43   : > { %v3377_v50 = vpop.eup %3376  ;;  %v2128_v62 = vadd.f32 %v2022_v48, %v1884_v46  ;;  %v975_v5 = vmul.f32 %v3769_v22, %v610_v39  ;;  %v976_v12 = vmul.f32 %v3769_v22, %v611_v43  ;;  %v977_v13 = vmul.f32 %v3769_v22, %v612_v49 }
  0x44   : > { %v3379_v55 = vpop.eup %3378  ;;  %v2535_v56 = vadd.f32 1.0, %v3377_v50  ;;  %v843_v4 = vrot.slane %v730_v54, 1  ;;  %v2371_v6 = vadd.f32 %v2264_v51, %v2127_v58  ;;  %v844_v9 = vrot.slane %v731_v63, 1  ;;  %v3994_v58 = vld [vmem:[#allocation2 + $0xf0] sm:$0xff] }
  0x45   : > { %v2536_v0 = vadd.f32 1.0, %v3379_v55  ;;  %v2372_v8 = vadd.f32 %v2266_v52, %v2128_v62  ;;  %v846_v10 = vrot.slane %v732_v2, 1  ;;  %v1088_v17 = vrot.slane %v975_v5, 2  ;;  %v3996_v62 = vld [vmem:[#allocation2 + $0xf8] sm:$0xff] }
  0x46   : > { %3380 = vrcp.f32 %v2535_v56  ;;  %v3963_v14 = vadd.f32 %v3887_v11, %v2371_v6  ;;  %v845_v16 = vsel %vm802_vm0, %v843_v4, %v844_v9  ;;  %v1089_v27 = vrot.slane %v976_v12, 2  ;;  %v1823_v4 = vld [vmem:[#allocation2 + $0x100] sm:$0x3] }
  0x47   : > { %3382 = vrcp.f32 %v2536_v0  ;;  %v3966_v15 = vadd.f32 %v3887_v11, %v2372_v8  ;;  %v847_v23 = vsel %vm802_vm0, %v844_v9, %v846_v10  ;;  %v931_v25 = vadd.f32 %v845_v16, %v654_v44 }
  0x48   : > { %v1091_v31 = vrot.slane %v977_v13, 2  ;;  %v2441_v34 = vsub.f32 0.0, %v3963_v14  ;;  %v932_v36 = vadd.f32 %v847_v23, %v655_v53  ;;  %v1260_v38 = vmul.f32 %v3772_v24, %v3972_v32 }
  0x49   : > { %v2442_v57 = vsub.f32 0.0, %v3966_v15  ;;  %v1090_v39 = vsel %vm1047_vm1, %v1088_v17, %v1089_v27  ;;  %v1261_v41 = vmul.f32 %v3772_v24, %v3976_v37  ;;  %v1336_v42 = vmul.f32 %v3779_v29, %v3972_v32 }
  0x4a   : > { %v1092_v40 = vsel %vm1047_vm1, %v1089_v27, %v1091_v31  ;;  %v2475_v43 = vmul.f32 1.442695, %v2441_v34  ;;  %v1176_v45 = vadd.f32 %v1090_v39, %v931_v25  ;;  %v1337_v47 = vmul.f32 %v3779_v29, %v3976_v37 }
  0x4b   : > { %v2477_v44 = vmul.f32 1.442695, %v2442_v57  ;;  %v1177_v46 = vadd.f32 %v1092_v40, %v932_v36  ;;  %v1338_v48 = vmul.f32 %v3779_v29, %v1218_v1  ;;  %v1448_v49 = vrot.slane %v1336_v42, 1 }
  0x4c   : > { %v1580_v50 = vmul.f32 %v3809_v59, %v3972_v32  ;;  %3384 = vpow2.f32 %v2475_v43  ;;  %v1292_v51 = vadd.f32 %v1260_v38, %v1176_v45  ;;  %v1581_v53 = vmul.f32 %v3809_v59, %v3976_v37 }
  0x4d   : > { %v1293_v52 = vadd.f32 %v1261_v41, %v1177_v46  ;;  %3386 = vpow2.f32 %v2477_v44  ;;  %v1449_v54 = vrot.slane %v1337_v47, 1  ;;  %v1451_v55 = vrot.slane %v1338_v48, 1  ;;  %v615_v47 = vld [vmem:[#allocation2 + $0xe8] sm:$0x3] }
  0x4e   : > { %v1582_v56 = vmul.f32 %v3809_v59, %v1218_v1  ;;  %v1692_v0 = vrot.slane %v1580_v50, 2  ;;  %v1693_v2 = vrot.slane %v1581_v53, 2  ;;  %v1865_v5 = vmul.f32 %v3812_v60, %v3994_v58 }
  0x4f   : > { %v1866_v6 = vmul.f32 %v3812_v60, %v3996_v62  ;;  %v1450_v10 = vsel %vm802_vm0, %v1448_v49, %v1449_v54  ;;  %v1452_v12 = vsel %vm802_vm0, %v1449_v54, %v1451_v55  ;;  %v1941_v25 = vmul.f32 %v3815_v61, %v3994_v58 }
  0x50   : > { %v3381_v63 = vpop.eup %3380  ;;  %v1695_v13 = vrot.slane %v1582_v56, 2  ;;  %v1536_v17 = vadd.f32 %v1450_v10, %v1292_v51  ;;  %v1537_v18 = vadd.f32 %v1452_v12, %v1293_v52  ;;  %v1694_v19 = vsel %vm1047_vm1, %v1692_v0, %v1693_v2  ;;  %v527_v12 = vld [vmem:[%s3738_s12 + $0xd0] sm:$0xff] }
  0x51   : > { %v3383_v8 = vpop.eup %3382  ;;  %v2599_v9 = vmul.f32 %v3381_v63, %v3900_v30  ;;  %v1942_v27 = vmul.f32 %v3815_v61, %v3996_v62  ;;  %v1943_v30 = vmul.f32 %v3815_v61, %v1823_v4  ;;  %v2053_v36 = vrot.slane %v1941_v25, 1  ;;  %560 = vst [vmem:[#allocation2 + $0x151] sm:$0xff] %v527_v12 }
  0x52   : > { %v2600_v16 = vmul.f32 %v3383_v8, %v3904_v35  ;;  %v1696_v23 = vsel %vm1047_vm1, %v1693_v2, %v1695_v13  ;;  %v1780_v34 = vadd.f32 %v1694_v19, %v1536_v17  ;;  %v2185_v35 = vmul.f32 %v3847_v28, %v3994_v58  ;;  %v528_v13 = vld [vmem:[%s3738_s12 + $0xd8] sm:$0xff] }
  0x53   : > { %v1781_v57 = vadd.f32 %v1696_v23, %v1537_v18  ;;  %v2054_v1 = vrot.slane %v1942_v27, 1  ;;  %v2056_v38 = vrot.slane %v1943_v30, 1  ;;  %v2186_v39 = vmul.f32 %v3847_v28, %v3996_v62  ;;  %561 = vst [vmem:[#allocation2 + $0x159] sm:$0xff] %v528_v13 }
  0x54   : > { %v2631_v31 = vpack.c.bf16 %v2600_v16, %v2599_v9  ;;  %v1897_v40 = vadd.f32 %v1865_v5, %v1780_v34  ;;  %v2187_v42 = vmul.f32 %v3847_v28, %v1823_v4  ;;  %v2297_v43 = vrot.slane %v2185_v35, 2 }
  0x55   : > { %v1898_v41 = vadd.f32 %v1866_v6, %v1781_v57  ;;  %v2055_v44 = vsel %vm802_vm0, %v2053_v36, %v2054_v1  ;;  %v2057_v45 = vsel %vm802_vm0, %v2054_v1, %v2056_v38  ;;  %v2298_v46 = vrot.slane %v2186_v39, 2  ;;  %v1221_v38 = vld [vmem:[#allocation2 + $0x100] sm:$0x3] }
  0x56   : > { %3295 = vmatprep.mubr.bf16.mxu0 %v2631_v31  ;;  %v656_v48 = vmul.f32 %v3972_v32, %v3763_v20  ;;  %v3385_v49 = vpop.eup %3384  ;;  %v2141_v50 = vadd.f32 %v2055_v44, %v1897_v40  ;;  %v2300_v52 = vrot.slane %v2187_v42, 2  ;;  %v657_v53 = vmul.f32 %v3976_v37, %v3763_v20 }
  0x57   : > { %v2142_v51 = vadd.f32 %v2057_v45, %v1898_v41  ;;  %v3387_v54 = vpop.eup %3386  ;;  %v2537_v55 = vadd.f32 1.0, %v3385_v49  ;;  %v2299_v56 = vsel %vm1047_vm1, %v2297_v43, %v2298_v46  ;;  %v733_v63 = vmul.f32 %v3972_v32, %v3766_v21 }
  0x58   : > { %v734_v0 = vmul.f32 %v3976_v37, %v3766_v21  ;;  %v2538_v2 = vadd.f32 1.0, %v3387_v54  ;;  %v2301_v4 = vsel %vm1047_vm1, %v2298_v46, %v2300_v52  ;;  %v2385_v5 = vadd.f32 %v2299_v56, %v2141_v50  ;;  %v4063_v56 = vld [vmem:[#allocation2 + $0x108] sm:$0xff] }
  0x59   : > { %v735_v6 = vmul.f32 %v3766_v21, %v615_v47  ;;  %3388 = vrcp.f32 %v2537_v55  ;;  %v2386_v8 = vadd.f32 %v2301_v4, %v2142_v51  ;;  %v848_v9 = vrot.slane %v733_v63, 1 }
  0x5a   : > { %v849_v10 = vrot.slane %v734_v0, 1  ;;  %3390 = vrcp.f32 %v2538_v2  ;;  %v4034_v16 = vadd.f32 %v3887_v11, %v2385_v5  ;;  %v978_v18 = vmul.f32 %v3972_v32, %v3769_v22  ;;  %v1826_v5 = vld [vmem:[#allocation2 + $0x118] sm:$0x3] }
  0x5b   : > { %v851_v17 = vrot.slane %v735_v6, 1  ;;  %v4039_v19 = vadd.f32 %v3887_v11, %v2386_v8  ;;  %v979_v25 = vmul.f32 %v3976_v37, %v3769_v22  ;;  %v980_v27 = vmul.f32 %v3769_v22, %v615_v47 }
  0x5c   : > { %v850_v23 = vsel %vm802_vm0, %v848_v9, %v849_v10  ;;  %v2455_v30 = vsub.f32 0.0, %v4034_v16  ;;  %v1093_v57 = vrot.slane %v978_v18, 2  ;;  %v1262_v40 = vmul.f32 %v3994_v58, %v3772_v24 }
  0x5d   : > { %v852_v31 = vsel %vm802_vm0, %v849_v10, %v851_v17  ;;  %v933_v34 = vadd.f32 %v850_v23, %v656_v48  ;;  %v2456_v32 = vsub.f32 0.0, %v4039_v19  ;;  %v1094_v36 = vrot.slane %v979_v25, 2  ;;  %v4071_v17 = vld [vmem:[#allocation2 + $0x110] sm:$0xff] }
  0x5e   : > { %v934_v35 = vadd.f32 %v852_v31, %v657_v53  ;;  %v1096_v1 = vrot.slane %v980_v27, 2  ;;  %v2503_v39 = vmul.f32 1.442695, %v2455_v30  ;;  %v1263_v37 = vmul.f32 %v3996_v62, %v3772_v24 }
  0x5f   : > { %v1339_v41 = vmul.f32 %v3994_v58, %v3779_v29  ;;  %v2505_v42 = vmul.f32 1.442695, %v2456_v32  ;;  %v1095_v43 = vsel %vm1047_vm1, %v1093_v57, %v1094_v36  ;;  %v1340_v45 = vmul.f32 %v3996_v62, %v3779_v29 }
  0x60   : > { %v1097_v44 = vsel %vm1047_vm1, %v1094_v36, %v1096_v1  ;;  %3392 = vpow2.f32 %v2503_v39  ;;  %v1178_v46 = vadd.f32 %v1095_v43, %v933_v34  ;;  %v1341_v48 = vmul.f32 %v3779_v29, %v1221_v38 }
  0x61   : > { %v1179_v47 = vadd.f32 %v1097_v44, %v934_v35  ;;  %3394 = vpow2.f32 %v2505_v42  ;;  %v1453_v49 = vrot.slane %v1339_v41, 1  ;;  %v1454_v50 = vrot.slane %v1340_v45, 1 }
  0x62   : > { %v1583_v51 = vmul.f32 %v3994_v58, %v3809_v59  ;;  %v1294_v52 = vadd.f32 %v1262_v40, %v1178_v46  ;;  %v1456_v54 = vrot.slane %v1341_v48, 1  ;;  %v1584_v55 = vmul.f32 %v3996_v62, %v3809_v59 }
  0x63   : > { %v1295_v53 = vadd.f32 %v1263_v37, %v1179_v47  ;;  %v3389_v63 = vpop.eup %3388  ;;  %v1455_v0 = vsel %vm802_vm0, %v1453_v49, %v1454_v50  ;;  %v1585_v2 = vmul.f32 %v3809_v59, %v1221_v38  ;;  %v1867_v6 = vmul.f32 %v3812_v60, %v4063_v56 }
  0x64   : > { %v1697_v4 = vrot.slane %v1583_v51, 2  ;;  %v3391_v8 = vpop.eup %3390  ;;  %v2601_v9 = vmul.f32 %v3389_v63, %v3963_v14  ;;  %v1457_v10 = vsel %vm802_vm0, %v1454_v50, %v1456_v54  ;;  %v1538_v12 = vadd.f32 %v1455_v0, %v1294_v52 }
  0x65   : > { %v1698_v13 = vrot.slane %v1584_v55, 2  ;;  %v2602_v18 = vmul.f32 %v3391_v8, %v3966_v15  ;;  %v1539_v23 = vadd.f32 %v1457_v10, %v1295_v53  ;;  %v1700_v25 = vrot.slane %v1585_v2, 2  ;;  %v594_v53 = vld [vmem:[#allocation2 + $0x40] sm:$0x3] }
  0x66   : > { %v1868_v27 = vmul.f32 %v3812_v60, %v4071_v17  ;;  %v1944_v31 = vmul.f32 %v3815_v61, %v4063_v56  ;;  %v1945_v14 = vmul.f32 %v3815_v61, %v4071_v17  ;;  %v1946_v34 = vmul.f32 %v3815_v61, %v1826_v5 }
  0x67   : > { %v1699_v30 = vsel %vm1047_vm1, %v1697_v4, %v1698_v13  ;;  %v2632_v57 = vpack.c.bf16 %v2602_v18, %v2601_v9  ;;  %v1701_v32 = vsel %vm1047_vm1, %v1698_v13, %v1700_v25  ;;  %v2188_v15 = vmul.f32 %v3847_v28, %v4063_v56 }
  0x68   : > { %v1782_v35 = vadd.f32 %v1699_v30, %v1538_v12  ;;  %v1783_v36 = vadd.f32 %v1701_v32, %v1539_v23  ;;  %v2058_v1 = vrot.slane %v1944_v31, 1  ;;  %v2059_v38 = vrot.slane %v1945_v14, 1  ;;  %v529_v31 = vld [vmem:[%s3738_s12 + $0xe0] sm:$0xff]  ;;  %v530_v14 = vld [vmem:[%s3738_s12 + $0xe8] sm:$0xff] }
  0x69   : > { %v2061_v39 = vrot.slane %v1946_v34, 1  ;;  %3296 = vmatmul.mubr.bf16.vlgmr.msra.gmra.mrb[0].mxu0 %v2632_v57  ;;  %v2189_v37 = vmul.f32 %v3847_v28, %v4071_v17  ;;  %v2190_v41 = vmul.f32 %v3847_v28, %v1826_v5  ;;  %v2302_v42 = vrot.slane %v2188_v15, 2  ;;  %562 = vst [vmem:[#allocation2 + $0x169] sm:$0xff] %v529_v31  ;;  %563 = vst [vmem:[#allocation2 + $0x171] sm:$0xff] %v530_v14  ;;  %v4140_v31 = vld [vmem:[#allocation2 + $0x68] sm:$0xff] }
  0x6a   : > { %v1899_v40 = vadd.f32 %v1867_v6, %v1782_v35  ;;  %v3393_v43 = vpop.eup %3392  ;;  %v1900_v44 = vadd.f32 %v1868_v27, %v1783_v36  ;;  %v2060_v45 = vsel %vm802_vm0, %v2058_v1, %v2059_v38  ;;  %v642_v47 = vmul.f32 %v3842_v26, %v3763_v20  ;;  %v1200_v1 = vld [vmem:[#allocation2 + $0x58] sm:$0x3] }
  0x6b   : > { %v2062_v46 = vsel %vm802_vm0, %v2059_v38, %v2061_v39  ;;  %v3395_v48 = vpop.eup %3394  ;;  %v2551_v49 = vadd.f32 1.0, %v3393_v43  ;;  %v2303_v51 = vrot.slane %v2189_v37, 2  ;;  %v2305_v52 = vrot.slane %v2190_v41, 2 }
  0x6c   : > { %v2143_v50 = vadd.f32 %v2060_v45, %v1899_v40  ;;  %v2552_v54 = vadd.f32 1.0, %v3395_v48  ;;  %v2144_v55 = vadd.f32 %v2062_v46, %v1900_v44  ;;  %v643_v63 = vmul.f32 %v3851_v33, %v3763_v20 }
  0x6d   : > { %v712_v0 = vmul.f32 %v3842_v26, %v3766_v21  ;;  %3396 = vrcp.f32 %v2551_v49  ;;  %v2304_v2 = vsel %vm1047_vm1, %v2302_v42, %v2303_v51  ;;  %v2306_v4 = vsel %vm1047_vm1, %v2303_v51, %v2305_v52 }
  0x6e   : > { %v713_v5 = vmul.f32 %v3851_v33, %v3766_v21  ;;  %3398 = vrcp.f32 %v2552_v54  ;;  %v2387_v6 = vadd.f32 %v2304_v2, %v2143_v50  ;;  %v2388_v8 = vadd.f32 %v2306_v4, %v2144_v55 }
  0x6f   : > { %v714_v9 = vmul.f32 %v3766_v21, %v594_v53  ;;  %v813_v10 = vrot.slane %v712_v0, 1  ;;  %v957_v13 = vmul.f32 %v3842_v26, %v3769_v22  ;;  %v958_v18 = vmul.f32 %v3851_v33, %v3769_v22 }
  0x70   : > { %v814_v12 = vrot.slane %v713_v5, 1  ;;  %v4106_v23 = vadd.f32 %v3887_v11, %v2387_v6  ;;  %v4109_v25 = vadd.f32 %v3887_v11, %v2388_v8  ;;  %v959_v30 = vmul.f32 %v3769_v22, %v594_v53 }
  0x71   : > { %v816_v27 = vrot.slane %v714_v9, 1  ;;  %v1058_v57 = vrot.slane %v957_v13, 2  ;;  %v1059_v32 = vrot.slane %v958_v18, 2  ;;  %v1248_v26 = vmul.f32 %v3925_v3, %v3772_v24  ;;  %v1805_v13 = vld [vmem:[#allocation2 + $0x70] sm:$0x3] }
  0x72   : > { %v815_v34 = vsel %vm802_vm0, %v813_v10, %v814_v12  ;;  %v2457_v33 = vsub.f32 0.0, %v4106_v23  ;;  %v2458_v35 = vsub.f32 0.0, %v4109_v25  ;;  %v1061_v40 = vrot.slane %v959_v30, 2 }
  0x73   : > { %v817_v15 = vsel %vm802_vm0, %v814_v12, %v816_v27  ;;  %v919_v36 = vadd.f32 %v815_v34, %v642_v47  ;;  %v1060_v39 = vsel %vm1047_vm1, %v1058_v57, %v1059_v32  ;;  %v1249_v37 = vmul.f32 %v3930_v7, %v3772_v24  ;;  %v4138_v12 = vld [vmem:[#allocation2 + $0x60] sm:$0xff] }
  0x74   : > { %v920_v38 = vadd.f32 %v817_v15, %v643_v63  ;;  %v2507_v41 = vmul.f32 1.442695, %v2457_v33  ;;  %v2509_v42 = vmul.f32 1.442695, %v2458_v35  ;;  %v1318_v44 = vmul.f32 %v3925_v3, %v3779_v29 }
  0x75   : > { %v1164_v43 = vadd.f32 %v1060_v39, %v919_v36  ;;  %v1062_v45 = vsel %vm1047_vm1, %v1059_v32, %v1061_v40  ;;  %v1319_v46 = vmul.f32 %v3930_v7, %v3779_v29  ;;  %v1320_v47 = vmul.f32 %v3779_v29, %v1200_v1 }
  0x76   : > { %v1562_v48 = vmul.f32 %v3925_v3, %v3809_v59  ;;  %3400 = vpow2.f32 %v2507_v41  ;;  %v1165_v49 = vadd.f32 %v1062_v45, %v920_v38  ;;  %v1418_v51 = vrot.slane %v1318_v44, 1 }
  0x77   : > { %v1280_v50 = vadd.f32 %v1248_v26, %v1164_v43  ;;  %v3397_v52 = vpop.eup %3396  ;;  %3402 = vpow2.f32 %v2509_v42  ;;  %v1419_v53 = vrot.slane %v1319_v46, 1  ;;  %v1421_v54 = vrot.slane %v1320_v47, 1 }
  0x78   : > { %v1563_v55 = vmul.f32 %v3930_v7, %v3809_v59  ;;  %v3399_v63 = vpop.eup %3398  ;;  %v2615_v0 = vmul.f32 %v3397_v52, %v4034_v16  ;;  %v1281_v2 = vadd.f32 %v1249_v37, %v1165_v49  ;;  %v1564_v4 = vmul.f32 %v3809_v59, %v1200_v1 }
  0x79   : > { %v1662_v5 = vrot.slane %v1562_v48, 2  ;;  %v2616_v6 = vmul.f32 %v3399_v63, %v4039_v19  ;;  %v1420_v8 = vsel %vm802_vm0, %v1418_v51, %v1419_v53  ;;  %v1422_v9 = vsel %vm802_vm0, %v1419_v53, %v1421_v54 }
  0x7a   : > { %v1663_v10 = vrot.slane %v1563_v55, 2  ;;  %v1524_v18 = vadd.f32 %v1420_v8, %v1280_v50  ;;  %v1525_v27 = vadd.f32 %v1422_v9, %v1281_v2  ;;  %v1665_v30 = vrot.slane %v1564_v4, 2  ;;  %v597_v50 = vld [vmem:[#allocation2 + $0x58] sm:$0x3] }
  0x7b   : > { %v1853_v16 = vmul.f32 %v3812_v60, %v4138_v12  ;;  %v2639_v14 = vpack.c.bf16 %v2616_v6, %v2615_v0  ;;  %v1854_v19 = vmul.f32 %v3812_v60, %v4140_v31  ;;  %v1923_v57 = vmul.f32 %v3815_v61, %v4138_v12 }
  0x7c   : > { %v1664_v34 = vsel %vm1047_vm1, %v1662_v5, %v1663_v10  ;;  %v1666_v32 = vsel %vm1047_vm1, %v1663_v10, %v1665_v30  ;;  %v1924_v33 = vmul.f32 %v3815_v61, %v4140_v31  ;;  %v1925_v35 = vmul.f32 %v3815_v61, %v1805_v13 }
  0x7d   : > { %v1768_v26 = vadd.f32 %v1664_v34, %v1524_v18  ;;  %3311 = vmatprep.mubr.bf16.mxu1 %v2639_v14  ;;  %v1769_v15 = vadd.f32 %v1666_v32, %v1525_v27  ;;  %v2023_v36 = vrot.slane %v1923_v57, 1  ;;  %v2167_v1 = vmul.f32 %v3847_v28, %v4138_v12 }
  0x7e   : > { %v2168_v38 = vmul.f32 %v3847_v28, %v4140_v31  ;;  %v2024_v40 = vrot.slane %v1924_v33, 1  ;;  %v2026_v37 = vrot.slane %v1925_v35, 1  ;;  %v2169_v41 = vmul.f32 %v3847_v28, %v1805_v13  ;;  %v1203_v35 = vld [vmem:[#allocation2 + $0x70] sm:$0x3] }
  0x7f   : > { %v1885_v39 = vadd.f32 %v1853_v16, %v1768_v26  ;;  %v1886_v42 = vadd.f32 %v1854_v19, %v1769_v15  ;;  %v2267_v43 = vrot.slane %v2167_v1, 2  ;;  %v644_v45 = vmul.f32 %v3925_v3, %v3763_v20 }
  0x80   : > { %v2268_v44 = vrot.slane %v2168_v38, 2  ;;  %v3401_v46 = vpop.eup %3400  ;;  %v2025_v47 = vsel %vm802_vm0, %v2023_v36, %v2024_v40  ;;  %v2027_v48 = vsel %vm802_vm0, %v2024_v40, %v2026_v37  ;;  %v2270_v49 = vrot.slane %v2169_v41, 2 }
  0x81   : > { %v645_v51 = vmul.f32 %v3930_v7, %v3763_v20  ;;  %v3403_v52 = vpop.eup %3402  ;;  %v2553_v53 = vadd.f32 1.0, %v3401_v46  ;;  %v2129_v54 = vadd.f32 %v2025_v47, %v1885_v39  ;;  %v2130_v28 = vadd.f32 %v2027_v48, %v1886_v42 }
  0x82   : > { %v2269_v55 = vsel %vm1047_vm1, %v2267_v43, %v2268_v44  ;;  %v2554_v63 = vadd.f32 1.0, %v3403_v52  ;;  %v2271_v0 = vsel %vm1047_vm1, %v2268_v44, %v2270_v49  ;;  %v715_v2 = vmul.f32 %v3925_v3, %v3766_v21 }
  0x83   : > { %v716_v4 = vmul.f32 %v3930_v7, %v3766_v21  ;;  %3404 = vrcp.f32 %v2553_v53  ;;  %v2373_v5 = vadd.f32 %v2269_v55, %v2129_v54  ;;  %v2374_v6 = vadd.f32 %v2271_v0, %v2130_v28 }
  0x84   : > { %v717_v8 = vmul.f32 %v3766_v21, %v597_v50  ;;  %3406 = vrcp.f32 %v2554_v63  ;;  %v818_v9 = vrot.slane %v715_v2, 1  ;;  %v960_v13 = vmul.f32 %v3925_v3, %v3769_v22 }
  0x85   : > { %v819_v10 = vrot.slane %v716_v4, 1  ;;  %v4174_v18 = vadd.f32 %v3887_v11, %v2373_v5  ;;  %v4177_v27 = vadd.f32 %v3887_v11, %v2374_v6  ;;  %v961_v16 = vmul.f32 %v3930_v7, %v3769_v22 }
  0x86   : > { %v821_v30 = vrot.slane %v717_v8, 1  ;;  %v962_v34 = vmul.f32 %v3769_v22, %v597_v50  ;;  %v1063_v19 = vrot.slane %v960_v13, 2  ;;  %v1250_v57 = vmul.f32 %v4138_v12, %v3772_v24  ;;  %v4208_v13 = vld [vmem:[#allocation2 + $0x80] sm:$0xff] }
  0x87   : > { %v820_v14 = vsel %vm802_vm0, %v818_v9, %v819_v10  ;;  %v2443_v3 = vsub.f32 0.0, %v4174_v18  ;;  %v2444_v32 = vsub.f32 0.0, %v4177_v27  ;;  %v1064_v36 = vrot.slane %v961_v16, 2 }
  0x88   : > { %v822_v26 = vsel %vm802_vm0, %v819_v10, %v821_v30  ;;  %v921_v33 = vadd.f32 %v820_v14, %v644_v45  ;;  %v1066_v1 = vrot.slane %v962_v34, 2  ;;  %v1251_v7 = vmul.f32 %v4140_v31, %v3772_v24  ;;  %v4206_v10 = vld [vmem:[#allocation2 + $0x78] sm:$0xff]  ;;  %v1808_v30 = vld [vmem:[#allocation2 + $0x88] sm:$0x3] }
  0x89   : > { %v922_v15 = vadd.f32 %v822_v26, %v645_v51  ;;  %v2479_v38 = vmul.f32 1.442695, %v2443_v3  ;;  %v2481_v39 = vmul.f32 1.442695, %v2444_v32  ;;  %v1321_v40 = vmul.f32 %v4138_v12, %v3779_v29 }
  0x8a   : > { %v1322_v37 = vmul.f32 %v4140_v31, %v3779_v29  ;;  %v1065_v41 = vsel %vm1047_vm1, %v1063_v19, %v1064_v36  ;;  %v1067_v42 = vsel %vm1047_vm1, %v1064_v36, %v1066_v1  ;;  %v1323_v43 = vmul.f32 %v3779_v29, %v1203_v35 }
  0x8b   : > { %v1565_v44 = vmul.f32 %v4138_v12, %v3809_v59  ;;  %3408 = vpow2.f32 %v2479_v38  ;;  %v1166_v45 = vadd.f32 %v1065_v41, %v921_v33  ;;  %v1167_v46 = vadd.f32 %v1067_v42, %v922_v15 }
  0x8c   : > { %v1423_v47 = vrot.slane %v1321_v40, 1  ;;  %3410 = vpow2.f32 %v2481_v39  ;;  %v1424_v48 = vrot.slane %v1322_v37, 1  ;;  %v1426_v49 = vrot.slane %v1323_v43, 1 }
  0x8d   : > { %v1566_v50 = vmul.f32 %v4140_v31, %v3809_v59  ;;  %v3405_v51 = vpop.eup %3404  ;;  %v1282_v52 = vadd.f32 %v1250_v57, %v1166_v45  ;;  %v1283_v53 = vadd.f32 %v1251_v7, %v1167_v46  ;;  %v1567_v54 = vmul.f32 %v3809_v59, %v1203_v35  ;;  %v4224_v35 = vld [vmem:[%s5056_s3 + $0x8] ss:$0 sm:$0xff]  ;;  %v618_v46 = vld [vmem:[#allocation2 + $0x100] sm:$0x3] }
  0x8e   : > { %v1667_v28 = vrot.slane %v1565_v44, 2  ;;  %v3407_v55 = vpop.eup %3406  ;;  %v2617_v63 = vmul.f32 %v3405_v51, %v4106_v23  ;;  %v1425_v0 = vsel %vm802_vm0, %v1423_v47, %v1424_v48  ;;  %v1427_v2 = vsel %vm802_vm0, %v1424_v48, %v1426_v49 }
  0x8f   : > { %v1668_v4 = vrot.slane %v1566_v50, 2  ;;  %v2618_v5 = vmul.f32 %v3407_v55, %v4109_v25  ;;  %v1526_v6 = vadd.f32 %v1425_v0, %v1282_v52  ;;  %v1527_v8 = vadd.f32 %v1427_v2, %v1283_v53 }
  0x90   : > { %v1670_v9 = vrot.slane %v1567_v54, 2  ;;  %v1855_v23 = vmul.f32 %v3812_v60, %v4206_v10  ;;  %v1856_v14 = vmul.f32 %v3812_v60, %v4208_v13  ;;  %v1926_v34 = vmul.f32 %v3815_v61, %v4206_v10 }
  0x91   : > { %v1669_v16 = vsel %vm1047_vm1, %v1667_v28, %v1668_v4  ;;  %v2640_v25 = vpack.c.bf16 %v2618_v5, %v2617_v63  ;;  %v1927_v3 = vmul.f32 %v3815_v61, %v4208_v13  ;;  %v1928_v26 = vmul.f32 %v3815_v61, %v1808_v30 }
  0x92   : > { %v1671_v19 = vsel %vm1047_vm1, %v1668_v4, %v1670_v9  ;;  %v1770_v57 = vadd.f32 %v1669_v16, %v1526_v6  ;;  %v2028_v33 = vrot.slane %v1926_v34, 1  ;;  %v2170_v15 = vmul.f32 %v4224_v35, %v4206_v10 }
  0x93   : > { %v1771_v32 = vadd.f32 %v1671_v19, %v1527_v8  ;;  %3312 = vmatmul.mubr.bf16.vlgmr.msra.gmra.mrb[0].mxu1 %v2640_v25  ;;  %v2029_v1 = vrot.slane %v1927_v3, 1  ;;  %v2171_v7 = vmul.f32 %v4224_v35, %v4208_v13  ;;  %v2172_v38 = vmul.f32 %v4224_v35, %v1808_v30 }
  0x94   : > { %v1887_v36 = vadd.f32 %v1855_v23, %v1770_v57  ;;  %v2031_v40 = vrot.slane %v1928_v26, 1  ;;  %v2272_v37 = vrot.slane %v2170_v15, 2  ;;  %v658_v41 = vmul.f32 %v3994_v58, %v3763_v20 }
  0x95   : > { %v1888_v39 = vadd.f32 %v1856_v14, %v1771_v32  ;;  %v3409_v42 = vpop.eup %3408  ;;  %v2030_v43 = vsel %vm802_vm0, %v2028_v33, %v2029_v1  ;;  %v2273_v44 = vrot.slane %v2171_v7, 2  ;;  %v2275_v45 = vrot.slane %v2172_v38, 2 }
  0x96   : > { %v659_v47 = vmul.f32 %v3996_v62, %v3763_v20  ;;  %v3411_v48 = vpop.eup %3410  ;;  %v2539_v49 = vadd.f32 1.0, %v3409_v42  ;;  %v2032_v50 = vsel %vm802_vm0, %v2029_v1, %v2031_v40  ;;  %v2131_v51 = vadd.f32 %v2030_v43, %v1887_v36 }
  0x97   : > { %v736_v52 = vmul.f32 %v3994_v58, %v3766_v21  ;;  %v2540_v53 = vadd.f32 1.0, %v3411_v48  ;;  %v2132_v54 = vadd.f32 %v2032_v50, %v1888_v39  ;;  %v2274_v28 = vsel %vm1047_vm1, %v2272_v37, %v2273_v44 }
  0x98   : > { %v2276_v55 = vsel %vm1047_vm1, %v2273_v44, %v2275_v45  ;;  %3412 = vrcp.f32 %v2539_v49  ;;  %v2375_v63 = vadd.f32 %v2274_v28, %v2131_v51  ;;  %v737_v0 = vmul.f32 %v3996_v62, %v3766_v21 }
  0x99   : > { %v738_v2 = vmul.f32 %v3766_v21, %v618_v46  ;;  %3414 = vrcp.f32 %v2540_v53  ;;  %v2376_v4 = vadd.f32 %v2276_v55, %v2132_v54  ;;  %v853_v5 = vrot.slane %v736_v52, 1  ;;  %v4275_v52 = vld [vmem:[#allocation2 + $0x120] sm:$0xff] }
  0x9a   : > { %v981_v6 = vmul.f32 %v3994_v58, %v3769_v22  ;;  %v4247_v8 = vadd.f32 %v3887_v11, %v2375_v63  ;;  %v854_v9 = vrot.slane %v737_v0, 1  ;;  %v982_v16 = vmul.f32 %v3996_v62, %v3769_v22  ;;  %v1829_v63 = vld [vmem:[#allocation2 + $0x130] sm:$0x3] }
  0x9b   : > { %v856_v30 = vrot.slane %v738_v2, 1  ;;  %v4252_v23 = vadd.f32 %v3887_v11, %v2376_v4  ;;  %v983_v14 = vmul.f32 %v3769_v22, %v618_v46  ;;  %v1264_v25 = vmul.f32 %v4063_v56, %v3772_v24  ;;  %v1224_v11 = vld [vmem:[#allocation2 + $0x118] sm:$0x3] }
  0x9c   : > { %v1098_v34 = vrot.slane %v981_v6, 2  ;;  %v2445_v19 = vsub.f32 0.0, %v4247_v8  ;;  %v855_v58 = vsel %vm802_vm0, %v853_v5, %v854_v9  ;;  %v1099_v3 = vrot.slane %v982_v16, 2 }
  0x9d   : > { %v857_v57 = vsel %vm802_vm0, %v854_v9, %v856_v30  ;;  %v2446_v32 = vsub.f32 0.0, %v4252_v23  ;;  %v935_v26 = vadd.f32 %v855_v58, %v658_v41  ;;  %v1101_v33 = vrot.slane %v983_v14, 2  ;;  %v4283_v9 = vld [vmem:[#allocation2 + $0x128] sm:$0xff] }
  0x9e   : > { %v936_v62 = vadd.f32 %v857_v57, %v659_v47  ;;  %v2483_v15 = vmul.f32 1.442695, %v2445_v19  ;;  %v1100_v36 = vsel %vm1047_vm1, %v1098_v34, %v1099_v3  ;;  %v1265_v1 = vmul.f32 %v4071_v17, %v3772_v24 }
  0x9f   : > { %v1342_v7 = vmul.f32 %v4063_v56, %v3779_v29  ;;  %v2485_v38 = vmul.f32 1.442695, %v2446_v32  ;;  %v1102_v39 = vsel %vm1047_vm1, %v1099_v3, %v1101_v33  ;;  %v1180_v40 = vadd.f32 %v1100_v36, %v935_v26 }
  0xa0   : > { %v1343_v37 = vmul.f32 %v4071_v17, %v3779_v29  ;;  %3416 = vpow2.f32 %v2483_v15  ;;  %v1181_v41 = vadd.f32 %v1102_v39, %v936_v62  ;;  %v1344_v42 = vmul.f32 %v3779_v29, %v1224_v11 }
  0xa1   : > { %v1458_v43 = vrot.slane %v1342_v7, 1  ;;  %3418 = vpow2.f32 %v2485_v38  ;;  %v1296_v44 = vadd.f32 %v1264_v25, %v1180_v40  ;;  %v1586_v46 = vmul.f32 %v4063_v56, %v3809_v59 }
  0xa2   : > { %v1459_v45 = vrot.slane %v1343_v37, 1  ;;  %v3413_v47 = vpop.eup %3412  ;;  %v1297_v48 = vadd.f32 %v1265_v1, %v1181_v41  ;;  %v1461_v49 = vrot.slane %v1344_v42, 1  ;;  %v1587_v50 = vmul.f32 %v4071_v17, %v3809_v59 }
  0xa3   : > { %v1588_v51 = vmul.f32 %v3809_v59, %v1224_v11  ;;  %v3415_v53 = vpop.eup %3414  ;;  %v2603_v54 = vmul.f32 %v3413_v47, %v4174_v18  ;;  %v1702_v55 = vrot.slane %v1586_v46, 2  ;;  %v1869_v0 = vmul.f32 %v3812_v60, %v4275_v52  ;;  %v621_v46 = vld [vmem:[#allocation2 + $0x118] sm:$0x3] }
  0xa4   : > { %v1460_v28 = vsel %vm802_vm0, %v1458_v43, %v1459_v45  ;;  %v2604_v2 = vmul.f32 %v3415_v53, %v4177_v27  ;;  %v1462_v4 = vsel %vm802_vm0, %v1459_v45, %v1461_v49  ;;  %v1703_v6 = vrot.slane %v1587_v50, 2 }
  0xa5   : > { %v1540_v5 = vadd.f32 %v1460_v28, %v1296_v44  ;;  %v1541_v30 = vadd.f32 %v1462_v4, %v1297_v48  ;;  %v1705_v16 = vrot.slane %v1588_v51, 2  ;;  %v1870_v18 = vmul.f32 %v3812_v60, %v4283_v9  ;;  %v532_v4 = vld [vmem:[%s3738_s12 + $0xf8] sm:$0xff] }
  0xa6   : > { %v1947_v14 = vmul.f32 %v3815_v61, %v4275_v52  ;;  %v2633_v34 = vpack.c.bf16 %v2604_v2, %v2603_v54  ;;  %v1704_v25 = vsel %vm1047_vm1, %v1702_v55, %v1703_v6  ;;  %v1948_v27 = vmul.f32 %v3815_v61, %v4283_v9  ;;  %v531_v2 = vld [vmem:[%s3738_s12 + $0xf0] sm:$0xff]  ;;  %565 = vst [vmem:[#allocation2 + $0x189] sm:$0xff] %v532_v4 }
  0xa7   : > { %v1949_v19 = vmul.f32 %v3815_v61, %v1829_v63  ;;  %v1706_v58 = vsel %vm1047_vm1, %v1703_v6, %v1705_v16  ;;  %v1784_v57 = vadd.f32 %v1704_v25, %v1540_v5  ;;  %v2191_v32 = vmul.f32 %v4224_v35, %v4275_v52  ;;  %v4317_v5 = vld [vmem:[%s5057_s4] ss:$0 sm:$0xff]  ;;  %564 = vst [vmem:[#allocation2 + $0x181] sm:$0xff] %v531_v2 }
  0xa8   : > { %v2063_v3 = vrot.slane %v1947_v14, 1  ;;  %3299 = vmatprep.mubr.bf16.mxu0 %v2633_v34  ;;  %v1785_v26 = vadd.f32 %v1706_v58, %v1541_v30  ;;  %v2064_v62 = vrot.slane %v1948_v27, 1  ;;  %v2192_v11 = vmul.f32 %v4224_v35, %v4283_v9 }
  0xa9   : > { %v2066_v33 = vrot.slane %v1949_v19, 1  ;;  %v1901_v15 = vadd.f32 %v1869_v0, %v1784_v57  ;;  %v2193_v36 = vmul.f32 %v4224_v35, %v1829_v63  ;;  %v2307_v1 = vrot.slane %v2191_v32, 2 }
  0xaa   : > { %v660_v7 = vmul.f32 %v4063_v56, %v3763_v20  ;;  %v3417_v38 = vpop.eup %3416  ;;  %v1902_v39 = vadd.f32 %v1870_v18, %v1785_v26  ;;  %v2065_v40 = vsel %vm802_vm0, %v2063_v3, %v2064_v62  ;;  %v2308_v41 = vrot.slane %v2192_v11, 2 }
  0xab   : > { %v2067_v37 = vsel %vm802_vm0, %v2064_v62, %v2066_v33  ;;  %v3419_v42 = vpop.eup %3418  ;;  %v2541_v43 = vadd.f32 1.0, %v3417_v38  ;;  %v2145_v44 = vadd.f32 %v2065_v40, %v1901_v15  ;;  %v2310_v45 = vrot.slane %v2193_v36, 2  ;;  %v1227_v62 = vld [vmem:[#allocation2 + $0x130] sm:$0x3] }
  0xac   : > { %v661_v47 = vmul.f32 %v4071_v17, %v3763_v20  ;;  %v2542_v48 = vadd.f32 1.0, %v3419_v42  ;;  %v2146_v49 = vadd.f32 %v2067_v37, %v1902_v39  ;;  %v2309_v50 = vsel %vm1047_vm1, %v2307_v1, %v2308_v41 }
  0xad   : > { %v739_v51 = vmul.f32 %v4063_v56, %v3766_v21  ;;  %3420 = vrcp.f32 %v2541_v43  ;;  %v2311_v53 = vsel %vm1047_vm1, %v2308_v41, %v2310_v45  ;;  %v2389_v54 = vadd.f32 %v2309_v50, %v2145_v44  ;;  %v4349_v50 = vld [vmem:[#allocation2 + $0x138] sm:$0xff] }
  0xae   : > { %v740_v28 = vmul.f32 %v4071_v17, %v3766_v21  ;;  %3422 = vrcp.f32 %v2542_v48  ;;  %v2390_v55 = vadd.f32 %v2311_v53, %v2146_v49  ;;  %v741_v63 = vmul.f32 %v3766_v21, %v621_v46 }
  0xaf   : > { %v858_v0 = vrot.slane %v739_v51, 1  ;;  %v4320_v6 = vadd.f32 %v4317_v5, %v2389_v54  ;;  %v984_v16 = vmul.f32 %v4063_v56, %v3769_v22  ;;  %v985_v18 = vmul.f32 %v4071_v17, %v3769_v22 }
  0xb0   : > { %v859_v30 = vrot.slane %v740_v28, 1  ;;  %v4327_v14 = vadd.f32 %v4317_v5, %v2390_v55  ;;  %v861_v34 = vrot.slane %v741_v63, 1  ;;  %v986_v25 = vmul.f32 %v3769_v22, %v621_v46 }
  0xb1   : > { %v1266_v27 = vmul.f32 %v4275_v52, %v3772_v24  ;;  %v2459_v19 = vsub.f32 0.0, %v4320_v6  ;;  %v1103_v57 = vrot.slane %v984_v16, 2  ;;  %v1104_v56 = vrot.slane %v985_v18, 2  ;;  %v1832_v16 = vld [vmem:[#allocation2 + $0x148] sm:$0x3] }
  0xb2   : > { %v860_v58 = vsel %vm802_vm0, %v858_v0, %v859_v30  ;;  %v2460_v3 = vsub.f32 0.0, %v4327_v14  ;;  %v862_v17 = vsel %vm802_vm0, %v859_v30, %v861_v34  ;;  %v1106_v26 = vrot.slane %v986_v25, 2  ;;  %v4358_v30 = vld [vmem:[#allocation2 + $0x140] sm:$0xff] }
  0xb3   : > { %v937_v32 = vadd.f32 %v860_v58, %v660_v7  ;;  %v2511_v33 = vmul.f32 1.442695, %v2459_v19  ;;  %v938_v11 = vadd.f32 %v862_v17, %v661_v47  ;;  %v1105_v15 = vsel %vm1047_vm1, %v1103_v57, %v1104_v56 }
  0xb4   : > { %v1267_v36 = vmul.f32 %v4283_v9, %v3772_v24  ;;  %v2513_v1 = vmul.f32 1.442695, %v2460_v3  ;;  %v1107_v38 = vsel %vm1047_vm1, %v1104_v56, %v1106_v26  ;;  %v1345_v40 = vmul.f32 %v4275_v52, %v3779_v29 }
  0xb5   : > { %v1182_v39 = vadd.f32 %v1105_v15, %v937_v32  ;;  %3424 = vpow2.f32 %v2511_v33  ;;  %v1183_v37 = vadd.f32 %v1107_v38, %v938_v11  ;;  %v1346_v7 = vmul.f32 %v4283_v9, %v3779_v29 }
  0xb6   : > { %v1347_v41 = vmul.f32 %v3779_v29, %v1227_v62  ;;  %3426 = vpow2.f32 %v2513_v1  ;;  %v1463_v43 = vrot.slane %v1345_v40, 1  ;;  %v1589_v44 = vmul.f32 %v4275_v52, %v3809_v59 }
  0xb7   : > { %v1298_v42 = vadd.f32 %v1266_v27, %v1182_v39  ;;  %v3421_v45 = vpop.eup %3420  ;;  %v1299_v46 = vadd.f32 %v1267_v36, %v1183_v37  ;;  %v1464_v47 = vrot.slane %v1346_v7, 1  ;;  %v1590_v49 = vmul.f32 %v4283_v9, %v3809_v59 }
  0xb8   : > { %v1466_v48 = vrot.slane %v1347_v41, 1  ;;  %v3423_v51 = vpop.eup %3422  ;;  %v2605_v53 = vmul.f32 %v3421_v45, %v4247_v8  ;;  %v1591_v54 = vmul.f32 %v3809_v59, %v1227_v62  ;;  %v1707_v28 = vrot.slane %v1589_v44, 2 }
  0xb9   : > { %v1871_v55 = vmul.f32 %v3812_v60, %v4349_v50  ;;  %v2606_v63 = vmul.f32 %v3423_v51, %v4252_v23  ;;  %v1465_v0 = vsel %vm802_vm0, %v1463_v43, %v1464_v47  ;;  %v1708_v4 = vrot.slane %v1590_v49, 2 }
  0xba   : > { %v1467_v2 = vsel %vm802_vm0, %v1464_v47, %v1466_v48  ;;  %v1542_v18 = vadd.f32 %v1465_v0, %v1298_v42  ;;  %v1710_v25 = vrot.slane %v1591_v54, 2  ;;  %v1872_v8 = vmul.f32 %v3812_v60, %v4358_v30 }
  0xbb   : > { %v1543_v34 = vadd.f32 %v1467_v2, %v1299_v46  ;;  %v2634_v27 = vpack.c.bf16 %v2606_v63, %v2605_v53  ;;  %v1709_v19 = vsel %vm1047_vm1, %v1707_v28, %v1708_v4  ;;  %v1950_v23 = vmul.f32 %v3815_v61, %v4349_v50  ;;  %v600_v46 = vld [vmem:[#allocation2 + $0x70] sm:$0x3] }
  0xbc   : > { %v1951_v58 = vmul.f32 %v3815_v61, %v4358_v30  ;;  %v1711_v57 = vsel %vm1047_vm1, %v1708_v4, %v1710_v25  ;;  %v1786_v56 = vadd.f32 %v1709_v19, %v1542_v18  ;;  %v1952_v3 = vmul.f32 %v3815_v61, %v1832_v16 }
  0xbd   : > { %v2194_v17 = vmul.f32 %v4224_v35, %v4349_v50  ;;  %3300 = vmatmul.mubr.bf16.gmra.mrb[4].mxu0 %v2634_v27  ;;  %v1787_v32 = vadd.f32 %v1711_v57, %v1543_v34  ;;  %v2068_v26 = vrot.slane %v1950_v23, 1  ;;  %v2195_v33 = vmul.f32 %v4224_v35, %v4358_v30 }
  0xbe   : > { %v2069_v62 = vrot.slane %v1951_v58, 1  ;;  %v1903_v11 = vadd.f32 %v1871_v55, %v1786_v56  ;;  %v2071_v15 = vrot.slane %v1952_v3, 1  ;;  %v2196_v36 = vmul.f32 %v4224_v35, %v1832_v16 }
  0xbf   : > { %v2312_v1 = vrot.slane %v2194_v17, 2  ;;  %v3425_v38 = vpop.eup %3424  ;;  %v1904_v39 = vadd.f32 %v1872_v8, %v1787_v32  ;;  %v2313_v37 = vrot.slane %v2195_v33, 2  ;;  %v646_v7 = vmul.f32 %v4138_v12, %v3763_v20  ;;  %v1206_v33 = vld [vmem:[#allocation2 + $0x88] sm:$0x3] }
  0xc0   : > { %v2070_v40 = vsel %vm802_vm0, %v2068_v26, %v2069_v62  ;;  %v3427_v41 = vpop.eup %3426  ;;  %v2555_v42 = vadd.f32 1.0, %v3425_v38  ;;  %v2072_v43 = vsel %vm802_vm0, %v2069_v62, %v2071_v15  ;;  %v2315_v45 = vrot.slane %v2196_v36, 2 }
  0xc1   : > { %v2147_v44 = vadd.f32 %v2070_v40, %v1903_v11  ;;  %v2556_v47 = vadd.f32 1.0, %v3427_v41  ;;  %v2148_v48 = vadd.f32 %v2072_v43, %v1904_v39  ;;  %v2314_v49 = vsel %vm1047_vm1, %v2312_v1, %v2313_v37 }
  0xc2   : > { %v647_v51 = vmul.f32 %v4140_v31, %v3763_v20  ;;  %3428 = vrcp.f32 %v2555_v42  ;;  %v2316_v53 = vsel %vm1047_vm1, %v2313_v37, %v2315_v45  ;;  %v718_v28 = vmul.f32 %v4138_v12, %v3766_v21 }
  0xc3   : > { %v2391_v54 = vadd.f32 %v2314_v49, %v2147_v44  ;;  %3430 = vrcp.f32 %v2556_v47  ;;  %v2392_v55 = vadd.f32 %v2316_v53, %v2148_v48  ;;  %v719_v63 = vmul.f32 %v4140_v31, %v3766_v21 }
  0xc4   : > { %v720_v0 = vmul.f32 %v3766_v21, %v600_v46  ;;  %v823_v4 = vrot.slane %v718_v28, 1  ;;  %v963_v16 = vmul.f32 %v4138_v12, %v3769_v22  ;;  %v964_v18 = vmul.f32 %v4140_v31, %v3769_v22 }
  0xc5   : > { %v4388_v2 = vadd.f32 %v4317_v5, %v2391_v54  ;;  %v4395_v34 = vadd.f32 %v4317_v5, %v2392_v55  ;;  %v824_v25 = vrot.slane %v719_v63, 1  ;;  %v965_v27 = vmul.f32 %v3769_v22, %v600_v46  ;;  %v4419_v54 = vld [vmem:[#allocation2 + $0x90] sm:$0xff] }
  0xc6   : > { %v826_v8 = vrot.slane %v720_v0, 1  ;;  %v1068_v23 = vrot.slane %v963_v16, 2  ;;  %v1069_v58 = vrot.slane %v964_v18, 2  ;;  %v1252_v57 = vmul.f32 %v4206_v10, %v3772_v24  ;;  %v4423_v0 = vld [vmem:[#allocation2 + $0x98] sm:$0xff] }
  0xc7   : > { %v2461_v19 = vsub.f32 0.0, %v4388_v2  ;;  %v2462_v56 = vsub.f32 0.0, %v4395_v34  ;;  %v825_v12 = vsel %vm802_vm0, %v823_v4, %v824_v25  ;;  %v1071_v3 = vrot.slane %v965_v27, 2  ;;  %v1811_v4 = vld [vmem:[#allocation2 + $0xa0] sm:$0x3] }
  0xc8   : > { %v827_v31 = vsel %vm802_vm0, %v824_v25, %v826_v8  ;;  %v923_v32 = vadd.f32 %v825_v12, %v646_v7  ;;  %v1070_v62 = vsel %vm1047_vm1, %v1068_v23, %v1069_v58  ;;  %v1253_v36 = vmul.f32 %v4208_v13, %v3772_v24 }
  0xc9   : > { %v2515_v17 = vmul.f32 1.442695, %v2461_v19  ;;  %v924_v26 = vadd.f32 %v827_v31, %v647_v51  ;;  %v2517_v11 = vmul.f32 1.442695, %v2462_v56  ;;  %v1072_v15 = vsel %vm1047_vm1, %v1069_v58, %v1071_v3 }
  0xca   : > { %v1324_v1 = vmul.f32 %v4206_v10, %v3779_v29  ;;  %v1168_v38 = vadd.f32 %v1070_v62, %v923_v32  ;;  %v1325_v40 = vmul.f32 %v4208_v13, %v3779_v29  ;;  %v1326_v37 = vmul.f32 %v3779_v29, %v1206_v33 }
  0xcb   : > { %3432 = vpow2.f32 %v2515_v17  ;;  %v1169_v39 = vadd.f32 %v1072_v15, %v924_v26  ;;  %v1568_v41 = vmul.f32 %v4206_v10, %v3809_v59  ;;  %v1569_v46 = vmul.f32 %v4208_v13, %v3809_v59 }
  0xcc   : > { %3434 = vpow2.f32 %v2517_v11  ;;  %v1428_v7 = vrot.slane %v1324_v1, 1  ;;  %v3429_v42 = vpop.eup %3428  ;;  %v1284_v43 = vadd.f32 %v1252_v57, %v1168_v38  ;;  %v1429_v45 = vrot.slane %v1325_v40, 1 }
  0xcd   : > { %v1285_v44 = vadd.f32 %v1253_v36, %v1169_v39  ;;  %v3431_v47 = vpop.eup %3430  ;;  %v2619_v48 = vmul.f32 %v3429_v42, %v4320_v6  ;;  %v1431_v49 = vrot.slane %v1326_v37, 1  ;;  %v1570_v51 = vmul.f32 %v3809_v59, %v1206_v33 }
  0xce   : > { %v1672_v53 = vrot.slane %v1568_v41, 2  ;;  %v2620_v28 = vmul.f32 %v3431_v47, %v4327_v14  ;;  %v1430_v55 = vsel %vm802_vm0, %v1428_v7, %v1429_v45  ;;  %v1673_v63 = vrot.slane %v1569_v46, 2  ;;  %v603_v47 = vld [vmem:[#allocation2 + $0x88] sm:$0x3] }
  0xcf   : > { %v1857_v16 = vmul.f32 %v3812_v60, %v4419_v54  ;;  %v1432_v18 = vsel %vm802_vm0, %v1429_v45, %v1431_v49  ;;  %v1528_v6 = vadd.f32 %v1430_v55, %v1284_v43  ;;  %v1675_v25 = vrot.slane %v1570_v51, 2 }
  0xd0   : > { %v1858_v8 = vmul.f32 %v3812_v60, %v4423_v0  ;;  %v2641_v27 = vpack.c.bf16 %v2620_v28, %v2619_v48  ;;  %v1529_v19 = vadd.f32 %v1432_v18, %v1285_v44  ;;  %v1674_v14 = vsel %vm1047_vm1, %v1672_v53, %v1673_v63 }
  0xd1   : > { %v1929_v23 = vmul.f32 %v3815_v61, %v4419_v54  ;;  %v1676_v58 = vsel %vm1047_vm1, %v1673_v63, %v1675_v25  ;;  %v1772_v57 = vadd.f32 %v1674_v14, %v1528_v6  ;;  %v1930_v56 = vmul.f32 %v3815_v61, %v4423_v0 }
  0xd2   : > { %v1931_v12 = vmul.f32 %v3815_v61, %v1811_v4  ;;  %3315 = vmatprep.mubr.bf16.mxu1 %v2641_v27  ;;  %v1773_v31 = vadd.f32 %v1676_v58, %v1529_v19  ;;  %v2173_v17 = vmul.f32 %v4224_v35, %v4419_v54  ;;  %v2174_v32 = vmul.f32 %v4224_v35, %v4423_v0 }
  0xd3   : > { %v2033_v3 = vrot.slane %v1929_v23, 1  ;;  %v1889_v26 = vadd.f32 %v1857_v16, %v1772_v57  ;;  %v2034_v62 = vrot.slane %v1930_v56, 1  ;;  %v2175_v11 = vmul.f32 %v4224_v35, %v1811_v4 }
  0xd4   : > { %v2036_v33 = vrot.slane %v1931_v12, 1  ;;  %v1890_v36 = vadd.f32 %v1858_v8, %v1773_v31  ;;  %v2277_v1 = vrot.slane %v2173_v17, 2  ;;  %v2278_v38 = vrot.slane %v2174_v32, 2  ;;  %v1209_v12 = vld [vmem:[#allocation2 + $0xa0] sm:$0x3] }
  0xd5   : > { %v3433_v15 = vpop.eup %3432  ;;  %v648_v39 = vmul.f32 %v4206_v10, %v3763_v20  ;;  %v2035_v7 = vsel %vm802_vm0, %v2033_v3, %v2034_v62  ;;  %v2280_v42 = vrot.slane %v2175_v11, 2  ;;  %v649_v49 = vmul.f32 %v4208_v13, %v3763_v20 }
  0xd6   : > { %v3435_v40 = vpop.eup %3434  ;;  %v2557_v37 = vadd.f32 1.0, %v3433_v15  ;;  %v2037_v41 = vsel %vm802_vm0, %v2034_v62, %v2036_v33  ;;  %v2133_v44 = vadd.f32 %v2035_v7, %v1889_v26  ;;  %v2279_v46 = vsel %vm1047_vm1, %v2277_v1, %v2278_v38 }
  0xd7   : > { %v2558_v43 = vadd.f32 1.0, %v3435_v40  ;;  %v2134_v45 = vadd.f32 %v2037_v41, %v1890_v36  ;;  %v2281_v48 = vsel %vm1047_vm1, %v2278_v38, %v2280_v42  ;;  %v721_v51 = vmul.f32 %v4206_v10, %v3766_v21 }
  0xd8   : > { %3436 = vrcp.f32 %v2557_v37  ;;  %v2377_v53 = vadd.f32 %v2279_v46, %v2133_v44  ;;  %v722_v55 = vmul.f32 %v4208_v13, %v3766_v21  ;;  %v723_v63 = vmul.f32 %v3766_v21, %v603_v47 }
  0xd9   : > { %3438 = vrcp.f32 %v2558_v43  ;;  %v2378_v28 = vadd.f32 %v2281_v48, %v2134_v45  ;;  %v828_v4 = vrot.slane %v721_v51, 1  ;;  %v966_v16 = vmul.f32 %v4206_v10, %v3769_v22 }
  0xda   : > { %v967_v18 = vmul.f32 %v4208_v13, %v3769_v22  ;;  %v4460_v6 = vadd.f32 %v4317_v5, %v2377_v53  ;;  %v829_v8 = vrot.slane %v722_v55, 1  ;;  %v968_v27 = vmul.f32 %v3769_v22, %v603_v47  ;;  %v4489_v55 = vld [vmem:[#allocation2 + $0xa8] sm:$0xff] }
  0xdb   : > { %v4463_v25 = vadd.f32 %v4317_v5, %v2378_v28  ;;  %v831_v19 = vrot.slane %v723_v63, 1  ;;  %v1073_v14 = vrot.slane %v966_v16, 2  ;;  %v1254_v58 = vmul.f32 %v4419_v54, %v3772_v24 }
  0xdc   : > { %v1074_v23 = vrot.slane %v967_v18, 2  ;;  %v2447_v10 = vsub.f32 0.0, %v4460_v6  ;;  %v830_v13 = vsel %vm802_vm0, %v828_v4, %v829_v8  ;;  %v1076_v56 = vrot.slane %v968_v27, 2  ;;  %v4492_v18 = vld [vmem:[#allocation2 + $0xb0] sm:$0xff] }
  0xdd   : > { %v2448_v57 = vsub.f32 0.0, %v4463_v25  ;;  %v832_v31 = vsel %vm802_vm0, %v829_v8, %v831_v19  ;;  %v925_v3 = vadd.f32 %v830_v13, %v648_v39  ;;  %v1255_v32 = vmul.f32 %v4423_v0, %v3772_v24  ;;  %v1814_v8 = vld [vmem:[#allocation2 + $0xb8] sm:$0x3] }
  0xde   : > { %v1075_v17 = vsel %vm1047_vm1, %v1073_v14, %v1074_v23  ;;  %v2487_v26 = vmul.f32 1.442695, %v2447_v10  ;;  %v926_v33 = vadd.f32 %v832_v31, %v649_v49  ;;  %v1077_v11 = vsel %vm1047_vm1, %v1074_v23, %v1076_v56 }
  0xdf   : > { %v2489_v62 = vmul.f32 1.442695, %v2448_v57  ;;  %v1170_v15 = vadd.f32 %v1075_v17, %v925_v3  ;;  %v1327_v36 = vmul.f32 %v4419_v54, %v3779_v29  ;;  %v1328_v1 = vmul.f32 %v4423_v0, %v3779_v29 }
  0xe0   : > { %v1329_v38 = vmul.f32 %v3779_v29, %v1209_v12  ;;  %3440 = vpow2.f32 %v2487_v26  ;;  %v1171_v39 = vadd.f32 %v1077_v11, %v926_v33  ;;  %v1571_v40 = vmul.f32 %v4419_v54, %v3809_v59 }
  0xe1   : > { %v1572_v37 = vmul.f32 %v4423_v0, %v3809_v59  ;;  %3442 = vpow2.f32 %v2489_v62  ;;  %v1286_v41 = vadd.f32 %v1254_v58, %v1170_v15  ;;  %v1433_v42 = vrot.slane %v1327_v36, 1 }
  0xe2   : > { %v3437_v7 = vpop.eup %3436  ;;  %v1434_v43 = vrot.slane %v1328_v1, 1  ;;  %v1287_v46 = vadd.f32 %v1255_v32, %v1171_v39  ;;  %v1436_v47 = vrot.slane %v1329_v38, 1  ;;  %v1573_v48 = vmul.f32 %v3809_v59, %v1209_v12  ;;  %v624_v39 = vld [vmem:[#allocation2 + $0x130] sm:$0x3] }
  0xe3   : > { %v3439_v44 = vpop.eup %3438  ;;  %v2621_v45 = vmul.f32 %v3437_v7, %v4388_v2  ;;  %v1677_v53 = vrot.slane %v1571_v40, 2  ;;  %v1678_v28 = vrot.slane %v1572_v37, 2  ;;  %v1859_v2 = vmul.f32 %v3812_v60, %v4489_v55 }
  0xe4   : > { %v2622_v49 = vmul.f32 %v3439_v44, %v4395_v34  ;;  %v1435_v51 = vsel %vm802_vm0, %v1433_v42, %v1434_v43  ;;  %v1437_v63 = vsel %vm802_vm0, %v1434_v43, %v1436_v47  ;;  %v1680_v16 = vrot.slane %v1573_v48, 2 }
  0xe5   : > { %v1530_v4 = vadd.f32 %v1435_v51, %v1286_v41  ;;  %v1531_v19 = vadd.f32 %v1437_v63, %v1287_v46  ;;  %v1679_v34 = vsel %vm1047_vm1, %v1677_v53, %v1678_v28  ;;  %v1860_v14 = vmul.f32 %v3812_v60, %v4492_v18 }
  0xe6   : > { %v2642_v27 = vpack.c.bf16 %v2622_v49, %v2621_v45  ;;  %v1681_v23 = vsel %vm1047_vm1, %v1678_v28, %v1680_v16  ;;  %v1932_v10 = vmul.f32 %v3815_v61, %v4489_v55  ;;  %v1933_v57 = vmul.f32 %v3815_v61, %v4492_v18 }
  0xe7   : > { %v1774_v58 = vadd.f32 %v1679_v34, %v1530_v4  ;;  %v1775_v13 = vadd.f32 %v1681_v23, %v1531_v19  ;;  %v1934_v56 = vmul.f32 %v3815_v61, %v1814_v8  ;;  %v2176_v12 = vmul.f32 %v4224_v35, %v4489_v55 }
  0xe8   : > { %3316 = vmatmul.mubr.bf16.gmra.mrb[4].mxu1 %v2642_v27  ;;  %v2177_v31 = vmul.f32 %v4224_v35, %v4492_v18  ;;  %v2038_v17 = vrot.slane %v1932_v10, 1  ;;  %v2039_v32 = vrot.slane %v1933_v57, 1  ;;  %v2178_v26 = vmul.f32 %v4224_v35, %v1814_v8 }
  0xe9   : > { %v1891_v3 = vadd.f32 %v1859_v2, %v1774_v58  ;;  %v1892_v62 = vadd.f32 %v1860_v14, %v1775_v13  ;;  %v2041_v33 = vrot.slane %v1934_v56, 1  ;;  %v2282_v11 = vrot.slane %v2176_v12, 2 }
  0xea   : > { %v2283_v15 = vrot.slane %v2177_v31, 2  ;;  %v3441_v36 = vpop.eup %3440  ;;  %v2040_v1 = vsel %vm802_vm0, %v2038_v17, %v2039_v32  ;;  %v2285_v38 = vrot.slane %v2178_v26, 2  ;;  %v662_v40 = vmul.f32 %v4275_v52, %v3763_v20  ;;  %v1230_v31 = vld [vmem:[#allocation2 + $0x148] sm:$0x3] }
  0xeb   : > { %v663_v37 = vmul.f32 %v4283_v9, %v3763_v20  ;;  %v3443_v7 = vpop.eup %3442  ;;  %v2543_v41 = vadd.f32 1.0, %v3441_v36  ;;  %v2042_v42 = vsel %vm802_vm0, %v2039_v32, %v2041_v33  ;;  %v2135_v43 = vadd.f32 %v2040_v1, %v1891_v3 }
  0xec   : > { %v2284_v44 = vsel %vm1047_vm1, %v2282_v11, %v2283_v15  ;;  %v2544_v45 = vadd.f32 1.0, %v3443_v7  ;;  %v2136_v46 = vadd.f32 %v2042_v42, %v1892_v62  ;;  %v2286_v47 = vsel %vm1047_vm1, %v2283_v15, %v2285_v38 }
  0xed   : > { %v742_v48 = vmul.f32 %v4275_v52, %v3766_v21  ;;  %3444 = vrcp.f32 %v2543_v41  ;;  %v2379_v49 = vadd.f32 %v2284_v44, %v2135_v43  ;;  %v743_v51 = vmul.f32 %v4283_v9, %v3766_v21 }
  0xee   : > { %v744_v53 = vmul.f32 %v3766_v21, %v624_v39  ;;  %3446 = vrcp.f32 %v2544_v45  ;;  %v2380_v28 = vadd.f32 %v2286_v47, %v2136_v46  ;;  %v987_v4 = vmul.f32 %v4275_v52, %v3769_v22  ;;  %v4554_v45 = vld [vmem:[#allocation2 + $0x150] sm:$0xff] }
  0xef   : > { %v863_v63 = vrot.slane %v742_v48, 1  ;;  %v4526_v16 = vadd.f32 %v4317_v5, %v2379_v49  ;;  %v864_v8 = vrot.slane %v743_v51, 1  ;;  %v988_v27 = vmul.f32 %v4283_v9, %v3769_v22  ;;  %v1835_v51 = vld [vmem:[#allocation2 + $0x160] sm:$0x3] }
  0xf0   : > { %v866_v2 = vrot.slane %v744_v53, 1  ;;  %v4531_v19 = vadd.f32 %v4317_v5, %v2380_v28  ;;  %v989_v34 = vmul.f32 %v3769_v22, %v624_v39  ;;  %v1108_v14 = vrot.slane %v987_v4, 2 }
  0xf1   : > { %v1268_v23 = vmul.f32 %v4349_v50, %v3772_v24  ;;  %v2449_v58 = vsub.f32 0.0, %v4526_v16  ;;  %v865_v52 = vsel %vm802_vm0, %v863_v63, %v864_v8  ;;  %v1109_v57 = vrot.slane %v988_v27, 2 }
  0xf2   : > { %v867_v10 = vsel %vm802_vm0, %v864_v8, %v866_v2  ;;  %v2450_v13 = vsub.f32 0.0, %v4531_v19  ;;  %v939_v56 = vadd.f32 %v865_v52, %v662_v40  ;;  %v1111_v12 = vrot.slane %v989_v34, 2  ;;  %v4562_v2 = vld [vmem:[#allocation2 + $0x158] sm:$0xff] }
  0xf3   : > { %v940_v9 = vadd.f32 %v867_v10, %v663_v37  ;;  %v2491_v3 = vmul.f32 1.442695, %v2449_v58  ;;  %v1110_v17 = vsel %vm1047_vm1, %v1108_v14, %v1109_v57  ;;  %v1269_v32 = vmul.f32 %v4358_v30, %v3772_v24 }
  0xf4   : > { %v1348_v26 = vmul.f32 %v4349_v50, %v3779_v29  ;;  %v2493_v62 = vmul.f32 1.442695, %v2450_v13  ;;  %v1112_v33 = vsel %vm1047_vm1, %v1109_v57, %v1111_v12  ;;  %v1184_v11 = vadd.f32 %v1110_v17, %v939_v56 }
  0xf5   : > { %v1349_v15 = vmul.f32 %v4358_v30, %v3779_v29  ;;  %3448 = vpow2.f32 %v2491_v3  ;;  %v1185_v36 = vadd.f32 %v1112_v33, %v940_v9  ;;  %v1350_v1 = vmul.f32 %v3779_v29, %v1230_v31 }
  0xf6   : > { %v1468_v38 = vrot.slane %v1348_v26, 1  ;;  %3450 = vpow2.f32 %v2493_v62  ;;  %v1300_v39 = vadd.f32 %v1268_v23, %v1184_v11  ;;  %v1592_v37 = vmul.f32 %v4349_v50, %v3809_v59 }
  0xf7   : > { %v1469_v40 = vrot.slane %v1349_v15, 1  ;;  %v3445_v7 = vpop.eup %3444  ;;  %v1301_v41 = vadd.f32 %v1269_v32, %v1185_v36  ;;  %v1471_v42 = vrot.slane %v1350_v1, 1  ;;  %v1593_v43 = vmul.f32 %v4358_v30, %v3809_v59 }
  0xf8   : > { %v1594_v44 = vmul.f32 %v3809_v59, %v1230_v31  ;;  %v3447_v46 = vpop.eup %3446  ;;  %v2607_v47 = vmul.f32 %v3445_v7, %v4460_v6  ;;  %v1712_v49 = vrot.slane %v1592_v37, 2  ;;  %v1873_v53 = vmul.f32 %v3812_v60, %v4554_v45  ;;  %v627_v7 = vld [vmem:[#allocation2 + $0x148] sm:$0x3] }
  0xf9   : > { %v1470_v48 = vsel %vm802_vm0, %v1468_v38, %v1469_v40  ;;  %v2608_v28 = vmul.f32 %v3447_v46, %v4463_v25  ;;  %v1472_v63 = vsel %vm802_vm0, %v1469_v40, %v1471_v42  ;;  %v1713_v8 = vrot.slane %v1593_v43, 2 }
  0xfa   : > { %v1544_v4 = vadd.f32 %v1470_v48, %v1300_v39  ;;  %v1545_v27 = vadd.f32 %v1472_v63, %v1301_v41  ;;  %v1715_v34 = vrot.slane %v1594_v44, 2  ;;  %v1874_v6 = vmul.f32 %v3812_v60, %v4562_v2 }
  0xfb   : > { %v1953_v14 = vmul.f32 %v3815_v61, %v4554_v45  ;;  %v2635_v23 = vpack.c.bf16 %v2608_v28, %v2607_v47  ;;  %v1714_v58 = vsel %vm1047_vm1, %v1712_v49, %v1713_v8  ;;  %v1954_v25 = vmul.f32 %v3815_v61, %v4562_v2 }
  0xfc   : > { %v1955_v52 = vmul.f32 %v3815_v61, %v1835_v51  ;;  %v1716_v10 = vsel %vm1047_vm1, %v1713_v8, %v1715_v34  ;;  %v1788_v57 = vadd.f32 %v1714_v58, %v1544_v4  ;;  %v2197_v56 = vmul.f32 %v4224_v35, %v4554_v45 }
  0xfd   : > { %v2073_v13 = vrot.slane %v1953_v14, 1  ;;  %3303 = vmatprep.mubr.bf16.mxu0 %v2635_v23  ;;  %v1789_v9 = vadd.f32 %v1716_v10, %v1545_v27  ;;  %v2074_v12 = vrot.slane %v1954_v25, 1  ;;  %v2198_v3 = vmul.f32 %v4224_v35, %v4562_v2 }
  0xfe   : > { %v2076_v31 = vrot.slane %v1955_v52, 1  ;;  %v1905_v17 = vadd.f32 %v1873_v53, %v1788_v57  ;;  %v2199_v32 = vmul.f32 %v4224_v35, %v1835_v51  ;;  %v2317_v26 = vrot.slane %v2197_v56, 2 }
  0xff   : > { %v664_v62 = vmul.f32 %v4349_v50, %v3763_v20  ;;  %v3449_v33 = vpop.eup %3448  ;;  %v1906_v11 = vadd.f32 %v1874_v6, %v1789_v9  ;;  %v2075_v15 = vsel %vm802_vm0, %v2073_v13, %v2074_v12  ;;  %v2318_v1 = vrot.slane %v2198_v3, 2  ;;  %v1233_v13 = vld [vmem:[#allocation2 + $0x160] sm:$0x3] }
 0x100   : > { %v2077_v36 = vsel %vm802_vm0, %v2074_v12, %v2076_v31  ;;  %v3451_v38 = vpop.eup %3450  ;;  %v2545_v39 = vadd.f32 1.0, %v3449_v33  ;;  %v2149_v40 = vadd.f32 %v2075_v15, %v1905_v17  ;;  %v2320_v37 = vrot.slane %v2199_v32, 2 }
 0x101   : > { %v665_v41 = vmul.f32 %v4358_v30, %v3763_v20  ;;  %v2546_v35 = vadd.f32 1.0, %v3451_v38  ;;  %v2150_v42 = vadd.f32 %v2077_v36, %v1906_v11  ;;  %v2319_v43 = vsel %vm1047_vm1, %v2317_v26, %v2318_v1 }
 0x102   : > { %v745_v44 = vmul.f32 %v4349_v50, %v3766_v21  ;;  %3452 = vrcp.f32 %v2545_v39  ;;  %v2321_v46 = vsel %vm1047_vm1, %v2318_v1, %v2320_v37  ;;  %v2393_v47 = vadd.f32 %v2319_v43, %v2149_v40 }
 0x103   : > { %v746_v48 = vmul.f32 %v4358_v30, %v3766_v21  ;;  %3454 = vrcp.f32 %v2546_v35  ;;  %v2394_v49 = vadd.f32 %v2321_v46, %v2150_v42  ;;  %v747_v51 = vmul.f32 %v3766_v21, %v627_v7 }
 0x104   : > { %v868_v53 = vrot.slane %v745_v44, 1  ;;  %v4592_v28 = vadd.f32 %v4317_v5, %v2393_v47  ;;  %v990_v4 = vmul.f32 %v4349_v50, %v3769_v22  ;;  %v991_v8 = vmul.f32 %v4358_v30, %v3769_v22 }
 0x105   : > { %v869_v63 = vrot.slane %v746_v48, 1  ;;  %v4599_v27 = vadd.f32 %v4317_v5, %v2394_v49  ;;  %v871_v34 = vrot.slane %v747_v51, 1  ;;  %v992_v6 = vmul.f32 %v3769_v22, %v627_v7 }
 0x106   : > { %v1270_v14 = vmul.f32 %v4554_v45, %v3772_v24  ;;  %v2463_v23 = vsub.f32 0.0, %v4592_v28  ;;  %v1113_v25 = vrot.slane %v990_v4, 2  ;;  %v1114_v52 = vrot.slane %v991_v8, 2 }
 0x107   : > { %v870_v58 = vsel %vm802_vm0, %v868_v53, %v869_v63  ;;  %v2464_v50 = vsub.f32 0.0, %v4599_v27  ;;  %v872_v10 = vsel %vm802_vm0, %v869_v63, %v871_v34  ;;  %v1116_v57 = vrot.slane %v992_v6, 2  ;;  %v4630_v53 = vld [vmem:[#allocation2 + $0x170] sm:$0xff]  ;;  %v1838_v63 = vld [vmem:[#allocation2 + $0x178] sm:$0x3] }
 0x108   : > { %v941_v30 = vadd.f32 %v870_v58, %v664_v62  ;;  %v2519_v56 = vmul.f32 1.442695, %v2463_v23  ;;  %v942_v9 = vadd.f32 %v872_v10, %v665_v41  ;;  %v1115_v12 = vsel %vm1047_vm1, %v1113_v25, %v1114_v52  ;;  %v4621_v41 = vld [vmem:[#allocation2 + $0x168] sm:$0xff] }
 0x109   : > { %v1271_v31 = vmul.f32 %v4562_v2, %v3772_v24  ;;  %v2521_v3 = vmul.f32 1.442695, %v2464_v50  ;;  %v1117_v17 = vsel %vm1047_vm1, %v1114_v52, %v1116_v57  ;;  %v1351_v26 = vmul.f32 %v4554_v45, %v3779_v29  ;;  %v4644_v50 = vld [vmem:[%s5056_s3 + $0x8] ss:$0 sm:$0xff] }
 0x10a   : > { %v1186_v32 = vadd.f32 %v1115_v12, %v941_v30  ;;  %3456 = vpow2.f32 %v2519_v56  ;;  %v1187_v33 = vadd.f32 %v1117_v17, %v942_v9  ;;  %v1352_v62 = vmul.f32 %v4562_v2, %v3779_v29 }
 0x10b   : > { %v1353_v11 = vmul.f32 %v3779_v29, %v1233_v13  ;;  %3458 = vpow2.f32 %v2521_v3  ;;  %v1473_v36 = vrot.slane %v1351_v26, 1  ;;  %v1595_v1 = vmul.f32 %v4554_v45, %v3809_v59 }
 0x10c   : > { %v1302_v15 = vadd.f32 %v1270_v14, %v1186_v32  ;;  %v3453_v38 = vpop.eup %3452  ;;  %v1303_v39 = vadd.f32 %v1271_v31, %v1187_v33  ;;  %v1474_v40 = vrot.slane %v1352_v62, 1  ;;  %v1596_v7 = vmul.f32 %v4562_v2, %v3809_v59 }
 0x10d   : > { %v1476_v37 = vrot.slane %v1353_v11, 1  ;;  %v3455_v35 = vpop.eup %3454  ;;  %v2609_v42 = vmul.f32 %v3453_v38, %v4526_v16  ;;  %v1597_v43 = vmul.f32 %v3809_v59, %v1233_v13  ;;  %v1717_v44 = vrot.slane %v1595_v1, 2 }
 0x10e   : > { %v1875_v46 = vmul.f32 %v3812_v60, %v4621_v41  ;;  %v2610_v47 = vmul.f32 %v3455_v35, %v4531_v19  ;;  %v1475_v48 = vsel %vm802_vm0, %v1473_v36, %v1474_v40  ;;  %v1718_v51 = vrot.slane %v1596_v7, 2 }
 0x10f   : > { %v1477_v49 = vsel %vm802_vm0, %v1474_v40, %v1476_v37  ;;  %v1546_v4 = vadd.f32 %v1475_v48, %v1302_v15  ;;  %v1720_v34 = vrot.slane %v1597_v43, 2  ;;  %v1876_v16 = vmul.f32 %v3812_v60, %v4630_v53 }
 0x110   : > { %v1547_v8 = vadd.f32 %v1477_v49, %v1303_v39  ;;  %v2636_v6 = vpack.c.bf16 %v2610_v47, %v2609_v42  ;;  %v1719_v14 = vsel %vm1047_vm1, %v1717_v44, %v1718_v51  ;;  %v1956_v19 = vmul.f32 %v3815_v61, %v4621_v41  ;;  %v606_v39 = vld [vmem:[#allocation2 + $0xa0] sm:$0x3] }
 0x111   : > { %v1957_v23 = vmul.f32 %v3815_v61, %v4630_v53  ;;  %v1721_v58 = vsel %vm1047_vm1, %v1718_v51, %v1720_v34  ;;  %v1790_v25 = vadd.f32 %v1719_v14, %v1546_v4  ;;  %v1958_v52 = vmul.f32 %v3815_v61, %v1838_v63 }
 0x112   : > { %v2200_v10 = vmul.f32 %v4644_v50, %v4621_v41  ;;  %3304 = vmatmul.mubr.bf16.gmra.mrb[8].mxu0 %v2636_v6  ;;  %v1791_v30 = vadd.f32 %v1721_v58, %v1547_v8  ;;  %v2078_v57 = vrot.slane %v1956_v19, 1  ;;  %v2201_v56 = vmul.f32 %v4644_v50, %v4630_v53 }
 0x113   : > { %v2079_v13 = vrot.slane %v1957_v23, 1  ;;  %v1907_v9 = vadd.f32 %v1875_v46, %v1790_v25  ;;  %v2081_v12 = vrot.slane %v1958_v52, 1  ;;  %v2202_v31 = vmul.f32 %v4644_v50, %v1838_v63 }
 0x114   : > { %v2322_v3 = vrot.slane %v2200_v10, 2  ;;  %v3457_v17 = vpop.eup %3456  ;;  %v1908_v32 = vadd.f32 %v1876_v16, %v1791_v30  ;;  %v2323_v33 = vrot.slane %v2201_v56, 2  ;;  %v650_v62 = vmul.f32 %v4419_v54, %v3763_v20 }
 0x115   : > { %v2080_v26 = vsel %vm802_vm0, %v2078_v57, %v2079_v13  ;;  %v3459_v11 = vpop.eup %3458  ;;  %v2559_v15 = vadd.f32 1.0, %v3457_v17  ;;  %v2082_v36 = vsel %vm802_vm0, %v2079_v13, %v2081_v12  ;;  %v2325_v38 = vrot.slane %v2202_v31, 2  ;;  %v1212_v13 = vld [vmem:[#allocation2 + $0xb8] sm:$0x3] }
 0x116   : > { %v2151_v1 = vadd.f32 %v2080_v26, %v1907_v9  ;;  %v2560_v40 = vadd.f32 1.0, %v3459_v11  ;;  %v2152_v37 = vadd.f32 %v2082_v36, %v1908_v32  ;;  %v2324_v7 = vsel %vm1047_vm1, %v2322_v3, %v2323_v33 }
 0x117   : > { %v651_v35 = vmul.f32 %v4423_v0, %v3763_v20  ;;  %3460 = vrcp.f32 %v2559_v15  ;;  %v2326_v42 = vsel %vm1047_vm1, %v2323_v33, %v2325_v38  ;;  %v724_v44 = vmul.f32 %v4419_v54, %v3766_v21 }
 0x118   : > { %v2395_v43 = vadd.f32 %v2324_v7, %v2151_v1  ;;  %3462 = vrcp.f32 %v2560_v40  ;;  %v2396_v46 = vadd.f32 %v2326_v42, %v2152_v37  ;;  %v725_v47 = vmul.f32 %v4423_v0, %v3766_v21  ;;  %v4696_v42 = vld [vmem:[#allocation2 + $0xc0] sm:$0xff] }
 0x119   : > { %v726_v48 = vmul.f32 %v3766_v21, %v606_v39  ;;  %v833_v51 = vrot.slane %v724_v44, 1  ;;  %v969_v63 = vmul.f32 %v4419_v54, %v3769_v22  ;;  %v970_v4 = vmul.f32 %v4423_v0, %v3769_v22 }
 0x11a   : > { %v4665_v49 = vadd.f32 %v4317_v5, %v2395_v43  ;;  %v4672_v8 = vadd.f32 %v4317_v5, %v2396_v46  ;;  %v834_v34 = vrot.slane %v725_v47, 1  ;;  %v971_v6 = vmul.f32 %v3769_v22, %v606_v39  ;;  %v4700_v47 = vld [vmem:[#allocation2 + $0xc8] sm:$0xff] }
 0x11b   : > { %v836_v16 = vrot.slane %v726_v48, 1  ;;  %v1078_v19 = vrot.slane %v969_v63, 2  ;;  %v1079_v23 = vrot.slane %v970_v4, 2  ;;  %v1256_v58 = vmul.f32 %v4489_v55, %v3772_v24  ;;  %v1817_v48 = vld [vmem:[#allocation2 + $0xd0] sm:$0x3] }
 0x11c   : > { %v2465_v14 = vsub.f32 0.0, %v4665_v49  ;;  %v2466_v25 = vsub.f32 0.0, %v4672_v8  ;;  %v835_v54 = vsel %vm802_vm0, %v833_v51, %v834_v34  ;;  %v1081_v52 = vrot.slane %v971_v6, 2 }
 0x11d   : > { %v837_v0 = vsel %vm802_vm0, %v834_v34, %v836_v16  ;;  %v927_v10 = vadd.f32 %v835_v54, %v650_v62  ;;  %v1080_v57 = vsel %vm1047_vm1, %v1078_v19, %v1079_v23  ;;  %v1257_v12 = vmul.f32 %v4492_v18, %v3772_v24 }
 0x11e   : > { %v2523_v5 = vmul.f32 1.442695, %v2465_v14  ;;  %v928_v30 = vadd.f32 %v837_v0, %v651_v35  ;;  %v2525_v56 = vmul.f32 1.442695, %v2466_v25  ;;  %v1082_v9 = vsel %vm1047_vm1, %v1079_v23, %v1081_v52 }
 0x11f   : > { %v1330_v31 = vmul.f32 %v4489_v55, %v3779_v29  ;;  %v1172_v3 = vadd.f32 %v1080_v57, %v927_v10  ;;  %v1331_v32 = vmul.f32 %v4492_v18, %v3779_v29  ;;  %v1332_v26 = vmul.f32 %v3779_v29, %v1212_v13 }
 0x120   : > { %3464 = vpow2.f32 %v2523_v5  ;;  %v1173_v17 = vadd.f32 %v1082_v9, %v928_v30  ;;  %v1574_v62 = vmul.f32 %v4489_v55, %v3809_v59  ;;  %v1575_v38 = vmul.f32 %v4492_v18, %v3809_v59 }
 0x121   : > { %3466 = vpow2.f32 %v2525_v56  ;;  %v1438_v33 = vrot.slane %v1330_v31, 1  ;;  %v3461_v11 = vpop.eup %3460  ;;  %v1288_v15 = vadd.f32 %v1256_v58, %v1172_v3  ;;  %v1439_v1 = vrot.slane %v1331_v32, 1 }
 0x122   : > { %v1289_v36 = vadd.f32 %v1257_v12, %v1173_v17  ;;  %v3463_v39 = vpop.eup %3462  ;;  %v2623_v40 = vmul.f32 %v3461_v11, %v4592_v28  ;;  %v1441_v37 = vrot.slane %v1332_v26, 1  ;;  %v1576_v7 = vmul.f32 %v3809_v59, %v1212_v13 }
 0x123   : > { %v1682_v35 = vrot.slane %v1574_v62, 2  ;;  %v2624_v43 = vmul.f32 %v3463_v39, %v4599_v27  ;;  %v1440_v44 = vsel %vm802_vm0, %v1438_v33, %v1439_v1  ;;  %v1683_v46 = vrot.slane %v1575_v38, 2  ;;  %v609_v38 = vld [vmem:[#allocation2 + $0xb8] sm:$0x3] }
 0x124   : > { %v1861_v51 = vmul.f32 %v3812_v60, %v4696_v42  ;;  %v1442_v63 = vsel %vm802_vm0, %v1439_v1, %v1441_v37  ;;  %v1532_v28 = vadd.f32 %v1440_v44, %v1288_v15  ;;  %v1685_v4 = vrot.slane %v1576_v7, 2 }
 0x125   : > { %v1862_v34 = vmul.f32 %v3812_v60, %v4700_v47  ;;  %v2643_v16 = vpack.c.bf16 %v2624_v43, %v2623_v40  ;;  %v1533_v6 = vadd.f32 %v1442_v63, %v1289_v36  ;;  %v1684_v27 = vsel %vm1047_vm1, %v1682_v35, %v1683_v46  ;;  %v4739_v63 = vld [vmem:[%s5057_s4] ss:$0 sm:$0xff] }
 0x126   : > { %v1935_v14 = vmul.f32 %v3815_v61, %v4696_v42  ;;  %v1686_v19 = vsel %vm1047_vm1, %v1683_v46, %v1685_v4  ;;  %v1776_v23 = vadd.f32 %v1684_v27, %v1532_v28  ;;  %v1936_v58 = vmul.f32 %v3815_v61, %v4700_v47 }
 0x127   : > { %v1937_v25 = vmul.f32 %v3815_v61, %v1817_v48  ;;  %3319 = vmatprep.mubr.bf16.mxu1 %v2643_v16  ;;  %v1777_v54 = vadd.f32 %v1686_v19, %v1533_v6  ;;  %v2179_v52 = vmul.f32 %v4644_v50, %v4696_v42  ;;  %v2180_v5 = vmul.f32 %v4644_v50, %v4700_v47 }
 0x128   : > { %v2043_v0 = vrot.slane %v1935_v14, 1  ;;  %v1893_v10 = vadd.f32 %v1861_v51, %v1776_v23  ;;  %v2044_v30 = vrot.slane %v1936_v58, 1  ;;  %v2181_v13 = vmul.f32 %v4644_v50, %v1817_v48 }
 0x129   : > { %v2046_v57 = vrot.slane %v1937_v25, 1  ;;  %v1894_v9 = vadd.f32 %v1862_v34, %v1777_v54  ;;  %v2287_v12 = vrot.slane %v2179_v52, 2  ;;  %v2288_v31 = vrot.slane %v2180_v5, 2  ;;  %v1215_v25 = vld [vmem:[#allocation2 + $0xd0] sm:$0x3] }
 0x12a   : > { %v3465_v56 = vpop.eup %3464  ;;  %v652_v3 = vmul.f32 %v4489_v55, %v3763_v20  ;;  %v2045_v26 = vsel %vm802_vm0, %v2043_v0, %v2044_v30  ;;  %v2290_v62 = vrot.slane %v2181_v13, 2  ;;  %v653_v40 = vmul.f32 %v4492_v18, %v3763_v20 }
 0x12b   : > { %v3467_v17 = vpop.eup %3466  ;;  %v2561_v32 = vadd.f32 1.0, %v3465_v56  ;;  %v2047_v33 = vsel %vm802_vm0, %v2044_v30, %v2046_v57  ;;  %v2137_v15 = vadd.f32 %v2045_v26, %v1893_v10  ;;  %v2289_v1 = vsel %vm1047_vm1, %v2287_v12, %v2288_v31 }
 0x12c   : > { %v2562_v11 = vadd.f32 1.0, %v3467_v17  ;;  %v2138_v36 = vadd.f32 %v2047_v33, %v1894_v9  ;;  %v2291_v39 = vsel %vm1047_vm1, %v2288_v31, %v2290_v62  ;;  %v727_v37 = vmul.f32 %v4489_v55, %v3766_v21 }
 0x12d   : > { %3468 = vrcp.f32 %v2561_v32  ;;  %v2381_v7 = vadd.f32 %v2289_v1, %v2137_v15  ;;  %v728_v43 = vmul.f32 %v4492_v18, %v3766_v21  ;;  %v729_v44 = vmul.f32 %v3766_v21, %v609_v38  ;;  %v1818_v15 = vld [vmem:[#allocation2 + $0xd8] sm:$0xff] }
 0x12e   : > { %3470 = vrcp.f32 %v2562_v11  ;;  %v2382_v35 = vadd.f32 %v2291_v39, %v2138_v36  ;;  %v838_v46 = vrot.slane %v727_v37, 1  ;;  %v972_v48 = vmul.f32 %v4489_v55, %v3769_v22  ;;  %v1819_v37 = vld [vmem:[#allocation2 + $0xe0] sm:$0xff] }
 0x12f   : > { %v973_v51 = vmul.f32 %v4492_v18, %v3769_v22  ;;  %v4742_v28 = vadd.f32 %v4739_v63, %v2381_v7  ;;  %v839_v34 = vrot.slane %v728_v43, 1  ;;  %v974_v16 = vmul.f32 %v3769_v22, %v609_v38 }
 0x130   : > { %v4745_v4 = vadd.f32 %v4739_v63, %v2382_v35  ;;  %v841_v6 = vrot.slane %v729_v44, 1  ;;  %v1083_v27 = vrot.slane %v972_v48, 2  ;;  %v1258_v18 = vmul.f32 %v4696_v42, %v3772_v24  ;;  %v1820_v48 = vld [vmem:[#allocation2 + $0xe8] sm:$0x3] }
 0x131   : > { %v1084_v55 = vrot.slane %v973_v51, 2  ;;  %v2451_v14 = vsub.f32 0.0, %v4742_v28  ;;  %v840_v23 = vsel %vm802_vm0, %v838_v46, %v839_v34  ;;  %v1086_v58 = vrot.slane %v974_v16, 2 }
 0x132   : > { %v2452_v19 = vsub.f32 0.0, %v4745_v4  ;;  %v842_v54 = vsel %vm802_vm0, %v839_v34, %v841_v6  ;;  %v929_v0 = vadd.f32 %v840_v23, %v652_v3  ;;  %v1259_v5 = vmul.f32 %v4700_v47, %v3772_v24 }
 0x133   : > { %v1085_v52 = vsel %vm1047_vm1, %v1083_v27, %v1084_v55  ;;  %v2495_v10 = vmul.f32 1.442695, %v2451_v14  ;;  %v930_v57 = vadd.f32 %v842_v54, %v653_v40  ;;  %v1087_v13 = vsel %vm1047_vm1, %v1084_v55, %v1086_v58 }
 0x134   : > { %v2497_v30 = vmul.f32 1.442695, %v2452_v19  ;;  %v1174_v56 = vadd.f32 %v1085_v52, %v929_v0  ;;  %v1333_v9 = vmul.f32 %v4696_v42, %v3779_v29  ;;  %v1334_v12 = vmul.f32 %v4700_v47, %v3779_v29 }
 0x135   : > { %v1335_v31 = vmul.f32 %v3779_v29, %v1215_v25  ;;  %3472 = vpow2.f32 %v2495_v10  ;;  %v1175_v3 = vadd.f32 %v1087_v13, %v930_v57  ;;  %v1577_v17 = vmul.f32 %v4696_v42, %v3809_v59 }
 0x136   : > { %v1578_v32 = vmul.f32 %v4700_v47, %v3809_v59  ;;  %3474 = vpow2.f32 %v2497_v30  ;;  %v1290_v33 = vadd.f32 %v1258_v18, %v1174_v56  ;;  %v1443_v62 = vrot.slane %v1333_v9, 1 }
 0x137   : > { %v3469_v26 = vpop.eup %3468  ;;  %v1444_v11 = vrot.slane %v1334_v12, 1  ;;  %v1291_v38 = vadd.f32 %v1259_v5, %v1175_v3  ;;  %v1446_v39 = vrot.slane %v1335_v31, 1  ;;  %v1579_v40 = vmul.f32 %v3809_v59, %v1215_v25 }
 0x138   : > { %v3471_v36 = vpop.eup %3470  ;;  %v2625_v1 = vmul.f32 %v3469_v26, %v4665_v49  ;;  %v1687_v35 = vrot.slane %v1577_v17, 2  ;;  %v1688_v47 = vrot.slane %v1578_v32, 2  ;;  %v1863_v51 = vmul.f32 %v3812_v60, %v1818_v15  ;;  %v630_v17 = vld [vmem:[#allocation2 + $0x160] sm:$0x3] }
 0x139   : > { %v2626_v7 = vmul.f32 %v3471_v36, %v4672_v8  ;;  %v1445_v42 = vsel %vm802_vm0, %v1443_v62, %v1444_v11  ;;  %v1447_v43 = vsel %vm802_vm0, %v1444_v11, %v1446_v39  ;;  %v1690_v46 = vrot.slane %v1579_v40, 2 }
 0x13a   : > { %v1534_v44 = vadd.f32 %v1445_v42, %v1290_v33  ;;  %v1535_v49 = vadd.f32 %v1447_v43, %v1291_v38  ;;  %v1689_v16 = vsel %vm1047_vm1, %v1687_v35, %v1688_v47  ;;  %v1864_v6 = vmul.f32 %v3812_v60, %v1819_v37 }
 0x13b   : > { %v2644_v34 = vpack.c.bf16 %v2626_v7, %v2625_v1  ;;  %v1691_v27 = vsel %vm1047_vm1, %v1688_v47, %v1690_v46  ;;  %v1938_v55 = vmul.f32 %v3815_v61, %v1818_v15  ;;  %v1939_v18 = vmul.f32 %v3815_v61, %v1819_v37 }
 0x13c   : > { %v1778_v8 = vadd.f32 %v1689_v16, %v1534_v44  ;;  %v1779_v14 = vadd.f32 %v1691_v27, %v1535_v49  ;;  %v1940_v19 = vmul.f32 %v3815_v61, %v1820_v48  ;;  %v2182_v23 = vmul.f32 %v4644_v50, %v1818_v15  ;;  %v4781_v25 = vpop.f32.mrb[0].mxu0 }
 0x13d   : > { %3320 = vmatmul.mubr.bf16.gmra.mrb[8].mxu1 %v2644_v34  ;;  %v2183_v58 = vmul.f32 %v4644_v50, %v1819_v37  ;;  %v2048_v0 = vrot.slane %v1938_v55, 1  ;;  %v2049_v52 = vrot.slane %v1939_v18, 1  ;;  %v2184_v5 = vmul.f32 %v4644_v50, %v1820_v48  ;;  %v4784_v10 = vpop.f32.mrb[1].mxu0 }
 0x13e   : > { %v1895_v54 = vadd.f32 %v1863_v51, %v1778_v8  ;;  %v1896_v30 = vadd.f32 %v1864_v6, %v1779_v14  ;;  %v2051_v57 = vrot.slane %v1940_v19, 1  ;;  %v2292_v13 = vrot.slane %v2182_v23, 2  ;;  %v4786_v9 = vpop.f32.mrb[2].mxu0 }
 0x13f   : > { %v2293_v56 = vrot.slane %v2183_v58, 2  ;;  %v3473_v12 = vpop.eup %3472  ;;  %v2050_v31 = vsel %vm802_vm0, %v2048_v0, %v2049_v52  ;;  %v2295_v3 = vrot.slane %v2184_v5, 2  ;;  %v666_v32 = vmul.f32 %v4554_v45, %v3763_v20  ;;  %v4793_v33 = vpop.f32.mrb[3].mxu0  ;;  %v1236_v58 = vld [vmem:[#allocation2 + $0x178] sm:$0x3] }
 0x140   : > { %v667_v26 = vmul.f32 %v4562_v2, %v3763_v20  ;;  %v3475_v62 = vpop.eup %3474  ;;  %v2547_v11 = vadd.f32 1.0, %v3473_v12  ;;  %v2052_v15 = vsel %vm802_vm0, %v2049_v52, %v2051_v57  ;;  %v2139_v36 = vadd.f32 %v2050_v31, %v1895_v54 }
 0x141   : > { %v2294_v1 = vsel %vm1047_vm1, %v2292_v13, %v2293_v56  ;;  %v2548_v38 = vadd.f32 1.0, %v3475_v62  ;;  %v2140_v39 = vadd.f32 %v2052_v15, %v1896_v30  ;;  %v2296_v40 = vsel %vm1047_vm1, %v2293_v56, %v2295_v3 }
 0x142   : > { %v748_v37 = vmul.f32 %v4554_v45, %v3766_v21  ;;  %3476 = vrcp.f32 %v2547_v11  ;;  %v2383_v7 = vadd.f32 %v2294_v1, %v2139_v36  ;;  %v749_v42 = vmul.f32 %v4562_v2, %v3766_v21 }
 0x143   : > { %v750_v35 = vmul.f32 %v3766_v21, %v630_v17  ;;  %3478 = vrcp.f32 %v2548_v38  ;;  %v2384_v47 = vadd.f32 %v2296_v40, %v2140_v39  ;;  %v993_v44 = vmul.f32 %v4554_v45, %v3769_v22  ;;  %v4834_v38 = vld [vmem:[#allocation2 + $0x180] sm:$0xff] }
 0x144   : > { %v873_v43 = vrot.slane %v748_v37, 1  ;;  %v4806_v46 = vadd.f32 %v4739_v63, %v2383_v7  ;;  %v874_v48 = vrot.slane %v749_v42, 1  ;;  %v994_v34 = vmul.f32 %v4562_v2, %v3769_v22  ;;  %v1841_v42 = vld [vmem:[#allocation2 + $0x190] sm:$0x3] }
 0x145   : > { %v876_v51 = vrot.slane %v750_v35, 1  ;;  %v4811_v49 = vadd.f32 %v4739_v63, %v2384_v47  ;;  %v995_v16 = vmul.f32 %v3769_v22, %v630_v17  ;;  %v1118_v6 = vrot.slane %v993_v44, 2 }
 0x146   : > { %v1272_v27 = vmul.f32 %v4621_v41, %v3772_v24  ;;  %v2453_v8 = vsub.f32 0.0, %v4806_v46  ;;  %v875_v45 = vsel %vm802_vm0, %v873_v43, %v874_v48  ;;  %v1119_v18 = vrot.slane %v994_v34, 2 }
 0x147   : > { %v877_v55 = vsel %vm802_vm0, %v874_v48, %v876_v51  ;;  %v2454_v14 = vsub.f32 0.0, %v4811_v49  ;;  %v943_v19 = vadd.f32 %v875_v45, %v666_v32  ;;  %v1121_v23 = vrot.slane %v995_v16, 2  ;;  %v4842_v51 = vld [vmem:[#allocation2 + $0x188] sm:$0xff] }
 0x148   : > { %v944_v2 = vadd.f32 %v877_v55, %v667_v26  ;;  %v2499_v54 = vmul.f32 1.442695, %v2453_v8  ;;  %v1120_v0 = vsel %vm1047_vm1, %v1118_v6, %v1119_v18  ;;  %v1273_v52 = vmul.f32 %v4630_v53, %v3772_v24 }
 0x149   : > { %v1354_v5 = vmul.f32 %v4621_v41, %v3779_v29  ;;  %v2501_v30 = vmul.f32 1.442695, %v2454_v14  ;;  %v1122_v57 = vsel %vm1047_vm1, %v1119_v18, %v1121_v23  ;;  %v1188_v13 = vadd.f32 %v1120_v0, %v943_v19 }
 0x14a   : > { %v1355_v56 = vmul.f32 %v4630_v53, %v3779_v29  ;;  %3480 = vpow2.f32 %v2499_v54  ;;  %v1189_v12 = vadd.f32 %v1122_v57, %v944_v2  ;;  %v1356_v31 = vmul.f32 %v3779_v29, %v1236_v58 }
 0x14b   : > { %v1478_v3 = vrot.slane %v1354_v5, 1  ;;  %3482 = vpow2.f32 %v2501_v30  ;;  %v1304_v17 = vadd.f32 %v1272_v27, %v1188_v13  ;;  %v1598_v26 = vmul.f32 %v4621_v41, %v3809_v59 }
 0x14c   : > { %v1479_v32 = vrot.slane %v1355_v56, 1  ;;  %v3477_v62 = vpop.eup %3476  ;;  %v1305_v11 = vadd.f32 %v1273_v52, %v1189_v12  ;;  %v1481_v15 = vrot.slane %v1356_v31, 1  ;;  %v1599_v36 = vmul.f32 %v4630_v53, %v3809_v59 }
 0x14d   : > { %v1600_v1 = vmul.f32 %v3809_v59, %v1236_v58  ;;  %v3479_v39 = vpop.eup %3478  ;;  %v2611_v40 = vmul.f32 %v3477_v62, %v4742_v28  ;;  %v1722_v7 = vrot.slane %v1598_v26, 2  ;;  %v1877_v35 = vmul.f32 %v3812_v60, %v4834_v38  ;;  %v633_v62 = vld [vmem:[#allocation2 + $0x178] sm:$0x3] }
 0x14e   : > { %v1480_v37 = vsel %vm802_vm0, %v1478_v3, %v1479_v32  ;;  %v2612_v47 = vmul.f32 %v3479_v39, %v4745_v4  ;;  %v1482_v43 = vsel %vm802_vm0, %v1479_v32, %v1481_v15  ;;  %v1723_v48 = vrot.slane %v1599_v36, 2 }
 0x14f   : > { %v1548_v44 = vadd.f32 %v1480_v37, %v1304_v17  ;;  %v1549_v34 = vadd.f32 %v1482_v43, %v1305_v11  ;;  %v1725_v16 = vrot.slane %v1600_v1, 2  ;;  %v1878_v28 = vmul.f32 %v3812_v60, %v4842_v51 }
 0x150   : > { %v1959_v6 = vmul.f32 %v3815_v61, %v4834_v38  ;;  %v2637_v27 = vpack.c.bf16 %v2612_v47, %v2611_v40  ;;  %v1724_v8 = vsel %vm1047_vm1, %v1722_v7, %v1723_v48  ;;  %v1960_v4 = vmul.f32 %v3815_v61, %v4842_v51 }
 0x151   : > { %v1961_v45 = vmul.f32 %v3815_v61, %v1841_v42  ;;  %v1726_v55 = vsel %vm1047_vm1, %v1723_v48, %v1725_v16  ;;  %v1792_v18 = vadd.f32 %v1724_v8, %v1548_v44  ;;  %v2203_v19 = vmul.f32 %v4644_v50, %v4834_v38 }
 0x152   : > { %v2083_v14 = vrot.slane %v1959_v6, 1  ;;  %3307 = vmatprep.mubr.bf16.mxu0 %v2637_v27  ;;  %v1793_v2 = vadd.f32 %v1726_v55, %v1549_v34  ;;  %v2084_v23 = vrot.slane %v1960_v4, 1  ;;  %v2204_v54 = vmul.f32 %v4644_v50, %v4842_v51 }
 0x153   : > { %v2086_v58 = vrot.slane %v1961_v45, 1  ;;  %v1909_v0 = vadd.f32 %v1877_v35, %v1792_v18  ;;  %v2205_v52 = vmul.f32 %v4644_v50, %v1841_v42  ;;  %v2327_v5 = vrot.slane %v2203_v19, 2  ;;  %v1239_v18 = vld [vmem:[#allocation2 + $0x190] sm:$0x3] }
 0x154   : > { %v668_v30 = vmul.f32 %v4621_v41, %v3763_v20  ;;  %v3481_v57 = vpop.eup %3480  ;;  %v1910_v13 = vadd.f32 %v1878_v28, %v1793_v2  ;;  %v2085_v56 = vsel %vm802_vm0, %v2083_v14, %v2084_v23  ;;  %v2328_v31 = vrot.slane %v2204_v54, 2 }
 0x155   : > { %v2087_v12 = vsel %vm802_vm0, %v2084_v23, %v2086_v58  ;;  %v3483_v3 = vpop.eup %3482  ;;  %v2549_v17 = vadd.f32 1.0, %v3481_v57  ;;  %v2153_v32 = vadd.f32 %v2085_v56, %v1909_v0  ;;  %v2330_v26 = vrot.slane %v2205_v52, 2  ;;  %v1842_v57 = vld [vmem:[#allocation2 + $0x198] sm:$0xff] }
 0x156   : > { %v669_v11 = vmul.f32 %v4630_v53, %v3763_v20  ;;  %v2550_v15 = vadd.f32 1.0, %v3483_v3  ;;  %v2154_v36 = vadd.f32 %v2087_v12, %v1910_v13  ;;  %v2329_v1 = vsel %vm1047_vm1, %v2327_v5, %v2328_v31 }
 0x157   : > { %v751_v39 = vmul.f32 %v4621_v41, %v3766_v21  ;;  %3484 = vrcp.f32 %v2549_v17  ;;  %v2331_v40 = vsel %vm1047_vm1, %v2328_v31, %v2330_v26  ;;  %v2397_v37 = vadd.f32 %v2329_v1, %v2153_v32  ;;  %v1843_v26 = vld [vmem:[#allocation2 + $0x1a0] sm:$0xff] }
 0x158   : > { %v752_v7 = vmul.f32 %v4630_v53, %v3766_v21  ;;  %3486 = vrcp.f32 %v2550_v15  ;;  %v2398_v42 = vadd.f32 %v2331_v40, %v2154_v36  ;;  %v753_v35 = vmul.f32 %v3766_v21, %v633_v62 }
 0x159   : > { %v878_v47 = vrot.slane %v751_v39, 1  ;;  %v4872_v20 = vadd.f32 %v4739_v63, %v2397_v37  ;;  %v996_v44 = vmul.f32 %v4621_v41, %v3769_v22  ;;  %v997_v48 = vmul.f32 %v4630_v53, %v3769_v22  ;;  %v1844_v37 = vld [vmem:[#allocation2 + $0x1a8] sm:$0x3] }
 0x15a   : > { %v879_v43 = vrot.slane %v752_v7, 1  ;;  %v4879_v34 = vadd.f32 %v4739_v63, %v2398_v42  ;;  %v881_v16 = vrot.slane %v753_v35, 1  ;;  %v998_v28 = vmul.f32 %v3769_v22, %v633_v62 }
 0x15b   : > { %v1274_v21 = vmul.f32 %v4834_v38, %v3772_v24  ;;  %v2467_v6 = vsub.f32 0.0, %v4872_v20  ;;  %v1123_v8 = vrot.slane %v996_v44, 2  ;;  %v1124_v4 = vrot.slane %v997_v48, 2 }
 0x15c   : > { %v880_v27 = vsel %vm802_vm0, %v878_v47, %v879_v43  ;;  %v2468_v41 = vsub.f32 0.0, %v4879_v34  ;;  %v882_v45 = vsel %vm802_vm0, %v879_v43, %v881_v16  ;;  %v1126_v55 = vrot.slane %v998_v28, 2  ;;  %v4917_v28 = vld [vmem:[%s5059_s6] ss:$0 sm:$0xff] }
 0x15d   : > { %v945_v53 = vadd.f32 %v880_v27, %v668_v30  ;;  %v2527_v14 = vmul.f32 1.442695, %v2467_v6  ;;  %v946_v19 = vadd.f32 %v882_v45, %v669_v11  ;;  %v1125_v22 = vsel %vm1047_vm1, %v1123_v8, %v1124_v4 }
 0x15e   : > { %v1275_v2 = vmul.f32 %v4842_v51, %v3772_v24  ;;  %v2529_v23 = vmul.f32 1.442695, %v2468_v41  ;;  %v1127_v58 = vsel %vm1047_vm1, %v1124_v4, %v1126_v55  ;;  %v1357_v0 = vmul.f32 %v4834_v38, %v3779_v29 }
 0x15f   : > { %v1190_v54 = vadd.f32 %v1125_v22, %v945_v53  ;;  %3488 = vpow2.f32 %v2527_v14  ;;  %v1191_v52 = vadd.f32 %v1127_v58, %v946_v19  ;;  %v1358_v5 = vmul.f32 %v4842_v51, %v3779_v29 }
 0x160   : > { %v1359_v30 = vmul.f32 %v3779_v29, %v1239_v18  ;;  %3490 = vpow2.f32 %v2529_v23  ;;  %v1483_v56 = vrot.slane %v1357_v0, 1  ;;  %v1601_v24 = vmul.f32 %v4834_v38, %v3809_v59 }
 0x161   : > { %v1306_v13 = vadd.f32 %v1274_v21, %v1190_v54  ;;  %v3485_v12 = vpop.eup %3484  ;;  %v1307_v31 = vadd.f32 %v1275_v2, %v1191_v52  ;;  %v1484_v3 = vrot.slane %v1358_v5, 1  ;;  %v1602_v32 = vmul.f32 %v4842_v51, %v3809_v59 }
 0x162   : > { %v1486_v17 = vrot.slane %v1359_v30, 1  ;;  %v3487_v62 = vpop.eup %3486  ;;  %v2613_v11 = vmul.f32 %v3485_v12, %v4806_v46  ;;  %v1603_v29 = vmul.f32 %v3809_v59, %v1239_v18  ;;  %v1727_v15 = vrot.slane %v1601_v24, 2 }
 0x163   : > { %v1879_v36 = vmul.f32 %v3812_v60, %v1842_v57  ;;  %v2614_v1 = vmul.f32 %v3487_v62, %v4811_v49  ;;  %v1485_v38 = vsel %vm802_vm0, %v1483_v56, %v1484_v3  ;;  %v1728_v40 = vrot.slane %v1602_v32, 2 }
 0x164   : > { %v1487_v39 = vsel %vm802_vm0, %v1484_v3, %v1486_v17  ;;  %v1550_v7 = vadd.f32 %v1485_v38, %v1306_v13  ;;  %v1730_v51 = vrot.slane %v1603_v29, 2  ;;  %v1880_v35 = vmul.f32 %v3812_v60, %v1843_v26 }
 0x165   : > { %v1551_v42 = vadd.f32 %v1487_v39, %v1307_v31  ;;  %v2638_v47 = vpack.c.bf16 %v2614_v1, %v2613_v11  ;;  %v1729_v46 = vsel %vm1047_vm1, %v1727_v15, %v1728_v40  ;;  %v1962_v59 = vmul.f32 %v3815_v61, %v1842_v57 }
 0x166   : > { %v1963_v43 = vmul.f32 %v3815_v61, %v1843_v26  ;;  %v1731_v49 = vsel %vm1047_vm1, %v1728_v40, %v1730_v51  ;;  %v1794_v44 = vadd.f32 %v1729_v46, %v1550_v7  ;;  %v1964_v48 = vmul.f32 %v3815_v61, %v1844_v37  ;;  %v3313_v60 = vpop.f32.mrb[0].mxu1 }
 0x167   : > { %v2206_v16 = vmul.f32 %v4644_v50, %v1842_v57  ;;  %3308 = vmatmul.mubr.bf16.gmra.mrb[12].mxu0 %v2638_v47  ;;  %v1795_v21 = vadd.f32 %v1731_v49, %v1551_v42  ;;  %v2088_v6 = vrot.slane %v1962_v59, 1  ;;  %v2207_v8 = vmul.f32 %v4644_v50, %v1843_v26  ;;  %v2799_v4 = vpop.f32.mrb[1].mxu1 }
 0x168   : > { %v2089_v27 = vrot.slane %v1963_v43, 1  ;;  %v1911_v41 = vadd.f32 %v1879_v36, %v1794_v44  ;;  %v2091_v45 = vrot.slane %v1964_v48, 1  ;;  %v2208_v53 = vmul.f32 %v4644_v50, %v1844_v37  ;;  %v3314_v55 = vpop.f32.mrb[2].mxu1 }
 0x169   : > { %v2332_v61 = vrot.slane %v2206_v16, 2  ;;  %v3489_v18 = vpop.eup %3488  ;;  %v1912_v14 = vadd.f32 %v1880_v35, %v1795_v21  ;;  %v2333_v22 = vrot.slane %v2207_v8, 2  ;;  %v4924_v2 = vadd.f32 %v4781_v25, %v4917_v28  ;;  %v2802_v23 = vpop.f32.mrb[3].mxu1 }
 0x16a   : > { %v2090_v19 = vsel %vm802_vm0, %v2088_v6, %v2089_v27  ;;  %v3491_v58 = vpop.eup %3490  ;;  %v2563_v54 = vadd.f32 1.0, %v3489_v18  ;;  %v2092_v0 = vsel %vm802_vm0, %v2089_v27, %v2091_v45  ;;  %v2335_v5 = vrot.slane %v2208_v53, 2 }
 0x16b   : > { %v2155_v52 = vadd.f32 %v2090_v19, %v1911_v41  ;;  %v2564_v30 = vadd.f32 1.0, %v3491_v58  ;;  %v2156_v50 = vadd.f32 %v2092_v0, %v1912_v14  ;;  %v2334_v57 = vsel %vm1047_vm1, %v2332_v61, %v2333_v22 }
 0x16c   : > { %v2864_v13 = vsub.f32 0.0, %v4924_v2  ;;  %3492 = vrcp.f32 %v2563_v54  ;;  %v2336_v56 = vsel %vm1047_vm1, %v2333_v22, %v2335_v5  ;;  %v4932_v25 = vadd.f32 %v4917_v28, %v4784_v10 }
 0x16d   : > { %v2399_v24 = vadd.f32 %v2334_v57, %v2155_v52  ;;  %3494 = vrcp.f32 %v2564_v30  ;;  %v2400_v12 = vadd.f32 %v2336_v56, %v2156_v50  ;;  %v4935_v3 = vadd.f32 %v3313_v60, %v4917_v28 }
 0x16e   : > { %v2898_v31 = vmul.f32 1.442695, %v2864_v13  ;;  %v2862_v32 = vsub.f32 0.0, %v4932_v25  ;;  %v4943_v26 = vadd.f32 %v4786_v9, %v4917_v28  ;;  %v4946_v62 = vadd.f32 %v4917_v28, %v2799_v4 }
 0x16f   : > { %v4938_v17 = vadd.f32 %v4739_v63, %v2399_v24  ;;  %v4949_v10 = vadd.f32 %v4739_v63, %v2400_v12  ;;  %v2880_v11 = vsub.f32 0.0, %v4935_v3  ;;  %v4954_v29 = vadd.f32 %v4917_v28, %v4793_v33 }
 0x170   : > { %3496 = vpow2.f32 %v2898_v31  ;;  %v2894_v36 = vmul.f32 1.442695, %v2862_v32  ;;  %v2865_v1 = vsub.f32 0.0, %v4943_v26  ;;  %v2878_v9 = vsub.f32 0.0, %v4946_v62 }
 0x171   : > { %v2469_v15 = vsub.f32 0.0, %v4938_v17  ;;  %v2470_v38 = vsub.f32 0.0, %v4949_v10  ;;  %v2930_v39 = vmul.f32 1.442695, %v2880_v11  ;;  %v2863_v63 = vsub.f32 0.0, %v4954_v29 }
 0x172   : > { %v4962_v40 = vadd.f32 %v3314_v55, %v4917_v28  ;;  %3498 = vpow2.f32 %v2894_v36  ;;  %v2900_v7 = vmul.f32 1.442695, %v2865_v1  ;;  %v2926_v42 = vmul.f32 1.442695, %v2878_v9 }
 0x173   : > { %v2531_v37 = vmul.f32 1.442695, %v2469_v15  ;;  %v2533_v33 = vmul.f32 1.442695, %v2470_v38  ;;  %3500 = vpow2.f32 %v2930_v39  ;;  %v2896_v35 = vmul.f32 1.442695, %v2863_v63 }
 0x174   : > { %v2881_v51 = vsub.f32 0.0, %v4962_v40  ;;  %v4966_v47 = vadd.f32 %v4917_v28, %v2802_v23 }
 0x175   : > { %3502 = vpow2.f32 %v2531_v37 }
 0x176   : > { %3504 = vpow2.f32 %v2533_v33  ;;  %v2932_v46 = vmul.f32 1.442695, %v2881_v51  ;;  %v3493_v59 = vpop.eup %3492  ;;  %v2879_v43 = vsub.f32 0.0, %v4966_v47 }
 0x177   : > { %3506 = vpow2.f32 %v2900_v7  ;;  %v3495_v49 = vpop.eup %3494  ;;  %v2627_v44 = vmul.f32 %v3493_v59, %v4872_v20 }
 0x178   : > { %3508 = vpow2.f32 %v2926_v42  ;;  %v2628_v48 = vmul.f32 %v3495_v49, %v4879_v34  ;;  %v2928_v16 = vmul.f32 1.442695, %v2879_v43 }
 0x179   : > { %3510 = vpow2.f32 %v2896_v35 }
 0x17a   : > { %v3497_v60 = vpop.eup %3496  ;;  %3512 = vpow2.f32 %v2932_v46  ;;  %v2645_v21 = vpack.c.bf16 %v2628_v48, %v2627_v44 }
 0x17b   : > { %v2960_v6 = vadd.f32 1.0, %v3497_v60  ;;  %3514 = vpow2.f32 %v2928_v16 }
 0x17c   : > { %v3499_v27 = vpop.eup %3498  ;;  %3323 = vmatprep.mubr.bf16.mxu1 %v2645_v21 }
 0x17d   : > { %3516 = vrcp.f32 %v2960_v6  ;;  %v3501_v8 = vpop.eup %3500  ;;  %v2958_v4 = vadd.f32 1.0, %v3499_v27 }
 0x17e   : > { %v2976_v45 = vadd.f32 1.0, %v3501_v8 }
 0x17f   : > { %v3503_v41 = vpop.eup %3502  ;;  %3518 = vrcp.f32 %v2958_v4 }
 0x180   : > { %v3505_v53 = vpop.eup %3504  ;;  %v2565_v61 = vadd.f32 1.0, %v3503_v41  ;;  %3520 = vrcp.f32 %v2976_v45 }
 0x181   : > { %v3507_v20 = vpop.eup %3506  ;;  %v2566_v55 = vadd.f32 1.0, %v3505_v53 }
 0x182   : > { %v3509_v34 = vpop.eup %3508  ;;  %3522 = vrcp.f32 %v2565_v61  ;;  %v2961_v18 = vadd.f32 1.0, %v3507_v20 }
 0x183   : > { %v3511_v14 = vpop.eup %3510  ;;  %3524 = vrcp.f32 %v2566_v55  ;;  %v2974_v19 = vadd.f32 1.0, %v3509_v34 }
 0x184   : > { %v3513_v22 = vpop.eup %3512  ;;  %3526 = vrcp.f32 %v2961_v18  ;;  %v2959_v23 = vadd.f32 1.0, %v3511_v14 }
 0x185   : > { %v3515_v58 = vpop.eup %3514  ;;  %3528 = vrcp.f32 %v2974_v19  ;;  %v2977_v54 = vadd.f32 1.0, %v3513_v22 }
 0x186   : > { %3530 = vrcp.f32 %v2959_v23  ;;  %v2975_v0 = vadd.f32 1.0, %v3515_v58 }
 0x187   : > { %v3517_v52 = vpop.eup %3516  ;;  %3532 = vrcp.f32 %v2977_v54 }
 0x188   : > { %v3024_v5 = vmul.f32 %v3517_v52, %v4924_v2  ;;  %3534 = vrcp.f32 %v2975_v0 }
 0x189   : > { %v3519_v30 = vpop.eup %3518 }
 0x18a   : > { %3056 = vst [vmem:[%s4976_s21 + $0x10] sm:$0xff] %v3024_v5  ;;  %v3521_v50 = vpop.eup %3520  ;;  %v3022_v57 = vmul.f32 %v3519_v30, %v4932_v25 }
 0x18b   : > { %v3040_v56 = vmul.f32 %v3521_v50, %v4935_v3 }
 0x18c   : > { %v3523_v13 = vpop.eup %3522  ;;  %3054 = vst [vmem:[%s4976_s21] sm:$0xff] %v3022_v57 }
 0x18d   : > { %v3525_v24 = vpop.eup %3524  ;;  %v2629_v12 = vmul.f32 %v3523_v13, %v4938_v17  ;;  %3072 = vst [vmem:[%s4976_s21 + $0x90] sm:$0xff] %v3040_v56 }
 0x18e   : > { %v3527_v31 = vpop.eup %3526  ;;  %v2630_v32 = vmul.f32 %v3525_v24, %v4949_v10 }
 0x18f   : > { %v3529_v2 = vpop.eup %3528  ;;  %v3025_v11 = vmul.f32 %v3527_v31, %v4943_v26 }
 0x190   : > { %v3531_v15 = vpop.eup %3530  ;;  %v2646_v36 = vpack.c.bf16 %v2630_v32, %v2629_v12  ;;  %v3038_v25 = vmul.f32 %v3529_v2, %v4946_v62  ;;  %v3301_v17 = vpop.f32.mrb[4].mxu0 }
 0x191   : > { %v3533_v1 = vpop.eup %3532  ;;  %3057 = vst [vmem:[%s4976_s21 + $0x18] sm:$0xff] %v3025_v11  ;;  %v3023_v3 = vmul.f32 %v3531_v15, %v4954_v29  ;;  %v2760_v38 = vadd.f32 %v3301_v17, %v4917_v28  ;;  %v2751_v39 = vpop.f32.mrb[5].mxu0 }
 0x192   : > { %v3535_v9 = vpop.eup %3534  ;;  %3324 = vmatmul.mubr.bf16.gmra.mrb[12].mxu1 %v2646_v36  ;;  %3070 = vst [vmem:[%s4976_s21 + $0x80] sm:$0xff] %v3038_v25  ;;  %v3041_v10 = vmul.f32 %v3533_v1, %v4962_v40  ;;  %v2752_v63 = vadd.f32 %v4917_v28, %v2751_v39  ;;  %v3302_v62 = vpop.f32.mrb[6].mxu0 }
 0x193   : > { %3055 = vst [vmem:[%s4976_s21 + $0x8] sm:$0xff] %v3023_v3  ;;  %v3039_v26 = vmul.f32 %v3535_v9, %v4966_v47  ;;  %v2868_v37 = vsub.f32 0.0, %v2760_v38  ;;  %v2763_v29 = vadd.f32 %v3302_v62, %v4917_v28  ;;  %v2754_v7 = vpop.f32.mrb[7].mxu0 }
 0x194   : > { %3073 = vst [vmem:[%s4976_s21 + $0x98] sm:$0xff] %v3041_v10  ;;  %v2866_v33 = vsub.f32 0.0, %v2752_v63  ;;  %v2755_v42 = vadd.f32 %v4917_v28, %v2754_v7 }
 0x195   : > { %3071 = vst [vmem:[%s4976_s21 + $0x88] sm:$0xff] %v3039_v26  ;;  %v2906_v51 = vmul.f32 1.442695, %v2868_v37  ;;  %v2869_v40 = vsub.f32 0.0, %v2763_v29 }
 0x196   : > { %v2902_v35 = vmul.f32 1.442695, %v2866_v33  ;;  %v2867_v46 = vsub.f32 0.0, %v2755_v42 }
 0x197   : > { %3536 = vpow2.f32 %v2906_v51  ;;  %v2908_v59 = vmul.f32 1.442695, %v2869_v40 }
 0x198   : > { %3538 = vpow2.f32 %v2902_v35  ;;  %v2904_v47 = vmul.f32 1.442695, %v2867_v46 }
 0x199   : > { %3540 = vpow2.f32 %v2908_v59 }
 0x19a   : > { %3542 = vpow2.f32 %v2904_v47 }
 0x1a1   : > { %v3537_v43 = vpop.eup %3536 }
 0x1a2   : > { %v3539_v49 = vpop.eup %3538  ;;  %v2964_v44 = vadd.f32 1.0, %v3537_v43 }
 0x1a3   : > { %v3541_v48 = vpop.eup %3540  ;;  %v2962_v16 = vadd.f32 1.0, %v3539_v49 }
 0x1a4   : > { %v3543_v60 = vpop.eup %3542  ;;  %3544 = vrcp.f32 %v2964_v44  ;;  %v2965_v21 = vadd.f32 1.0, %v3541_v48 }
 0x1a5   : > { %3546 = vrcp.f32 %v2962_v16  ;;  %v2963_v6 = vadd.f32 1.0, %v3543_v60 }
 0x1a6   : > { %3548 = vrcp.f32 %v2965_v21 }
 0x1a7   : > { %3550 = vrcp.f32 %v2963_v6 }
 0x1ae   : > { %v3545_v27 = vpop.eup %3544 }
 0x1af   : > { %v3547_v8 = vpop.eup %3546  ;;  %v3028_v4 = vmul.f32 %v3545_v27, %v2760_v38 }
 0x1b0   : > { %v3549_v41 = vpop.eup %3548  ;;  %v3026_v45 = vmul.f32 %v3547_v8, %v2752_v63 }
 0x1b1   : > { %v3551_v53 = vpop.eup %3550  ;;  %3060 = vst [vmem:[%s4976_s21 + $0x30] sm:$0xff] %v3028_v4  ;;  %v3029_v61 = vmul.f32 %v3549_v41, %v2763_v29 }
 0x1b2   : > { %3058 = vst [vmem:[%s4976_s21 + $0x20] sm:$0xff] %v3026_v45  ;;  %v3027_v20 = vmul.f32 %v3551_v53, %v2755_v42 }
 0x1b3   : > { %3061 = vst [vmem:[%s4976_s21 + $0x38] sm:$0xff] %v3029_v61 }
 0x1b4   : > { %3059 = vst [vmem:[%s4976_s21 + $0x28] sm:$0xff] %v3027_v20 }
 0x1bb   : > { %v3317_v55 = vpop.f32.mrb[4].mxu1 }
 0x1bc   : > { %v2824_v34 = vadd.f32 %v3317_v55, %v4917_v28  ;;  %v2815_v18 = vpop.f32.mrb[5].mxu1 }
 0x1bd   : > { %v2816_v14 = vadd.f32 %v4917_v28, %v2815_v18  ;;  %v3318_v19 = vpop.f32.mrb[6].mxu1 }
 0x1be   : > { %v2884_v22 = vsub.f32 0.0, %v2824_v34  ;;  %v2827_v23 = vadd.f32 %v3318_v19, %v4917_v28  ;;  %v2818_v58 = vpop.f32.mrb[7].mxu1 }
 0x1bf   : > { %v2882_v54 = vsub.f32 0.0, %v2816_v14  ;;  %v2819_v0 = vadd.f32 %v4917_v28, %v2818_v58 }
 0x1c0   : > { %v2938_v52 = vmul.f32 1.442695, %v2884_v22  ;;  %v2885_v5 = vsub.f32 0.0, %v2827_v23 }
 0x1c1   : > { %v2934_v30 = vmul.f32 1.442695, %v2882_v54  ;;  %v2883_v50 = vsub.f32 0.0, %v2819_v0 }
 0x1c2   : > { %3552 = vpow2.f32 %v2938_v52  ;;  %v2940_v57 = vmul.f32 1.442695, %v2885_v5 }
 0x1c3   : > { %3554 = vpow2.f32 %v2934_v30  ;;  %v2936_v13 = vmul.f32 1.442695, %v2883_v50 }
 0x1c4   : > { %3556 = vpow2.f32 %v2940_v57 }
 0x1c5   : > { %3558 = vpow2.f32 %v2936_v13 }
 0x1cc   : > { %v3553_v56 = vpop.eup %3552 }
 0x1cd   : > { %v3555_v24 = vpop.eup %3554  ;;  %v2980_v12 = vadd.f32 1.0, %v3553_v56 }
 0x1ce   : > { %v3557_v31 = vpop.eup %3556  ;;  %v2978_v32 = vadd.f32 1.0, %v3555_v24 }
 0x1cf   : > { %v3559_v2 = vpop.eup %3558  ;;  %3560 = vrcp.f32 %v2980_v12  ;;  %v2981_v11 = vadd.f32 1.0, %v3557_v31 }
 0x1d0   : > { %3562 = vrcp.f32 %v2978_v32  ;;  %v2979_v15 = vadd.f32 1.0, %v3559_v2 }
 0x1d1   : > { %3564 = vrcp.f32 %v2981_v11 }
 0x1d2   : > { %3566 = vrcp.f32 %v2979_v15 }
 0x1d9   : > { %v3561_v36 = vpop.eup %3560 }
 0x1da   : > { %v3563_v25 = vpop.eup %3562  ;;  %v3044_v1 = vmul.f32 %v3561_v36, %v2824_v34 }
 0x1db   : > { %v3565_v3 = vpop.eup %3564  ;;  %v3042_v17 = vmul.f32 %v3563_v25, %v2816_v14 }
 0x1dc   : > { %v3567_v9 = vpop.eup %3566  ;;  %3076 = vst [vmem:[%s4976_s21 + $0xb0] sm:$0xff] %v3044_v1  ;;  %v3045_v10 = vmul.f32 %v3565_v3, %v2827_v23 }
 0x1dd   : > { %3074 = vst [vmem:[%s4976_s21 + $0xa0] sm:$0xff] %v3042_v17  ;;  %v3043_v38 = vmul.f32 %v3567_v9, %v2819_v0 }
 0x1de   : > { %3077 = vst [vmem:[%s4976_s21 + $0xb8] sm:$0xff] %v3045_v10 }
 0x1df   : > { %3075 = vst [vmem:[%s4976_s21 + $0xa8] sm:$0xff] %v3043_v38 }
 0x1e5   : > { %v3305_v39 = vpop.f32.mrb[8].mxu0 }
 0x1e6   : > { %v2776_v26 = vadd.f32 %v3305_v39, %v4917_v28  ;;  %v2767_v63 = vpop.f32.mrb[9].mxu0 }
 0x1e7   : > { %v2768_v62 = vadd.f32 %v4917_v28, %v2767_v63  ;;  %v3306_v37 = vpop.f32.mrb[10].mxu0 }
 0x1e8   : > { %v2872_v29 = vsub.f32 0.0, %v2776_v26  ;;  %v2779_v7 = vadd.f32 %v3306_v37, %v4917_v28  ;;  %v2770_v33 = vpop.f32.mrb[11].mxu0 }
 0x1e9   : > { %v2870_v42 = vsub.f32 0.0, %v2768_v62  ;;  %v2771_v51 = vadd.f32 %v4917_v28, %v2770_v33 }
 0x1ea   : > { %v2914_v40 = vmul.f32 1.442695, %v2872_v29  ;;  %v2873_v35 = vsub.f32 0.0, %v2779_v7 }
 0x1eb   : > { %v2910_v46 = vmul.f32 1.442695, %v2870_v42  ;;  %v2871_v59 = vsub.f32 0.0, %v2771_v51 }
 0x1ec   : > { %3568 = vpow2.f32 %v2914_v40  ;;  %v2916_v47 = vmul.f32 1.442695, %v2873_v35 }
 0x1ed   : > { %3570 = vpow2.f32 %v2910_v46  ;;  %v2912_v43 = vmul.f32 1.442695, %v2871_v59 }
 0x1ee   : > { %3572 = vpow2.f32 %v2916_v47 }
 0x1ef   : > { %3574 = vpow2.f32 %v2912_v43 }
 0x1f6   : > { %v3569_v49 = vpop.eup %3568 }
 0x1f7   : > { %v3571_v44 = vpop.eup %3570  ;;  %v2968_v48 = vadd.f32 1.0, %v3569_v49 }
 0x1f8   : > { %v3573_v16 = vpop.eup %3572  ;;  %v2966_v60 = vadd.f32 1.0, %v3571_v44 }
 0x1f9   : > { %v3575_v21 = vpop.eup %3574  ;;  %3576 = vrcp.f32 %v2968_v48  ;;  %v2969_v6 = vadd.f32 1.0, %v3573_v16 }
 0x1fa   : > { %3578 = vrcp.f32 %v2966_v60  ;;  %v2967_v27 = vadd.f32 1.0, %v3575_v21 }
 0x1fb   : > { %3580 = vrcp.f32 %v2969_v6 }
 0x1fc   : > { %3582 = vrcp.f32 %v2967_v27 }
 0x203   : > { %v3577_v8 = vpop.eup %3576 }
 0x204   : > { %v3579_v4 = vpop.eup %3578  ;;  %v3032_v41 = vmul.f32 %v3577_v8, %v2776_v26 }
 0x205   : > { %v3581_v45 = vpop.eup %3580  ;;  %v3030_v53 = vmul.f32 %v3579_v4, %v2768_v62 }
 0x206   : > { %v3583_v61 = vpop.eup %3582  ;;  %3064 = vst [vmem:[%s4976_s21 + $0x50] sm:$0xff] %v3032_v41  ;;  %v3033_v20 = vmul.f32 %v3581_v45, %v2779_v7 }
 0x207   : > { %3062 = vst [vmem:[%s4976_s21 + $0x40] sm:$0xff] %v3030_v53  ;;  %v3031_v55 = vmul.f32 %v3583_v61, %v2771_v51 }
 0x208   : > { %3065 = vst [vmem:[%s4976_s21 + $0x58] sm:$0xff] %v3033_v20 }
 0x209   : > { %3063 = vst [vmem:[%s4976_s21 + $0x48] sm:$0xff] %v3031_v55 }
 0x210   : > { %v3321_v34 = vpop.f32.mrb[8].mxu1 }
 0x211   : > { %v2840_v18 = vadd.f32 %v3321_v34, %v4917_v28  ;;  %v2831_v14 = vpop.f32.mrb[9].mxu1 }
 0x212   : > { %v2832_v19 = vadd.f32 %v4917_v28, %v2831_v14  ;;  %v3322_v22 = vpop.f32.mrb[10].mxu1 }
 0x213   : > { %v2888_v23 = vsub.f32 0.0, %v2840_v18  ;;  %v2843_v58 = vadd.f32 %v3322_v22, %v4917_v28  ;;  %v2834_v54 = vpop.f32.mrb[11].mxu1 }
 0x214   : > { %v2886_v0 = vsub.f32 0.0, %v2832_v19  ;;  %v2835_v52 = vadd.f32 %v4917_v28, %v2834_v54 }
 0x215   : > { %v2946_v5 = vmul.f32 1.442695, %v2888_v23  ;;  %v2889_v30 = vsub.f32 0.0, %v2843_v58 }
 0x216   : > { %v2942_v50 = vmul.f32 1.442695, %v2886_v0  ;;  %v2887_v57 = vsub.f32 0.0, %v2835_v52 }
 0x217   : > { %3584 = vpow2.f32 %v2946_v5  ;;  %v2948_v13 = vmul.f32 1.442695, %v2889_v30 }
 0x218   : > { %3586 = vpow2.f32 %v2942_v50  ;;  %v2944_v56 = vmul.f32 1.442695, %v2887_v57 }
 0x219   : > { %3588 = vpow2.f32 %v2948_v13 }
 0x21a   : > { %3590 = vpow2.f32 %v2944_v56 }
 0x221   : > { %v3585_v24 = vpop.eup %3584 }
 0x222   : > { %v3587_v12 = vpop.eup %3586  ;;  %v2984_v31 = vadd.f32 1.0, %v3585_v24 }
 0x223   : > { %v3589_v32 = vpop.eup %3588  ;;  %v2982_v2 = vadd.f32 1.0, %v3587_v12 }
 0x224   : > { %v3591_v11 = vpop.eup %3590  ;;  %3592 = vrcp.f32 %v2984_v31  ;;  %v2985_v15 = vadd.f32 1.0, %v3589_v32 }
 0x225   : > { %3594 = vrcp.f32 %v2982_v2  ;;  %v2983_v36 = vadd.f32 1.0, %v3591_v11 }
 0x226   : > { %3596 = vrcp.f32 %v2985_v15 }
 0x227   : > { %3598 = vrcp.f32 %v2983_v36 }
 0x22e   : > { %v3593_v25 = vpop.eup %3592 }
 0x22f   : > { %v3595_v1 = vpop.eup %3594  ;;  %v3048_v3 = vmul.f32 %v3593_v25, %v2840_v18 }
 0x230   : > { %v3597_v17 = vpop.eup %3596  ;;  %v3046_v9 = vmul.f32 %v3595_v1, %v2832_v19 }
 0x231   : > { %v3599_v10 = vpop.eup %3598  ;;  %3080 = vst [vmem:[%s4976_s21 + $0xd0] sm:$0xff] %v3048_v3  ;;  %v3049_v38 = vmul.f32 %v3597_v17, %v2843_v58 }
 0x232   : > { %3078 = vst [vmem:[%s4976_s21 + $0xc0] sm:$0xff] %v3046_v9  ;;  %v3047_v39 = vmul.f32 %v3599_v10, %v2835_v52 }
 0x233   : > { %3081 = vst [vmem:[%s4976_s21 + $0xd8] sm:$0xff] %v3049_v38 }
 0x234   : > { %3079 = vst [vmem:[%s4976_s21 + $0xc8] sm:$0xff] %v3047_v39 }
 0x23a   : > { %v3309_v26 = vpop.f32.mrb[12].mxu0 }
 0x23b   : > { %v2792_v63 = vadd.f32 %v3309_v26, %v4917_v28  ;;  %v2783_v62 = vpop.f32.mrb[13].mxu0 }
 0x23c   : > { %v2784_v37 = vadd.f32 %v4917_v28, %v2783_v62  ;;  %v3310_v29 = vpop.f32.mrb[14].mxu0 }
 0x23d   : > { %v2876_v7 = vsub.f32 0.0, %v2792_v63  ;;  %v2795_v33 = vadd.f32 %v3310_v29, %v4917_v28  ;;  %v2786_v42 = vpop.f32.mrb[15].mxu0 }
 0x23e   : > { %v2874_v51 = vsub.f32 0.0, %v2784_v37  ;;  %v2787_v40 = vadd.f32 %v4917_v28, %v2786_v42 }
 0x23f   : > { %v2922_v35 = vmul.f32 1.442695, %v2876_v7  ;;  %v2877_v46 = vsub.f32 0.0, %v2795_v33 }
 0x240   : > { %v2918_v59 = vmul.f32 1.442695, %v2874_v51  ;;  %v2875_v47 = vsub.f32 0.0, %v2787_v40 }
 0x241   : > { %3600 = vpow2.f32 %v2922_v35  ;;  %v2924_v43 = vmul.f32 1.442695, %v2877_v46 }
 0x242   : > { %3602 = vpow2.f32 %v2918_v59  ;;  %v2920_v49 = vmul.f32 1.442695, %v2875_v47 }
 0x243   : > { %3604 = vpow2.f32 %v2924_v43 }
 0x244   : > { %3606 = vpow2.f32 %v2920_v49 }
 0x24b   : > { %v3601_v44 = vpop.eup %3600 }
 0x24c   : > { %v3603_v48 = vpop.eup %3602  ;;  %v2972_v16 = vadd.f32 1.0, %v3601_v44 }
 0x24d   : > { %v3605_v60 = vpop.eup %3604  ;;  %v2970_v21 = vadd.f32 1.0, %v3603_v48 }
 0x24e   : > { %v3607_v6 = vpop.eup %3606  ;;  %3608 = vrcp.f32 %v2972_v16  ;;  %v2973_v27 = vadd.f32 1.0, %v3605_v60 }
 0x24f   : > { %3610 = vrcp.f32 %v2970_v21  ;;  %v2971_v8 = vadd.f32 1.0, %v3607_v6 }
 0x250   : > { %3612 = vrcp.f32 %v2973_v27 }
 0x251   : > { %3614 = vrcp.f32 %v2971_v8 }
 0x258   : > { %v3609_v4 = vpop.eup %3608 }
 0x259   : > { %v3611_v41 = vpop.eup %3610  ;;  %v3036_v45 = vmul.f32 %v3609_v4, %v2792_v63 }
 0x25a   : > { %v3613_v53 = vpop.eup %3612  ;;  %v3034_v61 = vmul.f32 %v3611_v41, %v2784_v37 }
 0x25b   : > { %v3615_v20 = vpop.eup %3614  ;;  %3068 = vst [vmem:[%s4976_s21 + $0x70] sm:$0xff] %v3036_v45  ;;  %v3037_v55 = vmul.f32 %v3613_v53, %v2795_v33 }
 0x25c   : > { %3066 = vst [vmem:[%s4976_s21 + $0x60] sm:$0xff] %v3034_v61  ;;  %v3035_v34 = vmul.f32 %v3615_v20, %v2787_v40 }
 0x25d   : > { %3069 = vst [vmem:[%s4976_s21 + $0x78] sm:$0xff] %v3037_v55 }
 0x25e   : > { %3067 = vst [vmem:[%s4976_s21 + $0x68] sm:$0xff] %v3035_v34 }
 0x265   : > { %v3325_v18 = vpop.f32.mrb[12].mxu1 }
 0x266   : > { %v2856_v14 = vadd.f32 %v3325_v18, %v4917_v28  ;;  %v2847_v19 = vpop.f32.mrb[13].mxu1 }
 0x267   : > { %v2848_v22 = vadd.f32 %v4917_v28, %v2847_v19  ;;  %v3326_v23 = vpop.f32.mrb[14].mxu1 }
 0x268   : > { %v2892_v58 = vsub.f32 0.0, %v2856_v14  ;;  %v2859_v54 = vadd.f32 %v3326_v23, %v4917_v28  ;;  %v2850_v0 = vpop.f32.mrb[15].mxu1 }
 0x269   : > { %v2890_v52 = vsub.f32 0.0, %v2848_v22  ;;  %v2851_v5 = vadd.f32 %v4917_v28, %v2850_v0 }
 0x26a   : > { %v2954_v30 = vmul.f32 1.442695, %v2892_v58  ;;  %v2893_v50 = vsub.f32 0.0, %v2859_v54 }
 0x26b   : > { %v2950_v57 = vmul.f32 1.442695, %v2890_v52  ;;  %v2891_v13 = vsub.f32 0.0, %v2851_v5 }
 0x26c   : > { %3616 = vpow2.f32 %v2954_v30  ;;  %v2956_v56 = vmul.f32 1.442695, %v2893_v50 }
 0x26d   : > { %3618 = vpow2.f32 %v2950_v57  ;;  %v2952_v24 = vmul.f32 1.442695, %v2891_v13 }
 0x26e   : > { %3620 = vpow2.f32 %v2956_v56 }
 0x26f   : > { %3622 = vpow2.f32 %v2952_v24 }
 0x276   : > { %v3617_v12 = vpop.eup %3616 }
 0x277   : > { %v3619_v31 = vpop.eup %3618  ;;  %v2988_v32 = vadd.f32 1.0, %v3617_v12 }
 0x278   : > { %v3621_v2 = vpop.eup %3620  ;;  %v2986_v11 = vadd.f32 1.0, %v3619_v31 }
 0x279   : > { %v3623_v15 = vpop.eup %3622  ;;  %3624 = vrcp.f32 %v2988_v32  ;;  %v2989_v28 = vadd.f32 1.0, %v3621_v2 }
 0x27a   : > { %3626 = vrcp.f32 %v2986_v11  ;;  %v2987_v36 = vadd.f32 1.0, %v3623_v15 }
 0x27b   : > { %3628 = vrcp.f32 %v2989_v28 }
 0x27c   : > { %3630 = vrcp.f32 %v2987_v36 }
 0x283   : > { %v3625_v25 = vpop.eup %3624 }
 0x284   : > { %v3627_v1 = vpop.eup %3626  ;;  %v3052_v3 = vmul.f32 %v3625_v25, %v2856_v14 }
 0x285   : > { %v3629_v17 = vpop.eup %3628  ;;  %v3050_v9 = vmul.f32 %v3627_v1, %v2848_v22 }
 0x286   : > { %v3631_v10 = vpop.eup %3630  ;;  %3084 = vst [vmem:[%s4976_s21 + $0xf0] sm:$0xff] %v3052_v3  ;;  %v3053_v38 = vmul.f32 %v3629_v17, %v2859_v54 }
 0x287   : > { %3082 = vst [vmem:[%s4976_s21 + $0xe0] sm:$0xff] %v3050_v9  ;;  %v3051_v39 = vmul.f32 %v3631_v10, %v2851_v5 }
 0x288   : > { %3085 = vst [vmem:[%s4976_s21 + $0xf8] sm:$0xff] %v3053_v38 }
 0x289   : > { %3083 = vst [vmem:[%s4976_s21 + $0xe8] sm:$0xff] %v3051_v39 }
 0x28a PF: > { %s17_s2 = sadd.s32 1, %s3658_s2   ;;  %s5061_s24 = smov %s3654_s1 }
 0x28b   : > { %p14_p5 = scmp.ge.s32.totalorder %s17_s2, 4   ;;  %s5062_s1 = smov %s5064_s25 }
 0x28d   :  { %16 = sbr.rel (!%p14_p5) target bundleno = 2 (0x2), region = 87 }

</bundles_post_ra>
